<compile_context>
chip_gen: v7x
topology: tpu7x:2x2x1
jax: 0.10.0
libtpu: 0.0.40
codegen_flags: <defaults>
</compile_context>

<pallas_src>
import jax
import jax.numpy as jnp
from jax import lax
from jax.experimental import pallas as pl
from jax.experimental.pallas import tpu as pltpu

_BN_EPS = 1e-5  # PyTorch BatchNorm1d default


# ---------------------------------------------------------------------------
# In-kernel helpers (operate on VMEM-resident values / refs).
# ---------------------------------------------------------------------------
def _shift_mats(length):
    """(L, L) matrices M s.t. (x @ M)[:, t] == x[:, t-1] / x[:, t+1] (zero padded)."""
    r = lax.broadcasted_iota(jnp.int32, (length, length), 0)
    c = lax.broadcasted_iota(jnp.int32, (length, length), 1)
    m_prev = jnp.where(r + 1 == c, 1.0, 0.0).astype(jnp.float32)  # col t <- x[t-1]
    m_next = jnp.where(r == c + 1, 1.0, 0.0).astype(jnp.float32)  # col t <- x[t+1]
    return m_prev, m_next


def _decim_mats(length):
    """(L, L/2) selectors picking even / odd time steps (k=2, stride-2 conv)."""
    half = length // 2
    r = lax.broadcasted_iota(jnp.int32, (length, half), 0)
    c = lax.broadcasted_iota(jnp.int32, (length, half), 1)
    s_even = jnp.where(r == 2 * c, 1.0, 0.0).astype(jnp.float32)
    s_odd = jnp.where(r == 2 * c + 1, 1.0, 0.0).astype(jnp.float32)
    return s_even, s_odd


def _conv_k3(a, w_ref, s_ref, mats, relu):
    """Conv1d(k=3, pad=1) + folded-BN bias (+ ReLU) on one sample.

    a: (Cin, L) activation (time on lanes).  w_ref: (3, Cout, Cin) tap weights
    with BN scale pre-folded.  s_ref: (Cout, 1) folded bias/shift.
    """
    m_prev, m_next = mats
    a_prev = jnp.dot(a, m_prev, preferred_element_type=jnp.float32)
    a_next = jnp.dot(a, m_next, preferred_element_type=jnp.float32)
    w0, w1, w2 = w_ref[0], w_ref[1], w_ref[2]            # (Cout, Cin)
    if w_ref.shape[2] == 1:
        # Cin == 1 (first layer): rank-1 "matmul" is cheaper as VPU broadcasts.
        y = w0 * a_prev + w1 * a + w2 * a_next
    else:
        y = (jnp.dot(w0, a_prev, preferred_element_type=jnp.float32)
             + jnp.dot(w1, a, preferred_element_type=jnp.float32)
             + jnp.dot(w2, a_next, preferred_element_type=jnp.float32))
    y = y + s_ref[...]
    return jnp.maximum(y, 0.0) if relu else y


def _conv_k2s2(a, w_ref, s_ref, mats, relu):
    """Conv1d(k=2, stride=2) ("conv instead of pooling") + folded BN (+ ReLU)."""
    s_even, s_odd = mats
    a_even = jnp.dot(a, s_even, preferred_element_type=jnp.float32)   # (Cin, L/2)
    a_odd = jnp.dot(a, s_odd, preferred_element_type=jnp.float32)
    y = (jnp.dot(w_ref[0], a_even, preferred_element_type=jnp.float32)
         + jnp.dot(w_ref[1], a_odd, preferred_element_type=jnp.float32))
    y = y + s_ref[...]
    return jnp.maximum(y, 0.0) if relu else y


def _make_kernel(n_batch, in_ch, seq_len, conv_cfg):
    """Build the whole-forward fused kernel.  conv_cfg: ((kind, relu), ...)."""
    n_conv = len(conv_cfg)

    def kernel(*refs):
        x2_ref = refs[0]                          # (N*Cin, L)   conv-branch input
        xf_ref = refs[1]                          # (N, Cin*L)   flattened input
        conv_refs = refs[2:2 + 2 * n_conv]        # (w, shift) per conv layer
        lin_refs = refs[2 + 2 * n_conv:-1]        # (w, bias) per linear layer
        o_ref = refs[-1]                          # (N, num_classes)

        # Constant shift / decimation matrices, built once and shared across
        # the batch loop (hoisted out of the loop -- no re-emitted broadcasts).
        mats = []
        length = seq_len
        for kind, _relu in conv_cfg:
            if kind == "k3":
                mats.append(_shift_mats(length))
            else:
                mats.append(_decim_mats(length))
                length //= 2

        # ---- features_up: static loop over the (tiny) batch ----
        up_rows = []
        for n in range(n_batch):
            a = x2_ref[pl.ds(n * in_ch, in_ch), :]        # (Cin, L)
            for li, (kind, relu) in enumerate(conv_cfg):
                w_ref = conv_refs[2 * li]
                s_ref = conv_refs[2 * li + 1]
                if kind == "k3":
                    a = _conv_k3(a, w_ref, s_ref, mats[li], relu)
                else:
                    a = _conv_k2s2(a, w_ref, s_ref, mats[li], relu)
            up_rows.append(a)                              # (1, L // 16)
        up = up_rows[0] if n_batch == 1 else jnp.concatenate(up_rows, axis=0)

        # ---- features_down: batched small matmuls (BN folded into weights) ----
        h = xf_ref[...]
        h = jnp.maximum(
            jnp.dot(h, lin_refs[0][...], preferred_element_type=jnp.float32)
            + lin_refs[1][...], 0.0)
        h = jnp.maximum(
            jnp.dot(h, lin_refs[2][...], preferred_element_type=jnp.float32)
            + lin_refs[3][...], 0.0)
        down = (jnp.dot(h, lin_refs[4][...], preferred_element_type=jnp.float32)
                + lin_refs[5][...])

        # ---- residual add + classifier ----
        mid = up + down
        out = (jnp.dot(mid, lin_refs[6][...], preferred_element_type=jnp.float32)
               + lin_refs[7][...])
        o_ref[...] = out.astype(o_ref.dtype)

    return kernel


# ---------------------------------------------------------------------------
# Host wrapper: BN folding + single fused pallas_call.
# ---------------------------------------------------------------------------
def zolotyh_forward(x, params):
    """ZolotyhNet_CONV_INSTEAD_POOLING forward (eval mode), one Pallas kernel."""
    n, c, l = x.shape
    x = x.astype(jnp.float32)
    x2 = x.reshape(n * c, l)          # conv branch: channels on rows, time on lanes
    xf = x.reshape(n, c * l)          # torch Flatten() order for features_down

    # Fold eval-mode BatchNorm (running stats) into the weights / biases.
    # TODO(synk): training-mode BatchNorm (batch statistics + running-stat
    # updates) is not implemented; this is the inference path.
    conv_inputs, conv_cfg = [], []
    for p in params["up"]:
        w, b = p["w"], p["b"]                     # torch layout (Cout, Cin, K)
        cout, _cin, k = w.shape
        if p["bn"] is not None:
            bn = p["bn"]
            scale = bn["gamma"] / jnp.sqrt(bn["var"] + _BN_EPS)
            shift = bn["beta"] - bn["mean"] * scale
            w = w * scale[:, None, None]
            b = b * scale + shift
            relu = True
        else:
            relu = False
        conv_inputs += [jnp.transpose(w, (2, 0, 1)),       # (K, Cout, Cin)
                        b.reshape(cout, 1)]
        conv_cfg.append(("k3" if k == 3 else "k2s2", relu))

    lin_inputs = []
    for p in list(params["down"]) + [params["classifier"]]:
        w, b = p["w"], p["b"]                     # torch layout (out, in)
        if p["bn"] is not None:
            bn = p["bn"]
            scale = bn["gamma"] / jnp.sqrt(bn["var"] + _BN_EPS)
            shift = bn["beta"] - bn["mean"] * scale
            w = w * scale[:, None]
            b = b * scale + shift
        lin_inputs += [w.T, b.reshape(1, -1)]

    num_classes = params["classifier"]["w"].shape[0]
    operands = [x2, xf] + conv_inputs + lin_inputs
    vmem = pl.BlockSpec(memory_space=pltpu.MemorySpace.VMEM)

    return pl.pallas_call(
        _make_kernel(n, c, l, tuple(conv_cfg)),
        out_shape=jax.ShapeDtypeStruct((n, num_classes), jnp.float32),
        in_specs=[vmem] * len(operands),
        out_specs=vmem,
        compiler_params=pltpu.CompilerParams(vmem_limit_bytes=32 * 1024 * 1024),
    )(*operands)


# ---------------------------------------------------------------------------
# Plain-JAX reference (for in-script validation of the kernel).
# ---------------------------------------------------------------------------
def reference_forward(x, params):
    x = x.astype(jnp.float32)
    hi = jax.lax.Precision.HIGHEST

    a = x
    for p in params["up"]:
        w, b = p["w"], p["b"]
        k = w.shape[2]
        stride = 2 if k == 2 else 1
        pad = 1 if k == 3 else 0
        a = lax.conv_general_dilated(
            a, w, window_strides=(stride,), padding=[(pad, pad)],
            dimension_numbers=("NCH", "OIH", "NCH"), precision=hi)
        a = a + b[None, :, None]
        if p["bn"] is not None:
            bn = p["bn"]
            scale = bn["gamma"] / jnp.sqrt(bn["var"] + _BN_EPS)
            a = (a - bn["mean"][None, :, None]) * scale[None, :, None] \
                + bn["beta"][None, :, None]
            a = jnp.maximum(a, 0.0)
    up = a.reshape(a.shape[0], -1)

    h = x.reshape(x.shape[0], -1)
    for p in params["down"]:
        h = jnp.dot(h, p["w"].T, precision=hi) + p["b"][None, :]
        if p["bn"] is not None:
            bn = p["bn"]
            scale = bn["gamma"] / jnp.sqrt(bn["var"] + _BN_EPS)
            h = (h - bn["mean"][None, :]) * scale[None, :] + bn["beta"][None, :]
            h = jnp.maximum(h, 0.0)

    mid = up + h
    pc = params["classifier"]
    return jnp.dot(mid, pc["w"].T, precision=hi) + pc["b"][None, :]


# ---------------------------------------------------------------------------
# Deterministic parameter initialization (matches the module's layer shapes).
# ---------------------------------------------------------------------------
def _init_bn(key, cch):
    k1, k2, k3, k4 = jax.random.split(key, 4)
    return {
        "gamma": 1.0 + 0.1 * jax.random.normal(k1, (cch,), jnp.float32),
        "beta": 0.1 * jax.random.normal(k2, (cch,), jnp.float32),
        "mean": 0.1 * jax.random.normal(k3, (cch,), jnp.float32),
        "var": 1.0 + 0.1 * jnp.abs(jax.random.normal(k4, (cch,), jnp.float32)),
    }


def init_params(key, input_shape, num_classes=8):
    """input_shape = (L, channels), mirroring the PyTorch module's usage."""
    l, c = input_shape
    conv_defs = [  # (cin, cout, kernel, has_bn_relu)
        (c, 8, 3, True), (8, 8, 2, True),
        (8, 16, 3, True), (16, 16, 2, True),
        (16, 32, 3, True), (32, 32, 2, True),
        (32, 32, 3, True), (32, 32, 2, True),
        (32, 1, 3, False),
    ]
    params = {"up": [], "down": [], "classifier": None}
    for cin, cout, k, bn in conv_defs:
        key, kw, kb, kbn = jax.random.split(key, 4)
        params["up"].append({
            "w": jax.random.normal(kw, (cout, cin, k), jnp.float32) / jnp.sqrt(cin * k),
            "b": 0.05 * jax.random.normal(kb, (cout,), jnp.float32),
            "bn": _init_bn(kbn, cout) if bn else None,
        })
    lin_defs = [(l * c, 64, True), (64, 16, True), (16, l // 16, False)]
    for fin, fout, bn in lin_defs:
        key, kw, kb, kbn = jax.random.split(key, 4)
        params["down"].append({
            "w": jax.random.normal(kw, (fout, fin), jnp.float32) / jnp.sqrt(fin),
            "b": 0.05 * jax.random.normal(kb, (fout,), jnp.float32),
            "bn": _init_bn(kbn, fout) if bn else None,
        })
    key, kw, kb = jax.random.split(key, 3)
    params["classifier"] = {
        "w": jax.random.normal(kw, (num_classes, l // 16), jnp.float32)
             / jnp.sqrt(l // 16),
        "b": 0.05 * jax.random.normal(kb, (num_classes,), jnp.float32),
        "bn": None,
    }
    return params


if __name__ == "__main__":
    key = jax.random.PRNGKey(0)
    pkey, xkey = jax.random.split(key)

    L, C, N, NUM_CLASSES = 64, 1, 2, 8       # input_shape = (64, 1), batch 2
    params = init_params(pkey, input_shape=(L, C), num_classes=NUM_CLASSES)
    x = jax.random.normal(xkey, (N, C, L), jnp.float32)

    fwd = jax.jit(zolotyh_forward)
    out = fwd(x, params)
    jax.block_until_ready(out)

    assert out.shape == (N, NUM_CLASSES), out.shape
    assert bool(jnp.all(jnp.isfinite(out)))

    ref = jax.jit(reference_forward)(x, params)
    jax.block_until_ready(ref)
    max_err = float(jnp.max(jnp.abs(out - ref)))
    assert bool(jnp.allclose(out, ref, rtol=5e-2, atol=5e-2)), max_err

    print("KERNEL_OK")
</pallas_src>

<mosaic_0001>
module attributes {stable_mosaic.version = 11 : i64} {
  func.func @kernel(%arg0: memref<2x64xf32, #tpu.memory_space<vmem>>, %arg1: memref<2x64xf32, #tpu.memory_space<vmem>>, %arg2: memref<3x8x1xf32, #tpu.memory_space<vmem>>, %arg3: memref<8x1xf32, #tpu.memory_space<vmem>>, %arg4: memref<2x8x8xf32, #tpu.memory_space<vmem>>, %arg5: memref<8x1xf32, #tpu.memory_space<vmem>>, %arg6: memref<3x16x8xf32, #tpu.memory_space<vmem>>, %arg7: memref<16x1xf32, #tpu.memory_space<vmem>>, %arg8: memref<2x16x16xf32, #tpu.memory_space<vmem>>, %arg9: memref<16x1xf32, #tpu.memory_space<vmem>>, %arg10: memref<3x32x16xf32, #tpu.memory_space<vmem>>, %arg11: memref<32x1xf32, #tpu.memory_space<vmem>>, %arg12: memref<2x32x32xf32, #tpu.memory_space<vmem>>, %arg13: memref<32x1xf32, #tpu.memory_space<vmem>>, %arg14: memref<3x32x32xf32, #tpu.memory_space<vmem>>, %arg15: memref<32x1xf32, #tpu.memory_space<vmem>>, %arg16: memref<2x32x32xf32, #tpu.memory_space<vmem>>, %arg17: memref<32x1xf32, #tpu.memory_space<vmem>>, %arg18: memref<3x1x32xf32, #tpu.memory_space<vmem>>, %arg19: memref<1x1xf32, #tpu.memory_space<vmem>>, %arg20: memref<64x64xf32, #tpu.memory_space<vmem>>, %arg21: memref<1x64xf32, #tpu.memory_space<vmem>>, %arg22: memref<64x16xf32, #tpu.memory_space<vmem>>, %arg23: memref<1x16xf32, #tpu.memory_space<vmem>>, %arg24: memref<16x4xf32, #tpu.memory_space<vmem>>, %arg25: memref<1x4xf32, #tpu.memory_space<vmem>>, %arg26: memref<4x8xf32, #tpu.memory_space<vmem>>, %arg27: memref<1x8xf32, #tpu.memory_space<vmem>>, %arg28: memref<2x8xf32, #tpu.memory_space<vmem>>) attributes {dimension_semantics = [], scalar_prefetch = 0 : i64, scratch_operands = 0 : i64, tpu.core_type = #tpu.core_type<tc>} {
    %0 = tpu.iota {dimensions = array<i32: 0>} : vector<64x64xi32>
    %1 = tpu.iota {dimensions = array<i32: 1>} : vector<64x64xi32>
    %c1_i32 = arith.constant 1 : i32
    %2 = vector.broadcast %c1_i32 : i32 to vector<64x64xi32>
    %3 = arith.addi %0, %2 : vector<64x64xi32>
    %4 = arith.cmpi eq, %3, %1 : vector<64x64xi32>
    %cst = arith.constant 1.000000e+00 : f32
    %cst_0 = arith.constant 0.000000e+00 : f32
    %5 = vector.broadcast %cst : f32 to vector<64x64xf32>
    %6 = vector.broadcast %cst_0 : f32 to vector<64x64xf32>
    %7 = arith.select %4, %5, %6 : vector<64x64xi1>, vector<64x64xf32>
    %c1_i32_1 = arith.constant 1 : i32
    %8 = vector.broadcast %c1_i32_1 : i32 to vector<64x64xi32>
    %9 = arith.addi %1, %8 : vector<64x64xi32>
    %10 = arith.cmpi eq, %0, %9 : vector<64x64xi32>
    %cst_2 = arith.constant 1.000000e+00 : f32
    %cst_3 = arith.constant 0.000000e+00 : f32
    %11 = vector.broadcast %cst_2 : f32 to vector<64x64xf32>
    %12 = vector.broadcast %cst_3 : f32 to vector<64x64xf32>
    %13 = arith.select %10, %11, %12 : vector<64x64xi1>, vector<64x64xf32>
    %14 = tpu.iota {dimensions = array<i32: 0>} : vector<64x32xi32>
    %15 = tpu.iota {dimensions = array<i32: 1>} : vector<64x32xi32>
    %c2_i32 = arith.constant 2 : i32
    %16 = vector.broadcast %c2_i32 : i32 to vector<64x32xi32>
    %17 = arith.muli %16, %15 : vector<64x32xi32>
    %18 = arith.cmpi eq, %14, %17 : vector<64x32xi32>
    %cst_4 = arith.constant 1.000000e+00 : f32
    %cst_5 = arith.constant 0.000000e+00 : f32
    %19 = vector.broadcast %cst_4 : f32 to vector<64x32xf32>
    %20 = vector.broadcast %cst_5 : f32 to vector<64x32xf32>
    %21 = arith.select %18, %19, %20 : vector<64x32xi1>, vector<64x32xf32>
    %c2_i32_6 = arith.constant 2 : i32
    %22 = vector.broadcast %c2_i32_6 : i32 to vector<64x32xi32>
    %23 = arith.muli %22, %15 : vector<64x32xi32>
    %c1_i32_7 = arith.constant 1 : i32
    %24 = vector.broadcast %c1_i32_7 : i32 to vector<64x32xi32>
    %25 = arith.addi %23, %24 : vector<64x32xi32>
    %26 = arith.cmpi eq, %14, %25 : vector<64x32xi32>
    %cst_8 = arith.constant 1.000000e+00 : f32
    %cst_9 = arith.constant 0.000000e+00 : f32
    %27 = vector.broadcast %cst_8 : f32 to vector<64x32xf32>
    %28 = vector.broadcast %cst_9 : f32 to vector<64x32xf32>
    %29 = arith.select %26, %27, %28 : vector<64x32xi1>, vector<64x32xf32>
    %30 = tpu.iota {dimensions = array<i32: 0>} : vector<32x32xi32>
    %31 = tpu.iota {dimensions = array<i32: 1>} : vector<32x32xi32>
    %c1_i32_10 = arith.constant 1 : i32
    %32 = vector.broadcast %c1_i32_10 : i32 to vector<32x32xi32>
    %33 = arith.addi %30, %32 : vector<32x32xi32>
    %34 = arith.cmpi eq, %33, %31 : vector<32x32xi32>
    %cst_11 = arith.constant 1.000000e+00 : f32
    %cst_12 = arith.constant 0.000000e+00 : f32
    %35 = vector.broadcast %cst_11 : f32 to vector<32x32xf32>
    %36 = vector.broadcast %cst_12 : f32 to vector<32x32xf32>
    %37 = arith.select %34, %35, %36 : vector<32x32xi1>, vector<32x32xf32>
    %c1_i32_13 = arith.constant 1 : i32
    %38 = vector.broadcast %c1_i32_13 : i32 to vector<32x32xi32>
    %39 = arith.addi %31, %38 : vector<32x32xi32>
    %40 = arith.cmpi eq, %30, %39 : vector<32x32xi32>
    %cst_14 = arith.constant 1.000000e+00 : f32
    %cst_15 = arith.constant 0.000000e+00 : f32
    %41 = vector.broadcast %cst_14 : f32 to vector<32x32xf32>
    %42 = vector.broadcast %cst_15 : f32 to vector<32x32xf32>
    %43 = arith.select %40, %41, %42 : vector<32x32xi1>, vector<32x32xf32>
    %44 = tpu.iota {dimensions = array<i32: 0>} : vector<32x16xi32>
    %45 = tpu.iota {dimensions = array<i32: 1>} : vector<32x16xi32>
    %c2_i32_16 = arith.constant 2 : i32
    %46 = vector.broadcast %c2_i32_16 : i32 to vector<32x16xi32>
    %47 = arith.muli %46, %45 : vector<32x16xi32>
    %48 = arith.cmpi eq, %44, %47 : vector<32x16xi32>
    %cst_17 = arith.constant 1.000000e+00 : f32
    %cst_18 = arith.constant 0.000000e+00 : f32
    %49 = vector.broadcast %cst_17 : f32 to vector<32x16xf32>
    %50 = vector.broadcast %cst_18 : f32 to vector<32x16xf32>
    %51 = arith.select %48, %49, %50 : vector<32x16xi1>, vector<32x16xf32>
    %c2_i32_19 = arith.constant 2 : i32
    %52 = vector.broadcast %c2_i32_19 : i32 to vector<32x16xi32>
    %53 = arith.muli %52, %45 : vector<32x16xi32>
    %c1_i32_20 = arith.constant 1 : i32
    %54 = vector.broadcast %c1_i32_20 : i32 to vector<32x16xi32>
    %55 = arith.addi %53, %54 : vector<32x16xi32>
    %56 = arith.cmpi eq, %44, %55 : vector<32x16xi32>
    %cst_21 = arith.constant 1.000000e+00 : f32
    %cst_22 = arith.constant 0.000000e+00 : f32
    %57 = vector.broadcast %cst_21 : f32 to vector<32x16xf32>
    %58 = vector.broadcast %cst_22 : f32 to vector<32x16xf32>
    %59 = arith.select %56, %57, %58 : vector<32x16xi1>, vector<32x16xf32>
    %60 = tpu.iota {dimensions = array<i32: 0>} : vector<16x16xi32>
    %61 = tpu.iota {dimensions = array<i32: 1>} : vector<16x16xi32>
    %c1_i32_23 = arith.constant 1 : i32
    %62 = vector.broadcast %c1_i32_23 : i32 to vector<16x16xi32>
    %63 = arith.addi %60, %62 : vector<16x16xi32>
    %64 = arith.cmpi eq, %63, %61 : vector<16x16xi32>
    %cst_24 = arith.constant 1.000000e+00 : f32
    %cst_25 = arith.constant 0.000000e+00 : f32
    %65 = vector.broadcast %cst_24 : f32 to vector<16x16xf32>
    %66 = vector.broadcast %cst_25 : f32 to vector<16x16xf32>
    %67 = arith.select %64, %65, %66 : vector<16x16xi1>, vector<16x16xf32>
    %c1_i32_26 = arith.constant 1 : i32
    %68 = vector.broadcast %c1_i32_26 : i32 to vector<16x16xi32>
    %69 = arith.addi %61, %68 : vector<16x16xi32>
    %70 = arith.cmpi eq, %60, %69 : vector<16x16xi32>
    %cst_27 = arith.constant 1.000000e+00 : f32
    %cst_28 = arith.constant 0.000000e+00 : f32
    %71 = vector.broadcast %cst_27 : f32 to vector<16x16xf32>
    %72 = vector.broadcast %cst_28 : f32 to vector<16x16xf32>
    %73 = arith.select %70, %71, %72 : vector<16x16xi1>, vector<16x16xf32>
    %74 = tpu.iota {dimensions = array<i32: 0>} : vector<16x8xi32>
    %75 = tpu.iota {dimensions = array<i32: 1>} : vector<16x8xi32>
    %c2_i32_29 = arith.constant 2 : i32
    %76 = vector.broadcast %c2_i32_29 : i32 to vector<16x8xi32>
    %77 = arith.muli %76, %75 : vector<16x8xi32>
    %78 = arith.cmpi eq, %74, %77 : vector<16x8xi32>
    %cst_30 = arith.constant 1.000000e+00 : f32
    %cst_31 = arith.constant 0.000000e+00 : f32
    %79 = vector.broadcast %cst_30 : f32 to vector<16x8xf32>
    %80 = vector.broadcast %cst_31 : f32 to vector<16x8xf32>
    %81 = arith.select %78, %79, %80 : vector<16x8xi1>, vector<16x8xf32>
    %c2_i32_32 = arith.constant 2 : i32
    %82 = vector.broadcast %c2_i32_32 : i32 to vector<16x8xi32>
    %83 = arith.muli %82, %75 : vector<16x8xi32>
    %c1_i32_33 = arith.constant 1 : i32
    %84 = vector.broadcast %c1_i32_33 : i32 to vector<16x8xi32>
    %85 = arith.addi %83, %84 : vector<16x8xi32>
    %86 = arith.cmpi eq, %74, %85 : vector<16x8xi32>
    %cst_34 = arith.constant 1.000000e+00 : f32
    %cst_35 = arith.constant 0.000000e+00 : f32
    %87 = vector.broadcast %cst_34 : f32 to vector<16x8xf32>
    %88 = vector.broadcast %cst_35 : f32 to vector<16x8xf32>
    %89 = arith.select %86, %87, %88 : vector<16x8xi1>, vector<16x8xf32>
    %90 = tpu.iota {dimensions = array<i32: 0>} : vector<8x8xi32>
    %91 = tpu.iota {dimensions = array<i32: 1>} : vector<8x8xi32>
    %c1_i32_36 = arith.constant 1 : i32
    %92 = vector.broadcast %c1_i32_36 : i32 to vector<8x8xi32>
    %93 = arith.addi %90, %92 : vector<8x8xi32>
    %94 = arith.cmpi eq, %93, %91 : vector<8x8xi32>
    %cst_37 = arith.constant 1.000000e+00 : f32
    %cst_38 = arith.constant 0.000000e+00 : f32
    %95 = vector.broadcast %cst_37 : f32 to vector<8x8xf32>
    %96 = vector.broadcast %cst_38 : f32 to vector<8x8xf32>
    %97 = arith.select %94, %95, %96 : vector<8x8xi1>, vector<8x8xf32>
    %c1_i32_39 = arith.constant 1 : i32
    %98 = vector.broadcast %c1_i32_39 : i32 to vector<8x8xi32>
    %99 = arith.addi %91, %98 : vector<8x8xi32>
    %100 = arith.cmpi eq, %90, %99 : vector<8x8xi32>
    %cst_40 = arith.constant 1.000000e+00 : f32
    %cst_41 = arith.constant 0.000000e+00 : f32
    %101 = vector.broadcast %cst_40 : f32 to vector<8x8xf32>
    %102 = vector.broadcast %cst_41 : f32 to vector<8x8xf32>
    %103 = arith.select %100, %101, %102 : vector<8x8xi1>, vector<8x8xf32>
    %104 = tpu.iota {dimensions = array<i32: 0>} : vector<8x4xi32>
    %105 = tpu.iota {dimensions = array<i32: 1>} : vector<8x4xi32>
    %c2_i32_42 = arith.constant 2 : i32
    %106 = vector.broadcast %c2_i32_42 : i32 to vector<8x4xi32>
    %107 = arith.muli %106, %105 : vector<8x4xi32>
    %108 = arith.cmpi eq, %104, %107 : vector<8x4xi32>
    %cst_43 = arith.constant 1.000000e+00 : f32
    %cst_44 = arith.constant 0.000000e+00 : f32
    %109 = vector.broadcast %cst_43 : f32 to vector<8x4xf32>
    %110 = vector.broadcast %cst_44 : f32 to vector<8x4xf32>
    %111 = arith.select %108, %109, %110 : vector<8x4xi1>, vector<8x4xf32>
    %c2_i32_45 = arith.constant 2 : i32
    %112 = vector.broadcast %c2_i32_45 : i32 to vector<8x4xi32>
    %113 = arith.muli %112, %105 : vector<8x4xi32>
    %c1_i32_46 = arith.constant 1 : i32
    %114 = vector.broadcast %c1_i32_46 : i32 to vector<8x4xi32>
    %115 = arith.addi %113, %114 : vector<8x4xi32>
    %116 = arith.cmpi eq, %104, %115 : vector<8x4xi32>
    %cst_47 = arith.constant 1.000000e+00 : f32
    %cst_48 = arith.constant 0.000000e+00 : f32
    %117 = vector.broadcast %cst_47 : f32 to vector<8x4xf32>
    %118 = vector.broadcast %cst_48 : f32 to vector<8x4xf32>
    %119 = arith.select %116, %117, %118 : vector<8x4xi1>, vector<8x4xf32>
    %120 = tpu.iota {dimensions = array<i32: 0>} : vector<4x4xi32>
    %121 = tpu.iota {dimensions = array<i32: 1>} : vector<4x4xi32>
    %c1_i32_49 = arith.constant 1 : i32
    %122 = vector.broadcast %c1_i32_49 : i32 to vector<4x4xi32>
    %123 = arith.addi %120, %122 : vector<4x4xi32>
    %124 = arith.cmpi eq, %123, %121 : vector<4x4xi32>
    %cst_50 = arith.constant 1.000000e+00 : f32
    %cst_51 = arith.constant 0.000000e+00 : f32
    %125 = vector.broadcast %cst_50 : f32 to vector<4x4xf32>
    %126 = vector.broadcast %cst_51 : f32 to vector<4x4xf32>
    %127 = arith.select %124, %125, %126 : vector<4x4xi1>, vector<4x4xf32>
    %c1_i32_52 = arith.constant 1 : i32
    %128 = vector.broadcast %c1_i32_52 : i32 to vector<4x4xi32>
    %129 = arith.addi %121, %128 : vector<4x4xi32>
    %130 = arith.cmpi eq, %120, %129 : vector<4x4xi32>
    %cst_53 = arith.constant 1.000000e+00 : f32
    %cst_54 = arith.constant 0.000000e+00 : f32
    %131 = vector.broadcast %cst_53 : f32 to vector<4x4xf32>
    %132 = vector.broadcast %cst_54 : f32 to vector<4x4xf32>
    %133 = arith.select %130, %131, %132 : vector<4x4xi1>, vector<4x4xf32>
    %c0 = arith.constant 0 : index
    %c0_55 = arith.constant 0 : index
    %134 = vector.load %arg0[%c0, %c0_55] : memref<2x64xf32, #tpu.memory_space<vmem>>, vector<1x64xf32>
    %cst_56 = arith.constant dense<0.000000e+00> : vector<1x64xf32>
    %135 = tpu.matmul %134, %7, %cst_56 {dimension_numbers = #tpu.dot_dimension_numbers<[1], [0], [0], [1], [0, 0, 1, 1], [], []>} : vector<1x64xf32>, vector<64x64xf32>, vector<1x64xf32> -> vector<1x64xf32>
    %cst_57 = arith.constant dense<0.000000e+00> : vector<1x64xf32>
    %136 = tpu.matmul %134, %13, %cst_57 {dimension_numbers = #tpu.dot_dimension_numbers<[1], [0], [0], [1], [0, 0, 1, 1], [], []>} : vector<1x64xf32>, vector<64x64xf32>, vector<1x64xf32> -> vector<1x64xf32>
    %c0_58 = arith.constant 0 : index
    %c0_59 = arith.constant 0 : index
    %c0_60 = arith.constant 0 : index
    %137 = vector.load %arg2[%c0_58, %c0_59, %c0_60] : memref<3x8x1xf32, #tpu.memory_space<vmem>>, vector<1x8x1xf32>
    %138 = vector.shape_cast %137 : vector<1x8x1xf32> to vector<8x1xf32>
    %c1 = arith.constant 1 : index
    %c0_61 = arith.constant 0 : index
    %c0_62 = arith.constant 0 : index
    %139 = vector.load %arg2[%c1, %c0_61, %c0_62] : memref<3x8x1xf32, #tpu.memory_space<vmem>>, vector<1x8x1xf32>
    %140 = vector.shape_cast %139 : vector<1x8x1xf32> to vector<8x1xf32>
    %c2 = arith.constant 2 : index
    %c0_63 = arith.constant 0 : index
    %c0_64 = arith.constant 0 : index
    %141 = vector.load %arg2[%c2, %c0_63, %c0_64] : memref<3x8x1xf32, #tpu.memory_space<vmem>>, vector<1x8x1xf32>
    %142 = vector.shape_cast %141 : vector<1x8x1xf32> to vector<8x1xf32>
    %143 = vector.broadcast %138 : vector<8x1xf32> to vector<8x64xf32>
    %144 = vector.broadcast %135 : vector<1x64xf32> to vector<8x64xf32>
    %145 = arith.mulf %143, %144 : vector<8x64xf32>
    %146 = vector.broadcast %140 : vector<8x1xf32> to vector<8x64xf32>
    %147 = vector.broadcast %134 : vector<1x64xf32> to vector<8x64xf32>
    %148 = arith.mulf %146, %147 : vector<8x64xf32>
    %149 = arith.addf %145, %148 : vector<8x64xf32>
    %150 = vector.broadcast %142 : vector<8x1xf32> to vector<8x64xf32>
    %151 = vector.broadcast %136 : vector<1x64xf32> to vector<8x64xf32>
    %152 = arith.mulf %150, %151 : vector<8x64xf32>
    %153 = arith.addf %149, %152 : vector<8x64xf32>
    %c0_65 = arith.constant 0 : index
    %c0_66 = arith.constant 0 : index
    %154 = vector.load %arg3[%c0_65, %c0_66] : memref<8x1xf32, #tpu.memory_space<vmem>>, vector<8x1xf32>
    %155 = vector.broadcast %154 : vector<8x1xf32> to vector<8x64xf32>
    %156 = arith.addf %153, %155 : vector<8x64xf32>
    %cst_67 = arith.constant 0.000000e+00 : f32
    %157 = vector.broadcast %cst_67 : f32 to vector<8x64xf32>
    %158 = arith.maximumf %156, %157 : vector<8x64xf32>
    %cst_68 = arith.constant dense<0.000000e+00> : vector<8x32xf32>
    %159 = tpu.matmul %158, %21, %cst_68 {dimension_numbers = #tpu.dot_dimension_numbers<[1], [0], [0], [1], [0, 0, 1, 1], [], []>} : vector<8x64xf32>, vector<64x32xf32>, vector<8x32xf32> -> vector<8x32xf32>
    %cst_69 = arith.constant dense<0.000000e+00> : vector<8x32xf32>
    %160 = tpu.matmul %158, %29, %cst_69 {dimension_numbers = #tpu.dot_dimension_numbers<[1], [0], [0], [1], [0, 0, 1, 1], [], []>} : vector<8x64xf32>, vector<64x32xf32>, vector<8x32xf32> -> vector<8x32xf32>
    %c0_70 = arith.constant 0 : index
    %c0_71 = arith.constant 0 : index
    %c0_72 = arith.constant 0 : index
    %161 = vector.load %arg4[%c0_70, %c0_71, %c0_72] : memref<2x8x8xf32, #tpu.memory_space<vmem>>, vector<1x8x8xf32>
    %162 = vector.shape_cast %161 : vector<1x8x8xf32> to vector<8x8xf32>
    %cst_73 = arith.constant dense<0.000000e+00> : vector<8x32xf32>
    %163 = tpu.matmul %162, %159, %cst_73 {dimension_numbers = #tpu.dot_dimension_numbers<[1], [0], [0], [1], [0, 0, 1, 1], [], []>} : vector<8x8xf32>, vector<8x32xf32>, vector<8x32xf32> -> vector<8x32xf32>
    %c1_74 = arith.constant 1 : index
    %c0_75 = arith.constant 0 : index
    %c0_76 = arith.constant 0 : index
    %164 = vector.load %arg4[%c1_74, %c0_75, %c0_76] : memref<2x8x8xf32, #tpu.memory_space<vmem>>, vector<1x8x8xf32>
    %165 = vector.shape_cast %164 : vector<1x8x8xf32> to vector<8x8xf32>
    %cst_77 = arith.constant dense<0.000000e+00> : vector<8x32xf32>
    %166 = tpu.matmul %165, %160, %cst_77 {dimension_numbers = #tpu.dot_dimension_numbers<[1], [0], [0], [1], [0, 0, 1, 1], [], []>} : vector<8x8xf32>, vector<8x32xf32>, vector<8x32xf32> -> vector<8x32xf32>
    %167 = arith.addf %163, %166 : vector<8x32xf32>
    %c0_78 = arith.constant 0 : index
    %c0_79 = arith.constant 0 : index
    %168 = vector.load %arg5[%c0_78, %c0_79] : memref<8x1xf32, #tpu.memory_space<vmem>>, vector<8x1xf32>
    %169 = vector.broadcast %168 : vector<8x1xf32> to vector<8x32xf32>
    %170 = arith.addf %167, %169 : vector<8x32xf32>
    %cst_80 = arith.constant 0.000000e+00 : f32
    %171 = vector.broadcast %cst_80 : f32 to vector<8x32xf32>
    %172 = arith.maximumf %170, %171 : vector<8x32xf32>
    %cst_81 = arith.constant dense<0.000000e+00> : vector<8x32xf32>
    %173 = tpu.matmul %172, %37, %cst_81 {dimension_numbers = #tpu.dot_dimension_numbers<[1], [0], [0], [1], [0, 0, 1, 1], [], []>} : vector<8x32xf32>, vector<32x32xf32>, vector<8x32xf32> -> vector<8x32xf32>
    %cst_82 = arith.constant dense<0.000000e+00> : vector<8x32xf32>
    %174 = tpu.matmul %172, %43, %cst_82 {dimension_numbers = #tpu.dot_dimension_numbers<[1], [0], [0], [1], [0, 0, 1, 1], [], []>} : vector<8x32xf32>, vector<32x32xf32>, vector<8x32xf32> -> vector<8x32xf32>
    %c0_83 = arith.constant 0 : index
    %c0_84 = arith.constant 0 : index
    %c0_85 = arith.constant 0 : index
    %175 = vector.load %arg6[%c0_83, %c0_84, %c0_85] : memref<3x16x8xf32, #tpu.memory_space<vmem>>, vector<1x16x8xf32>
    %176 = vector.shape_cast %175 : vector<1x16x8xf32> to vector<16x8xf32>
    %c1_86 = arith.constant 1 : index
    %c0_87 = arith.constant 0 : index
    %c0_88 = arith.constant 0 : index
    %177 = vector.load %arg6[%c1_86, %c0_87, %c0_88] : memref<3x16x8xf32, #tpu.memory_space<vmem>>, vector<1x16x8xf32>
    %178 = vector.shape_cast %177 : vector<1x16x8xf32> to vector<16x8xf32>
    %c2_89 = arith.constant 2 : index
    %c0_90 = arith.constant 0 : index
    %c0_91 = arith.constant 0 : index
    %179 = vector.load %arg6[%c2_89, %c0_90, %c0_91] : memref<3x16x8xf32, #tpu.memory_space<vmem>>, vector<1x16x8xf32>
    %180 = vector.shape_cast %179 : vector<1x16x8xf32> to vector<16x8xf32>
    %cst_92 = arith.constant dense<0.000000e+00> : vector<16x32xf32>
    %181 = tpu.matmul %176, %173, %cst_92 {dimension_numbers = #tpu.dot_dimension_numbers<[1], [0], [0], [1], [0, 0, 1, 1], [], []>} : vector<16x8xf32>, vector<8x32xf32>, vector<16x32xf32> -> vector<16x32xf32>
    %cst_93 = arith.constant dense<0.000000e+00> : vector<16x32xf32>
    %182 = tpu.matmul %178, %172, %cst_93 {dimension_numbers = #tpu.dot_dimension_numbers<[1], [0], [0], [1], [0, 0, 1, 1], [], []>} : vector<16x8xf32>, vector<8x32xf32>, vector<16x32xf32> -> vector<16x32xf32>
    %183 = arith.addf %181, %182 : vector<16x32xf32>
    %cst_94 = arith.constant dense<0.000000e+00> : vector<16x32xf32>
    %184 = tpu.matmul %180, %174, %cst_94 {dimension_numbers = #tpu.dot_dimension_numbers<[1], [0], [0], [1], [0, 0, 1, 1], [], []>} : vector<16x8xf32>, vector<8x32xf32>, vector<16x32xf32> -> vector<16x32xf32>
    %185 = arith.addf %183, %184 : vector<16x32xf32>
    %c0_95 = arith.constant 0 : index
    %c0_96 = arith.constant 0 : index
    %186 = vector.load %arg7[%c0_95, %c0_96] : memref<16x1xf32, #tpu.memory_space<vmem>>, vector<16x1xf32>
    %187 = vector.broadcast %186 : vector<16x1xf32> to vector<16x32xf32>
    %188 = arith.addf %185, %187 : vector<16x32xf32>
    %cst_97 = arith.constant 0.000000e+00 : f32
    %189 = vector.broadcast %cst_97 : f32 to vector<16x32xf32>
    %190 = arith.maximumf %188, %189 : vector<16x32xf32>
    %cst_98 = arith.constant dense<0.000000e+00> : vector<16x16xf32>
    %191 = tpu.matmul %190, %51, %cst_98 {dimension_numbers = #tpu.dot_dimension_numbers<[1], [0], [0], [1], [0, 0, 1, 1], [], []>} : vector<16x32xf32>, vector<32x16xf32>, vector<16x16xf32> -> vector<16x16xf32>
    %cst_99 = arith.constant dense<0.000000e+00> : vector<16x16xf32>
    %192 = tpu.matmul %190, %59, %cst_99 {dimension_numbers = #tpu.dot_dimension_numbers<[1], [0], [0], [1], [0, 0, 1, 1], [], []>} : vector<16x32xf32>, vector<32x16xf32>, vector<16x16xf32> -> vector<16x16xf32>
    %c0_100 = arith.constant 0 : index
    %c0_101 = arith.constant 0 : index
    %c0_102 = arith.constant 0 : index
    %193 = vector.load %arg8[%c0_100, %c0_101, %c0_102] : memref<2x16x16xf32, #tpu.memory_space<vmem>>, vector<1x16x16xf32>
    %194 = vector.shape_cast %193 : vector<1x16x16xf32> to vector<16x16xf32>
    %cst_103 = arith.constant dense<0.000000e+00> : vector<16x16xf32>
    %195 = tpu.matmul %194, %191, %cst_103 {dimension_numbers = #tpu.dot_dimension_numbers<[1], [0], [0], [1], [0, 0, 1, 1], [], []>} : vector<16x16xf32>, vector<16x16xf32>, vector<16x16xf32> -> vector<16x16xf32>
    %c1_104 = arith.constant 1 : index
    %c0_105 = arith.constant 0 : index
    %c0_106 = arith.constant 0 : index
    %196 = vector.load %arg8[%c1_104, %c0_105, %c0_106] : memref<2x16x16xf32, #tpu.memory_space<vmem>>, vector<1x16x16xf32>
    %197 = vector.shape_cast %196 : vector<1x16x16xf32> to vector<16x16xf32>
    %cst_107 = arith.constant dense<0.000000e+00> : vector<16x16xf32>
    %198 = tpu.matmul %197, %192, %cst_107 {dimension_numbers = #tpu.dot_dimension_numbers<[1], [0], [0], [1], [0, 0, 1, 1], [], []>} : vector<16x16xf32>, vector<16x16xf32>, vector<16x16xf32> -> vector<16x16xf32>
    %199 = arith.addf %195, %198 : vector<16x16xf32>
    %c0_108 = arith.constant 0 : index
    %c0_109 = arith.constant 0 : index
    %200 = vector.load %arg9[%c0_108, %c0_109] : memref<16x1xf32, #tpu.memory_space<vmem>>, vector<16x1xf32>
    %201 = vector.broadcast %200 : vector<16x1xf32> to vector<16x16xf32>
    %202 = arith.addf %199, %201 : vector<16x16xf32>
    %cst_110 = arith.constant 0.000000e+00 : f32
    %203 = vector.broadcast %cst_110 : f32 to vector<16x16xf32>
    %204 = arith.maximumf %202, %203 : vector<16x16xf32>
    %cst_111 = arith.constant dense<0.000000e+00> : vector<16x16xf32>
    %205 = tpu.matmul %204, %67, %cst_111 {dimension_numbers = #tpu.dot_dimension_numbers<[1], [0], [0], [1], [0, 0, 1, 1], [], []>} : vector<16x16xf32>, vector<16x16xf32>, vector<16x16xf32> -> vector<16x16xf32>
    %cst_112 = arith.constant dense<0.000000e+00> : vector<16x16xf32>
    %206 = tpu.matmul %204, %73, %cst_112 {dimension_numbers = #tpu.dot_dimension_numbers<[1], [0], [0], [1], [0, 0, 1, 1], [], []>} : vector<16x16xf32>, vector<16x16xf32>, vector<16x16xf32> -> vector<16x16xf32>
    %c0_113 = arith.constant 0 : index
    %c0_114 = arith.constant 0 : index
    %c0_115 = arith.constant 0 : index
    %207 = vector.load %arg10[%c0_113, %c0_114, %c0_115] : memref<3x32x16xf32, #tpu.memory_space<vmem>>, vector<1x32x16xf32>
    %208 = vector.shape_cast %207 : vector<1x32x16xf32> to vector<32x16xf32>
    %c1_116 = arith.constant 1 : index
    %c0_117 = arith.constant 0 : index
    %c0_118 = arith.constant 0 : index
    %209 = vector.load %arg10[%c1_116, %c0_117, %c0_118] : memref<3x32x16xf32, #tpu.memory_space<vmem>>, vector<1x32x16xf32>
    %210 = vector.shape_cast %209 : vector<1x32x16xf32> to vector<32x16xf32>
    %c2_119 = arith.constant 2 : index
    %c0_120 = arith.constant 0 : index
    %c0_121 = arith.constant 0 : index
    %211 = vector.load %arg10[%c2_119, %c0_120, %c0_121] : memref<3x32x16xf32, #tpu.memory_space<vmem>>, vector<1x32x16xf32>
    %212 = vector.shape_cast %211 : vector<1x32x16xf32> to vector<32x16xf32>
    %cst_122 = arith.constant dense<0.000000e+00> : vector<32x16xf32>
    %213 = tpu.matmul %208, %205, %cst_122 {dimension_numbers = #tpu.dot_dimension_numbers<[1], [0], [0], [1], [0, 0, 1, 1], [], []>} : vector<32x16xf32>, vector<16x16xf32>, vector<32x16xf32> -> vector<32x16xf32>
    %cst_123 = arith.constant dense<0.000000e+00> : vector<32x16xf32>
    %214 = tpu.matmul %210, %204, %cst_123 {dimension_numbers = #tpu.dot_dimension_numbers<[1], [0], [0], [1], [0, 0, 1, 1], [], []>} : vector<32x16xf32>, vector<16x16xf32>, vector<32x16xf32> -> vector<32x16xf32>
    %215 = arith.addf %213, %214 : vector<32x16xf32>
    %cst_124 = arith.constant dense<0.000000e+00> : vector<32x16xf32>
    %216 = tpu.matmul %212, %206, %cst_124 {dimension_numbers = #tpu.dot_dimension_numbers<[1], [0], [0], [1], [0, 0, 1, 1], [], []>} : vector<32x16xf32>, vector<16x16xf32>, vector<32x16xf32> -> vector<32x16xf32>
    %217 = arith.addf %215, %216 : vector<32x16xf32>
    %c0_125 = arith.constant 0 : index
    %c0_126 = arith.constant 0 : index
    %218 = vector.load %arg11[%c0_125, %c0_126] : memref<32x1xf32, #tpu.memory_space<vmem>>, vector<32x1xf32>
    %219 = vector.broadcast %218 : vector<32x1xf32> to vector<32x16xf32>
    %220 = arith.addf %217, %219 : vector<32x16xf32>
    %cst_127 = arith.constant 0.000000e+00 : f32
    %221 = vector.broadcast %cst_127 : f32 to vector<32x16xf32>
    %222 = arith.maximumf %220, %221 : vector<32x16xf32>
    %cst_128 = arith.constant dense<0.000000e+00> : vector<32x8xf32>
    %223 = tpu.matmul %222, %81, %cst_128 {dimension_numbers = #tpu.dot_dimension_numbers<[1], [0], [0], [1], [0, 0, 1, 1], [], []>} : vector<32x16xf32>, vector<16x8xf32>, vector<32x8xf32> -> vector<32x8xf32>
    %cst_129 = arith.constant dense<0.000000e+00> : vector<32x8xf32>
    %224 = tpu.matmul %222, %89, %cst_129 {dimension_numbers = #tpu.dot_dimension_numbers<[1], [0], [0], [1], [0, 0, 1, 1], [], []>} : vector<32x16xf32>, vector<16x8xf32>, vector<32x8xf32> -> vector<32x8xf32>
    %c0_130 = arith.constant 0 : index
    %c0_131 = arith.constant 0 : index
    %c0_132 = arith.constant 0 : index
    %225 = vector.load %arg12[%c0_130, %c0_131, %c0_132] : memref<2x32x32xf32, #tpu.memory_space<vmem>>, vector<1x32x32xf32>
    %226 = vector.shape_cast %225 : vector<1x32x32xf32> to vector<32x32xf32>
    %cst_133 = arith.constant dense<0.000000e+00> : vector<32x8xf32>
    %227 = tpu.matmul %226, %223, %cst_133 {dimension_numbers = #tpu.dot_dimension_numbers<[1], [0], [0], [1], [0, 0, 1, 1], [], []>} : vector<32x32xf32>, vector<32x8xf32>, vector<32x8xf32> -> vector<32x8xf32>
    %c1_134 = arith.constant 1 : index
    %c0_135 = arith.constant 0 : index
    %c0_136 = arith.constant 0 : index
    %228 = vector.load %arg12[%c1_134, %c0_135, %c0_136] : memref<2x32x32xf32, #tpu.memory_space<vmem>>, vector<1x32x32xf32>
    %229 = vector.shape_cast %228 : vector<1x32x32xf32> to vector<32x32xf32>
    %cst_137 = arith.constant dense<0.000000e+00> : vector<32x8xf32>
    %230 = tpu.matmul %229, %224, %cst_137 {dimension_numbers = #tpu.dot_dimension_numbers<[1], [0], [0], [1], [0, 0, 1, 1], [], []>} : vector<32x32xf32>, vector<32x8xf32>, vector<32x8xf32> -> vector<32x8xf32>
    %231 = arith.addf %227, %230 : vector<32x8xf32>
    %c0_138 = arith.constant 0 : index
    %c0_139 = arith.constant 0 : index
    %232 = vector.load %arg13[%c0_138, %c0_139] : memref<32x1xf32, #tpu.memory_space<vmem>>, vector<32x1xf32>
    %233 = vector.broadcast %232 : vector<32x1xf32> to vector<32x8xf32>
    %234 = arith.addf %231, %233 : vector<32x8xf32>
    %cst_140 = arith.constant 0.000000e+00 : f32
    %235 = vector.broadcast %cst_140 : f32 to vector<32x8xf32>
    %236 = arith.maximumf %234, %235 : vector<32x8xf32>
    %cst_141 = arith.constant dense<0.000000e+00> : vector<32x8xf32>
    %237 = tpu.matmul %236, %97, %cst_141 {dimension_numbers = #tpu.dot_dimension_numbers<[1], [0], [0], [1], [0, 0, 1, 1], [], []>} : vector<32x8xf32>, vector<8x8xf32>, vector<32x8xf32> -> vector<32x8xf32>
    %cst_142 = arith.constant dense<0.000000e+00> : vector<32x8xf32>
    %238 = tpu.matmul %236, %103, %cst_142 {dimension_numbers = #tpu.dot_dimension_numbers<[1], [0], [0], [1], [0, 0, 1, 1], [], []>} : vector<32x8xf32>, vector<8x8xf32>, vector<32x8xf32> -> vector<32x8xf32>
    %c0_143 = arith.constant 0 : index
    %c0_144 = arith.constant 0 : index
    %c0_145 = arith.constant 0 : index
    %239 = vector.load %arg14[%c0_143, %c0_144, %c0_145] : memref<3x32x32xf32, #tpu.memory_space<vmem>>, vector<1x32x32xf32>
    %240 = vector.shape_cast %239 : vector<1x32x32xf32> to vector<32x32xf32>
    %c1_146 = arith.constant 1 : index
    %c0_147 = arith.constant 0 : index
    %c0_148 = arith.constant 0 : index
    %241 = vector.load %arg14[%c1_146, %c0_147, %c0_148] : memref<3x32x32xf32, #tpu.memory_space<vmem>>, vector<1x32x32xf32>
    %242 = vector.shape_cast %241 : vector<1x32x32xf32> to vector<32x32xf32>
    %c2_149 = arith.constant 2 : index
    %c0_150 = arith.constant 0 : index
    %c0_151 = arith.constant 0 : index
    %243 = vector.load %arg14[%c2_149, %c0_150, %c0_151] : memref<3x32x32xf32, #tpu.memory_space<vmem>>, vector<1x32x32xf32>
    %244 = vector.shape_cast %243 : vector<1x32x32xf32> to vector<32x32xf32>
    %cst_152 = arith.constant dense<0.000000e+00> : vector<32x8xf32>
    %245 = tpu.matmul %240, %237, %cst_152 {dimension_numbers = #tpu.dot_dimension_numbers<[1], [0], [0], [1], [0, 0, 1, 1], [], []>} : vector<32x32xf32>, vector<32x8xf32>, vector<32x8xf32> -> vector<32x8xf32>
    %cst_153 = arith.constant dense<0.000000e+00> : vector<32x8xf32>
    %246 = tpu.matmul %242, %236, %cst_153 {dimension_numbers = #tpu.dot_dimension_numbers<[1], [0], [0], [1], [0, 0, 1, 1], [], []>} : vector<32x32xf32>, vector<32x8xf32>, vector<32x8xf32> -> vector<32x8xf32>
    %247 = arith.addf %245, %246 : vector<32x8xf32>
    %cst_154 = arith.constant dense<0.000000e+00> : vector<32x8xf32>
    %248 = tpu.matmul %244, %238, %cst_154 {dimension_numbers = #tpu.dot_dimension_numbers<[1], [0], [0], [1], [0, 0, 1, 1], [], []>} : vector<32x32xf32>, vector<32x8xf32>, vector<32x8xf32> -> vector<32x8xf32>
    %249 = arith.addf %247, %248 : vector<32x8xf32>
    %c0_155 = arith.constant 0 : index
    %c0_156 = arith.constant 0 : index
    %250 = vector.load %arg15[%c0_155, %c0_156] : memref<32x1xf32, #tpu.memory_space<vmem>>, vector<32x1xf32>
    %251 = vector.broadcast %250 : vector<32x1xf32> to vector<32x8xf32>
    %252 = arith.addf %249, %251 : vector<32x8xf32>
    %cst_157 = arith.constant 0.000000e+00 : f32
    %253 = vector.broadcast %cst_157 : f32 to vector<32x8xf32>
    %254 = arith.maximumf %252, %253 : vector<32x8xf32>
    %cst_158 = arith.constant dense<0.000000e+00> : vector<32x4xf32>
    %255 = tpu.matmul %254, %111, %cst_158 {dimension_numbers = #tpu.dot_dimension_numbers<[1], [0], [0], [1], [0, 0, 1, 1], [], []>} : vector<32x8xf32>, vector<8x4xf32>, vector<32x4xf32> -> vector<32x4xf32>
    %cst_159 = arith.constant dense<0.000000e+00> : vector<32x4xf32>
    %256 = tpu.matmul %254, %119, %cst_159 {dimension_numbers = #tpu.dot_dimension_numbers<[1], [0], [0], [1], [0, 0, 1, 1], [], []>} : vector<32x8xf32>, vector<8x4xf32>, vector<32x4xf32> -> vector<32x4xf32>
    %c0_160 = arith.constant 0 : index
    %c0_161 = arith.constant 0 : index
    %c0_162 = arith.constant 0 : index
    %257 = vector.load %arg16[%c0_160, %c0_161, %c0_162] : memref<2x32x32xf32, #tpu.memory_space<vmem>>, vector<1x32x32xf32>
    %258 = vector.shape_cast %257 : vector<1x32x32xf32> to vector<32x32xf32>
    %cst_163 = arith.constant dense<0.000000e+00> : vector<32x4xf32>
    %259 = tpu.matmul %258, %255, %cst_163 {dimension_numbers = #tpu.dot_dimension_numbers<[1], [0], [0], [1], [0, 0, 1, 1], [], []>} : vector<32x32xf32>, vector<32x4xf32>, vector<32x4xf32> -> vector<32x4xf32>
    %c1_164 = arith.constant 1 : index
    %c0_165 = arith.constant 0 : index
    %c0_166 = arith.constant 0 : index
    %260 = vector.load %arg16[%c1_164, %c0_165, %c0_166] : memref<2x32x32xf32, #tpu.memory_space<vmem>>, vector<1x32x32xf32>
    %261 = vector.shape_cast %260 : vector<1x32x32xf32> to vector<32x32xf32>
    %cst_167 = arith.constant dense<0.000000e+00> : vector<32x4xf32>
    %262 = tpu.matmul %261, %256, %cst_167 {dimension_numbers = #tpu.dot_dimension_numbers<[1], [0], [0], [1], [0, 0, 1, 1], [], []>} : vector<32x32xf32>, vector<32x4xf32>, vector<32x4xf32> -> vector<32x4xf32>
    %263 = arith.addf %259, %262 : vector<32x4xf32>
    %c0_168 = arith.constant 0 : index
    %c0_169 = arith.constant 0 : index
    %264 = vector.load %arg17[%c0_168, %c0_169] : memref<32x1xf32, #tpu.memory_space<vmem>>, vector<32x1xf32>
    %265 = vector.broadcast %264 : vector<32x1xf32> to vector<32x4xf32>
    %266 = arith.addf %263, %265 : vector<32x4xf32>
    %cst_170 = arith.constant 0.000000e+00 : f32
    %267 = vector.broadcast %cst_170 : f32 to vector<32x4xf32>
    %268 = arith.maximumf %266, %267 : vector<32x4xf32>
    %cst_171 = arith.constant dense<0.000000e+00> : vector<32x4xf32>
    %269 = tpu.matmul %268, %127, %cst_171 {dimension_numbers = #tpu.dot_dimension_numbers<[1], [0], [0], [1], [0, 0, 1, 1], [], []>} : vector<32x4xf32>, vector<4x4xf32>, vector<32x4xf32> -> vector<32x4xf32>
    %cst_172 = arith.constant dense<0.000000e+00> : vector<32x4xf32>
    %270 = tpu.matmul %268, %133, %cst_172 {dimension_numbers = #tpu.dot_dimension_numbers<[1], [0], [0], [1], [0, 0, 1, 1], [], []>} : vector<32x4xf32>, vector<4x4xf32>, vector<32x4xf32> -> vector<32x4xf32>
    %c0_173 = arith.constant 0 : index
    %c0_174 = arith.constant 0 : index
    %c0_175 = arith.constant 0 : index
    %271 = vector.load %arg18[%c0_173, %c0_174, %c0_175] : memref<3x1x32xf32, #tpu.memory_space<vmem>>, vector<1x1x32xf32>
    %272 = vector.shape_cast %271 : vector<1x1x32xf32> to vector<1x32xf32>
    %c1_176 = arith.constant 1 : index
    %c0_177 = arith.constant 0 : index
    %c0_178 = arith.constant 0 : index
    %273 = vector.load %arg18[%c1_176, %c0_177, %c0_178] : memref<3x1x32xf32, #tpu.memory_space<vmem>>, vector<1x1x32xf32>
    %274 = vector.shape_cast %273 : vector<1x1x32xf32> to vector<1x32xf32>
    %c2_179 = arith.constant 2 : index
    %c0_180 = arith.constant 0 : index
    %c0_181 = arith.constant 0 : index
    %275 = vector.load %arg18[%c2_179, %c0_180, %c0_181] : memref<3x1x32xf32, #tpu.memory_space<vmem>>, vector<1x1x32xf32>
    %276 = vector.shape_cast %275 : vector<1x1x32xf32> to vector<1x32xf32>
    %cst_182 = arith.constant dense<0.000000e+00> : vector<1x4xf32>
    %277 = tpu.matmul %272, %269, %cst_182 {dimension_numbers = #tpu.dot_dimension_numbers<[1], [0], [0], [1], [0, 0, 1, 1], [], []>} : vector<1x32xf32>, vector<32x4xf32>, vector<1x4xf32> -> vector<1x4xf32>
    %cst_183 = arith.constant dense<0.000000e+00> : vector<1x4xf32>
    %278 = tpu.matmul %274, %268, %cst_183 {dimension_numbers = #tpu.dot_dimension_numbers<[1], [0], [0], [1], [0, 0, 1, 1], [], []>} : vector<1x32xf32>, vector<32x4xf32>, vector<1x4xf32> -> vector<1x4xf32>
    %279 = arith.addf %277, %278 : vector<1x4xf32>
    %cst_184 = arith.constant dense<0.000000e+00> : vector<1x4xf32>
    %280 = tpu.matmul %276, %270, %cst_184 {dimension_numbers = #tpu.dot_dimension_numbers<[1], [0], [0], [1], [0, 0, 1, 1], [], []>} : vector<1x32xf32>, vector<32x4xf32>, vector<1x4xf32> -> vector<1x4xf32>
    %281 = arith.addf %279, %280 : vector<1x4xf32>
    %c0_185 = arith.constant 0 : index
    %c0_186 = arith.constant 0 : index
    %282 = vector.load %arg19[%c0_185, %c0_186] : memref<1x1xf32, #tpu.memory_space<vmem>>, vector<1x1xf32>
    %283 = vector.broadcast %282 : vector<1x1xf32> to vector<1x4xf32>
    %284 = arith.addf %281, %283 : vector<1x4xf32>
    %c1_187 = arith.constant 1 : index
    %c0_188 = arith.constant 0 : index
    %285 = vector.load %arg0[%c1_187, %c0_188] : memref<2x64xf32, #tpu.memory_space<vmem>>, vector<1x64xf32>
    %cst_189 = arith.constant dense<0.000000e+00> : vector<1x64xf32>
    %286 = tpu.matmul %285, %7, %cst_189 {dimension_numbers = #tpu.dot_dimension_numbers<[1], [0], [0], [1], [0, 0, 1, 1], [], []>} : vector<1x64xf32>, vector<64x64xf32>, vector<1x64xf32> -> vector<1x64xf32>
    %cst_190 = arith.constant dense<0.000000e+00> : vector<1x64xf32>
    %287 = tpu.matmul %285, %13, %cst_190 {dimension_numbers = #tpu.dot_dimension_numbers<[1], [0], [0], [1], [0, 0, 1, 1], [], []>} : vector<1x64xf32>, vector<64x64xf32>, vector<1x64xf32> -> vector<1x64xf32>
    %c0_191 = arith.constant 0 : index
    %c0_192 = arith.constant 0 : index
    %c0_193 = arith.constant 0 : index
    %288 = vector.load %arg2[%c0_191, %c0_192, %c0_193] : memref<3x8x1xf32, #tpu.memory_space<vmem>>, vector<1x8x1xf32>
    %289 = vector.shape_cast %288 : vector<1x8x1xf32> to vector<8x1xf32>
    %c1_194 = arith.constant 1 : index
    %c0_195 = arith.constant 0 : index
    %c0_196 = arith.constant 0 : index
    %290 = vector.load %arg2[%c1_194, %c0_195, %c0_196] : memref<3x8x1xf32, #tpu.memory_space<vmem>>, vector<1x8x1xf32>
    %291 = vector.shape_cast %290 : vector<1x8x1xf32> to vector<8x1xf32>
    %c2_197 = arith.constant 2 : index
    %c0_198 = arith.constant 0 : index
    %c0_199 = arith.constant 0 : index
    %292 = vector.load %arg2[%c2_197, %c0_198, %c0_199] : memref<3x8x1xf32, #tpu.memory_space<vmem>>, vector<1x8x1xf32>
    %293 = vector.shape_cast %292 : vector<1x8x1xf32> to vector<8x1xf32>
    %294 = vector.broadcast %289 : vector<8x1xf32> to vector<8x64xf32>
    %295 = vector.broadcast %286 : vector<1x64xf32> to vector<8x64xf32>
    %296 = arith.mulf %294, %295 : vector<8x64xf32>
    %297 = vector.broadcast %291 : vector<8x1xf32> to vector<8x64xf32>
    %298 = vector.broadcast %285 : vector<1x64xf32> to vector<8x64xf32>
    %299 = arith.mulf %297, %298 : vector<8x64xf32>
    %300 = arith.addf %296, %299 : vector<8x64xf32>
    %301 = vector.broadcast %293 : vector<8x1xf32> to vector<8x64xf32>
    %302 = vector.broadcast %287 : vector<1x64xf32> to vector<8x64xf32>
    %303 = arith.mulf %301, %302 : vector<8x64xf32>
    %304 = arith.addf %300, %303 : vector<8x64xf32>
    %c0_200 = arith.constant 0 : index
    %c0_201 = arith.constant 0 : index
    %305 = vector.load %arg3[%c0_200, %c0_201] : memref<8x1xf32, #tpu.memory_space<vmem>>, vector<8x1xf32>
    %306 = vector.broadcast %305 : vector<8x1xf32> to vector<8x64xf32>
    %307 = arith.addf %304, %306 : vector<8x64xf32>
    %cst_202 = arith.constant 0.000000e+00 : f32
    %308 = vector.broadcast %cst_202 : f32 to vector<8x64xf32>
    %309 = arith.maximumf %307, %308 : vector<8x64xf32>
    %cst_203 = arith.constant dense<0.000000e+00> : vector<8x32xf32>
    %310 = tpu.matmul %309, %21, %cst_203 {dimension_numbers = #tpu.dot_dimension_numbers<[1], [0], [0], [1], [0, 0, 1, 1], [], []>} : vector<8x64xf32>, vector<64x32xf32>, vector<8x32xf32> -> vector<8x32xf32>
    %cst_204 = arith.constant dense<0.000000e+00> : vector<8x32xf32>
    %311 = tpu.matmul %309, %29, %cst_204 {dimension_numbers = #tpu.dot_dimension_numbers<[1], [0], [0], [1], [0, 0, 1, 1], [], []>} : vector<8x64xf32>, vector<64x32xf32>, vector<8x32xf32> -> vector<8x32xf32>
    %c0_205 = arith.constant 0 : index
    %c0_206 = arith.constant 0 : index
    %c0_207 = arith.constant 0 : index
    %312 = vector.load %arg4[%c0_205, %c0_206, %c0_207] : memref<2x8x8xf32, #tpu.memory_space<vmem>>, vector<1x8x8xf32>
    %313 = vector.shape_cast %312 : vector<1x8x8xf32> to vector<8x8xf32>
    %cst_208 = arith.constant dense<0.000000e+00> : vector<8x32xf32>
    %314 = tpu.matmul %313, %310, %cst_208 {dimension_numbers = #tpu.dot_dimension_numbers<[1], [0], [0], [1], [0, 0, 1, 1], [], []>} : vector<8x8xf32>, vector<8x32xf32>, vector<8x32xf32> -> vector<8x32xf32>
    %c1_209 = arith.constant 1 : index
    %c0_210 = arith.constant 0 : index
    %c0_211 = arith.constant 0 : index
    %315 = vector.load %arg4[%c1_209, %c0_210, %c0_211] : memref<2x8x8xf32, #tpu.memory_space<vmem>>, vector<1x8x8xf32>
    %316 = vector.shape_cast %315 : vector<1x8x8xf32> to vector<8x8xf32>
    %cst_212 = arith.constant dense<0.000000e+00> : vector<8x32xf32>
    %317 = tpu.matmul %316, %311, %cst_212 {dimension_numbers = #tpu.dot_dimension_numbers<[1], [0], [0], [1], [0, 0, 1, 1], [], []>} : vector<8x8xf32>, vector<8x32xf32>, vector<8x32xf32> -> vector<8x32xf32>
    %318 = arith.addf %314, %317 : vector<8x32xf32>
    %c0_213 = arith.constant 0 : index
    %c0_214 = arith.constant 0 : index
    %319 = vector.load %arg5[%c0_213, %c0_214] : memref<8x1xf32, #tpu.memory_space<vmem>>, vector<8x1xf32>
    %320 = vector.broadcast %319 : vector<8x1xf32> to vector<8x32xf32>
    %321 = arith.addf %318, %320 : vector<8x32xf32>
    %cst_215 = arith.constant 0.000000e+00 : f32
    %322 = vector.broadcast %cst_215 : f32 to vector<8x32xf32>
    %323 = arith.maximumf %321, %322 : vector<8x32xf32>
    %cst_216 = arith.constant dense<0.000000e+00> : vector<8x32xf32>
    %324 = tpu.matmul %323, %37, %cst_216 {dimension_numbers = #tpu.dot_dimension_numbers<[1], [0], [0], [1], [0, 0, 1, 1], [], []>} : vector<8x32xf32>, vector<32x32xf32>, vector<8x32xf32> -> vector<8x32xf32>
    %cst_217 = arith.constant dense<0.000000e+00> : vector<8x32xf32>
    %325 = tpu.matmul %323, %43, %cst_217 {dimension_numbers = #tpu.dot_dimension_numbers<[1], [0], [0], [1], [0, 0, 1, 1], [], []>} : vector<8x32xf32>, vector<32x32xf32>, vector<8x32xf32> -> vector<8x32xf32>
    %c0_218 = arith.constant 0 : index
    %c0_219 = arith.constant 0 : index
    %c0_220 = arith.constant 0 : index
    %326 = vector.load %arg6[%c0_218, %c0_219, %c0_220] : memref<3x16x8xf32, #tpu.memory_space<vmem>>, vector<1x16x8xf32>
    %327 = vector.shape_cast %326 : vector<1x16x8xf32> to vector<16x8xf32>
    %c1_221 = arith.constant 1 : index
    %c0_222 = arith.constant 0 : index
    %c0_223 = arith.constant 0 : index
    %328 = vector.load %arg6[%c1_221, %c0_222, %c0_223] : memref<3x16x8xf32, #tpu.memory_space<vmem>>, vector<1x16x8xf32>
    %329 = vector.shape_cast %328 : vector<1x16x8xf32> to vector<16x8xf32>
    %c2_224 = arith.constant 2 : index
    %c0_225 = arith.constant 0 : index
    %c0_226 = arith.constant 0 : index
    %330 = vector.load %arg6[%c2_224, %c0_225, %c0_226] : memref<3x16x8xf32, #tpu.memory_space<vmem>>, vector<1x16x8xf32>
    %331 = vector.shape_cast %330 : vector<1x16x8xf32> to vector<16x8xf32>
    %cst_227 = arith.constant dense<0.000000e+00> : vector<16x32xf32>
    %332 = tpu.matmul %327, %324, %cst_227 {dimension_numbers = #tpu.dot_dimension_numbers<[1], [0], [0], [1], [0, 0, 1, 1], [], []>} : vector<16x8xf32>, vector<8x32xf32>, vector<16x32xf32> -> vector<16x32xf32>
    %cst_228 = arith.constant dense<0.000000e+00> : vector<16x32xf32>
    %333 = tpu.matmul %329, %323, %cst_228 {dimension_numbers = #tpu.dot_dimension_numbers<[1], [0], [0], [1], [0, 0, 1, 1], [], []>} : vector<16x8xf32>, vector<8x32xf32>, vector<16x32xf32> -> vector<16x32xf32>
    %334 = arith.addf %332, %333 : vector<16x32xf32>
    %cst_229 = arith.constant dense<0.000000e+00> : vector<16x32xf32>
    %335 = tpu.matmul %331, %325, %cst_229 {dimension_numbers = #tpu.dot_dimension_numbers<[1], [0], [0], [1], [0, 0, 1, 1], [], []>} : vector<16x8xf32>, vector<8x32xf32>, vector<16x32xf32> -> vector<16x32xf32>
    %336 = arith.addf %334, %335 : vector<16x32xf32>
    %c0_230 = arith.constant 0 : index
    %c0_231 = arith.constant 0 : index
    %337 = vector.load %arg7[%c0_230, %c0_231] : memref<16x1xf32, #tpu.memory_space<vmem>>, vector<16x1xf32>
    %338 = vector.broadcast %337 : vector<16x1xf32> to vector<16x32xf32>
    %339 = arith.addf %336, %338 : vector<16x32xf32>
    %cst_232 = arith.constant 0.000000e+00 : f32
    %340 = vector.broadcast %cst_232 : f32 to vector<16x32xf32>
    %341 = arith.maximumf %339, %340 : vector<16x32xf32>
    %cst_233 = arith.constant dense<0.000000e+00> : vector<16x16xf32>
    %342 = tpu.matmul %341, %51, %cst_233 {dimension_numbers = #tpu.dot_dimension_numbers<[1], [0], [0], [1], [0, 0, 1, 1], [], []>} : vector<16x32xf32>, vector<32x16xf32>, vector<16x16xf32> -> vector<16x16xf32>
    %cst_234 = arith.constant dense<0.000000e+00> : vector<16x16xf32>
    %343 = tpu.matmul %341, %59, %cst_234 {dimension_numbers = #tpu.dot_dimension_numbers<[1], [0], [0], [1], [0, 0, 1, 1], [], []>} : vector<16x32xf32>, vector<32x16xf32>, vector<16x16xf32> -> vector<16x16xf32>
    %c0_235 = arith.constant 0 : index
    %c0_236 = arith.constant 0 : index
    %c0_237 = arith.constant 0 : index
    %344 = vector.load %arg8[%c0_235, %c0_236, %c0_237] : memref<2x16x16xf32, #tpu.memory_space<vmem>>, vector<1x16x16xf32>
    %345 = vector.shape_cast %344 : vector<1x16x16xf32> to vector<16x16xf32>
    %cst_238 = arith.constant dense<0.000000e+00> : vector<16x16xf32>
    %346 = tpu.matmul %345, %342, %cst_238 {dimension_numbers = #tpu.dot_dimension_numbers<[1], [0], [0], [1], [0, 0, 1, 1], [], []>} : vector<16x16xf32>, vector<16x16xf32>, vector<16x16xf32> -> vector<16x16xf32>
    %c1_239 = arith.constant 1 : index
    %c0_240 = arith.constant 0 : index
    %c0_241 = arith.constant 0 : index
    %347 = vector.load %arg8[%c1_239, %c0_240, %c0_241] : memref<2x16x16xf32, #tpu.memory_space<vmem>>, vector<1x16x16xf32>
    %348 = vector.shape_cast %347 : vector<1x16x16xf32> to vector<16x16xf32>
    %cst_242 = arith.constant dense<0.000000e+00> : vector<16x16xf32>
    %349 = tpu.matmul %348, %343, %cst_242 {dimension_numbers = #tpu.dot_dimension_numbers<[1], [0], [0], [1], [0, 0, 1, 1], [], []>} : vector<16x16xf32>, vector<16x16xf32>, vector<16x16xf32> -> vector<16x16xf32>
    %350 = arith.addf %346, %349 : vector<16x16xf32>
    %c0_243 = arith.constant 0 : index
    %c0_244 = arith.constant 0 : index
    %351 = vector.load %arg9[%c0_243, %c0_244] : memref<16x1xf32, #tpu.memory_space<vmem>>, vector<16x1xf32>
    %352 = vector.broadcast %351 : vector<16x1xf32> to vector<16x16xf32>
    %353 = arith.addf %350, %352 : vector<16x16xf32>
    %cst_245 = arith.constant 0.000000e+00 : f32
    %354 = vector.broadcast %cst_245 : f32 to vector<16x16xf32>
    %355 = arith.maximumf %353, %354 : vector<16x16xf32>
    %cst_246 = arith.constant dense<0.000000e+00> : vector<16x16xf32>
    %356 = tpu.matmul %355, %67, %cst_246 {dimension_numbers = #tpu.dot_dimension_numbers<[1], [0], [0], [1], [0, 0, 1, 1], [], []>} : vector<16x16xf32>, vector<16x16xf32>, vector<16x16xf32> -> vector<16x16xf32>
    %cst_247 = arith.constant dense<0.000000e+00> : vector<16x16xf32>
    %357 = tpu.matmul %355, %73, %cst_247 {dimension_numbers = #tpu.dot_dimension_numbers<[1], [0], [0], [1], [0, 0, 1, 1], [], []>} : vector<16x16xf32>, vector<16x16xf32>, vector<16x16xf32> -> vector<16x16xf32>
    %c0_248 = arith.constant 0 : index
    %c0_249 = arith.constant 0 : index
    %c0_250 = arith.constant 0 : index
    %358 = vector.load %arg10[%c0_248, %c0_249, %c0_250] : memref<3x32x16xf32, #tpu.memory_space<vmem>>, vector<1x32x16xf32>
    %359 = vector.shape_cast %358 : vector<1x32x16xf32> to vector<32x16xf32>
    %c1_251 = arith.constant 1 : index
    %c0_252 = arith.constant 0 : index
    %c0_253 = arith.constant 0 : index
    %360 = vector.load %arg10[%c1_251, %c0_252, %c0_253] : memref<3x32x16xf32, #tpu.memory_space<vmem>>, vector<1x32x16xf32>
    %361 = vector.shape_cast %360 : vector<1x32x16xf32> to vector<32x16xf32>
    %c2_254 = arith.constant 2 : index
    %c0_255 = arith.constant 0 : index
    %c0_256 = arith.constant 0 : index
    %362 = vector.load %arg10[%c2_254, %c0_255, %c0_256] : memref<3x32x16xf32, #tpu.memory_space<vmem>>, vector<1x32x16xf32>
    %363 = vector.shape_cast %362 : vector<1x32x16xf32> to vector<32x16xf32>
    %cst_257 = arith.constant dense<0.000000e+00> : vector<32x16xf32>
    %364 = tpu.matmul %359, %356, %cst_257 {dimension_numbers = #tpu.dot_dimension_numbers<[1], [0], [0], [1], [0, 0, 1, 1], [], []>} : vector<32x16xf32>, vector<16x16xf32>, vector<32x16xf32> -> vector<32x16xf32>
    %cst_258 = arith.constant dense<0.000000e+00> : vector<32x16xf32>
    %365 = tpu.matmul %361, %355, %cst_258 {dimension_numbers = #tpu.dot_dimension_numbers<[1], [0], [0], [1], [0, 0, 1, 1], [], []>} : vector<32x16xf32>, vector<16x16xf32>, vector<32x16xf32> -> vector<32x16xf32>
    %366 = arith.addf %364, %365 : vector<32x16xf32>
    %cst_259 = arith.constant dense<0.000000e+00> : vector<32x16xf32>
    %367 = tpu.matmul %363, %357, %cst_259 {dimension_numbers = #tpu.dot_dimension_numbers<[1], [0], [0], [1], [0, 0, 1, 1], [], []>} : vector<32x16xf32>, vector<16x16xf32>, vector<32x16xf32> -> vector<32x16xf32>
    %368 = arith.addf %366, %367 : vector<32x16xf32>
    %c0_260 = arith.constant 0 : index
    %c0_261 = arith.constant 0 : index
    %369 = vector.load %arg11[%c0_260, %c0_261] : memref<32x1xf32, #tpu.memory_space<vmem>>, vector<32x1xf32>
    %370 = vector.broadcast %369 : vector<32x1xf32> to vector<32x16xf32>
    %371 = arith.addf %368, %370 : vector<32x16xf32>
    %cst_262 = arith.constant 0.000000e+00 : f32
    %372 = vector.broadcast %cst_262 : f32 to vector<32x16xf32>
    %373 = arith.maximumf %371, %372 : vector<32x16xf32>
    %cst_263 = arith.constant dense<0.000000e+00> : vector<32x8xf32>
    %374 = tpu.matmul %373, %81, %cst_263 {dimension_numbers = #tpu.dot_dimension_numbers<[1], [0], [0], [1], [0, 0, 1, 1], [], []>} : vector<32x16xf32>, vector<16x8xf32>, vector<32x8xf32> -> vector<32x8xf32>
    %cst_264 = arith.constant dense<0.000000e+00> : vector<32x8xf32>
    %375 = tpu.matmul %373, %89, %cst_264 {dimension_numbers = #tpu.dot_dimension_numbers<[1], [0], [0], [1], [0, 0, 1, 1], [], []>} : vector<32x16xf32>, vector<16x8xf32>, vector<32x8xf32> -> vector<32x8xf32>
    %c0_265 = arith.constant 0 : index
    %c0_266 = arith.constant 0 : index
    %c0_267 = arith.constant 0 : index
    %376 = vector.load %arg12[%c0_265, %c0_266, %c0_267] : memref<2x32x32xf32, #tpu.memory_space<vmem>>, vector<1x32x32xf32>
    %377 = vector.shape_cast %376 : vector<1x32x32xf32> to vector<32x32xf32>
    %cst_268 = arith.constant dense<0.000000e+00> : vector<32x8xf32>
    %378 = tpu.matmul %377, %374, %cst_268 {dimension_numbers = #tpu.dot_dimension_numbers<[1], [0], [0], [1], [0, 0, 1, 1], [], []>} : vector<32x32xf32>, vector<32x8xf32>, vector<32x8xf32> -> vector<32x8xf32>
    %c1_269 = arith.constant 1 : index
    %c0_270 = arith.constant 0 : index
    %c0_271 = arith.constant 0 : index
    %379 = vector.load %arg12[%c1_269, %c0_270, %c0_271] : memref<2x32x32xf32, #tpu.memory_space<vmem>>, vector<1x32x32xf32>
    %380 = vector.shape_cast %379 : vector<1x32x32xf32> to vector<32x32xf32>
    %cst_272 = arith.constant dense<0.000000e+00> : vector<32x8xf32>
    %381 = tpu.matmul %380, %375, %cst_272 {dimension_numbers = #tpu.dot_dimension_numbers<[1], [0], [0], [1], [0, 0, 1, 1], [], []>} : vector<32x32xf32>, vector<32x8xf32>, vector<32x8xf32> -> vector<32x8xf32>
    %382 = arith.addf %378, %381 : vector<32x8xf32>
    %c0_273 = arith.constant 0 : index
    %c0_274 = arith.constant 0 : index
    %383 = vector.load %arg13[%c0_273, %c0_274] : memref<32x1xf32, #tpu.memory_space<vmem>>, vector<32x1xf32>
    %384 = vector.broadcast %383 : vector<32x1xf32> to vector<32x8xf32>
    %385 = arith.addf %382, %384 : vector<32x8xf32>
    %cst_275 = arith.constant 0.000000e+00 : f32
    %386 = vector.broadcast %cst_275 : f32 to vector<32x8xf32>
    %387 = arith.maximumf %385, %386 : vector<32x8xf32>
    %cst_276 = arith.constant dense<0.000000e+00> : vector<32x8xf32>
    %388 = tpu.matmul %387, %97, %cst_276 {dimension_numbers = #tpu.dot_dimension_numbers<[1], [0], [0], [1], [0, 0, 1, 1], [], []>} : vector<32x8xf32>, vector<8x8xf32>, vector<32x8xf32> -> vector<32x8xf32>
    %cst_277 = arith.constant dense<0.000000e+00> : vector<32x8xf32>
    %389 = tpu.matmul %387, %103, %cst_277 {dimension_numbers = #tpu.dot_dimension_numbers<[1], [0], [0], [1], [0, 0, 1, 1], [], []>} : vector<32x8xf32>, vector<8x8xf32>, vector<32x8xf32> -> vector<32x8xf32>
    %c0_278 = arith.constant 0 : index
    %c0_279 = arith.constant 0 : index
    %c0_280 = arith.constant 0 : index
    %390 = vector.load %arg14[%c0_278, %c0_279, %c0_280] : memref<3x32x32xf32, #tpu.memory_space<vmem>>, vector<1x32x32xf32>
    %391 = vector.shape_cast %390 : vector<1x32x32xf32> to vector<32x32xf32>
    %c1_281 = arith.constant 1 : index
    %c0_282 = arith.constant 0 : index
    %c0_283 = arith.constant 0 : index
    %392 = vector.load %arg14[%c1_281, %c0_282, %c0_283] : memref<3x32x32xf32, #tpu.memory_space<vmem>>, vector<1x32x32xf32>
    %393 = vector.shape_cast %392 : vector<1x32x32xf32> to vector<32x32xf32>
    %c2_284 = arith.constant 2 : index
    %c0_285 = arith.constant 0 : index
    %c0_286 = arith.constant 0 : index
    %394 = vector.load %arg14[%c2_284, %c0_285, %c0_286] : memref<3x32x32xf32, #tpu.memory_space<vmem>>, vector<1x32x32xf32>
    %395 = vector.shape_cast %394 : vector<1x32x32xf32> to vector<32x32xf32>
    %cst_287 = arith.constant dense<0.000000e+00> : vector<32x8xf32>
    %396 = tpu.matmul %391, %388, %cst_287 {dimension_numbers = #tpu.dot_dimension_numbers<[1], [0], [0], [1], [0, 0, 1, 1], [], []>} : vector<32x32xf32>, vector<32x8xf32>, vector<32x8xf32> -> vector<32x8xf32>
    %cst_288 = arith.constant dense<0.000000e+00> : vector<32x8xf32>
    %397 = tpu.matmul %393, %387, %cst_288 {dimension_numbers = #tpu.dot_dimension_numbers<[1], [0], [0], [1], [0, 0, 1, 1], [], []>} : vector<32x32xf32>, vector<32x8xf32>, vector<32x8xf32> -> vector<32x8xf32>
    %398 = arith.addf %396, %397 : vector<32x8xf32>
    %cst_289 = arith.constant dense<0.000000e+00> : vector<32x8xf32>
    %399 = tpu.matmul %395, %389, %cst_289 {dimension_numbers = #tpu.dot_dimension_numbers<[1], [0], [0], [1], [0, 0, 1, 1], [], []>} : vector<32x32xf32>, vector<32x8xf32>, vector<32x8xf32> -> vector<32x8xf32>
    %400 = arith.addf %398, %399 : vector<32x8xf32>
    %c0_290 = arith.constant 0 : index
    %c0_291 = arith.constant 0 : index
    %401 = vector.load %arg15[%c0_290, %c0_291] : memref<32x1xf32, #tpu.memory_space<vmem>>, vector<32x1xf32>
    %402 = vector.broadcast %401 : vector<32x1xf32> to vector<32x8xf32>
    %403 = arith.addf %400, %402 : vector<32x8xf32>
    %cst_292 = arith.constant 0.000000e+00 : f32
    %404 = vector.broadcast %cst_292 : f32 to vector<32x8xf32>
    %405 = arith.maximumf %403, %404 : vector<32x8xf32>
    %cst_293 = arith.constant dense<0.000000e+00> : vector<32x4xf32>
    %406 = tpu.matmul %405, %111, %cst_293 {dimension_numbers = #tpu.dot_dimension_numbers<[1], [0], [0], [1], [0, 0, 1, 1], [], []>} : vector<32x8xf32>, vector<8x4xf32>, vector<32x4xf32> -> vector<32x4xf32>
    %cst_294 = arith.constant dense<0.000000e+00> : vector<32x4xf32>
    %407 = tpu.matmul %405, %119, %cst_294 {dimension_numbers = #tpu.dot_dimension_numbers<[1], [0], [0], [1], [0, 0, 1, 1], [], []>} : vector<32x8xf32>, vector<8x4xf32>, vector<32x4xf32> -> vector<32x4xf32>
    %c0_295 = arith.constant 0 : index
    %c0_296 = arith.constant 0 : index
    %c0_297 = arith.constant 0 : index
    %408 = vector.load %arg16[%c0_295, %c0_296, %c0_297] : memref<2x32x32xf32, #tpu.memory_space<vmem>>, vector<1x32x32xf32>
    %409 = vector.shape_cast %408 : vector<1x32x32xf32> to vector<32x32xf32>
    %cst_298 = arith.constant dense<0.000000e+00> : vector<32x4xf32>
    %410 = tpu.matmul %409, %406, %cst_298 {dimension_numbers = #tpu.dot_dimension_numbers<[1], [0], [0], [1], [0, 0, 1, 1], [], []>} : vector<32x32xf32>, vector<32x4xf32>, vector<32x4xf32> -> vector<32x4xf32>
    %c1_299 = arith.constant 1 : index
    %c0_300 = arith.constant 0 : index
    %c0_301 = arith.constant 0 : index
    %411 = vector.load %arg16[%c1_299, %c0_300, %c0_301] : memref<2x32x32xf32, #tpu.memory_space<vmem>>, vector<1x32x32xf32>
    %412 = vector.shape_cast %411 : vector<1x32x32xf32> to vector<32x32xf32>
    %cst_302 = arith.constant dense<0.000000e+00> : vector<32x4xf32>
    %413 = tpu.matmul %412, %407, %cst_302 {dimension_numbers = #tpu.dot_dimension_numbers<[1], [0], [0], [1], [0, 0, 1, 1], [], []>} : vector<32x32xf32>, vector<32x4xf32>, vector<32x4xf32> -> vector<32x4xf32>
    %414 = arith.addf %410, %413 : vector<32x4xf32>
    %c0_303 = arith.constant 0 : index
    %c0_304 = arith.constant 0 : index
    %415 = vector.load %arg17[%c0_303, %c0_304] : memref<32x1xf32, #tpu.memory_space<vmem>>, vector<32x1xf32>
    %416 = vector.broadcast %415 : vector<32x1xf32> to vector<32x4xf32>
    %417 = arith.addf %414, %416 : vector<32x4xf32>
    %cst_305 = arith.constant 0.000000e+00 : f32
    %418 = vector.broadcast %cst_305 : f32 to vector<32x4xf32>
    %419 = arith.maximumf %417, %418 : vector<32x4xf32>
    %cst_306 = arith.constant dense<0.000000e+00> : vector<32x4xf32>
    %420 = tpu.matmul %419, %127, %cst_306 {dimension_numbers = #tpu.dot_dimension_numbers<[1], [0], [0], [1], [0, 0, 1, 1], [], []>} : vector<32x4xf32>, vector<4x4xf32>, vector<32x4xf32> -> vector<32x4xf32>
    %cst_307 = arith.constant dense<0.000000e+00> : vector<32x4xf32>
    %421 = tpu.matmul %419, %133, %cst_307 {dimension_numbers = #tpu.dot_dimension_numbers<[1], [0], [0], [1], [0, 0, 1, 1], [], []>} : vector<32x4xf32>, vector<4x4xf32>, vector<32x4xf32> -> vector<32x4xf32>
    %c0_308 = arith.constant 0 : index
    %c0_309 = arith.constant 0 : index
    %c0_310 = arith.constant 0 : index
    %422 = vector.load %arg18[%c0_308, %c0_309, %c0_310] : memref<3x1x32xf32, #tpu.memory_space<vmem>>, vector<1x1x32xf32>
    %423 = vector.shape_cast %422 : vector<1x1x32xf32> to vector<1x32xf32>
    %c1_311 = arith.constant 1 : index
    %c0_312 = arith.constant 0 : index
    %c0_313 = arith.constant 0 : index
    %424 = vector.load %arg18[%c1_311, %c0_312, %c0_313] : memref<3x1x32xf32, #tpu.memory_space<vmem>>, vector<1x1x32xf32>
    %425 = vector.shape_cast %424 : vector<1x1x32xf32> to vector<1x32xf32>
    %c2_314 = arith.constant 2 : index
    %c0_315 = arith.constant 0 : index
    %c0_316 = arith.constant 0 : index
    %426 = vector.load %arg18[%c2_314, %c0_315, %c0_316] : memref<3x1x32xf32, #tpu.memory_space<vmem>>, vector<1x1x32xf32>
    %427 = vector.shape_cast %426 : vector<1x1x32xf32> to vector<1x32xf32>
    %cst_317 = arith.constant dense<0.000000e+00> : vector<1x4xf32>
    %428 = tpu.matmul %423, %420, %cst_317 {dimension_numbers = #tpu.dot_dimension_numbers<[1], [0], [0], [1], [0, 0, 1, 1], [], []>} : vector<1x32xf32>, vector<32x4xf32>, vector<1x4xf32> -> vector<1x4xf32>
    %cst_318 = arith.constant dense<0.000000e+00> : vector<1x4xf32>
    %429 = tpu.matmul %425, %419, %cst_318 {dimension_numbers = #tpu.dot_dimension_numbers<[1], [0], [0], [1], [0, 0, 1, 1], [], []>} : vector<1x32xf32>, vector<32x4xf32>, vector<1x4xf32> -> vector<1x4xf32>
    %430 = arith.addf %428, %429 : vector<1x4xf32>
    %cst_319 = arith.constant dense<0.000000e+00> : vector<1x4xf32>
    %431 = tpu.matmul %427, %421, %cst_319 {dimension_numbers = #tpu.dot_dimension_numbers<[1], [0], [0], [1], [0, 0, 1, 1], [], []>} : vector<1x32xf32>, vector<32x4xf32>, vector<1x4xf32> -> vector<1x4xf32>
    %432 = arith.addf %430, %431 : vector<1x4xf32>
    %c0_320 = arith.constant 0 : index
    %c0_321 = arith.constant 0 : index
    %433 = vector.load %arg19[%c0_320, %c0_321] : memref<1x1xf32, #tpu.memory_space<vmem>>, vector<1x1xf32>
    %434 = vector.broadcast %433 : vector<1x1xf32> to vector<1x4xf32>
    %435 = arith.addf %432, %434 : vector<1x4xf32>
    %436 = tpu.concatenate %284, %435 in 0 : vector<1x4xf32>, vector<1x4xf32> -> vector<2x4xf32>
    %c0_322 = arith.constant 0 : index
    %c0_323 = arith.constant 0 : index
    %437 = vector.load %arg1[%c0_322, %c0_323] : memref<2x64xf32, #tpu.memory_space<vmem>>, vector<2x64xf32>
    %c0_324 = arith.constant 0 : index
    %c0_325 = arith.constant 0 : index
    %438 = vector.load %arg20[%c0_324, %c0_325] : memref<64x64xf32, #tpu.memory_space<vmem>>, vector<64x64xf32>
    %cst_326 = arith.constant dense<0.000000e+00> : vector<2x64xf32>
    %439 = tpu.matmul %437, %438, %cst_326 {dimension_numbers = #tpu.dot_dimension_numbers<[1], [0], [0], [1], [0, 0, 1, 1], [], []>} : vector<2x64xf32>, vector<64x64xf32>, vector<2x64xf32> -> vector<2x64xf32>
    %c0_327 = arith.constant 0 : index
    %c0_328 = arith.constant 0 : index
    %440 = vector.load %arg21[%c0_327, %c0_328] : memref<1x64xf32, #tpu.memory_space<vmem>>, vector<1x64xf32>
    %441 = vector.broadcast %440 : vector<1x64xf32> to vector<2x64xf32>
    %442 = arith.addf %439, %441 : vector<2x64xf32>
    %cst_329 = arith.constant 0.000000e+00 : f32
    %443 = vector.broadcast %cst_329 : f32 to vector<2x64xf32>
    %444 = arith.maximumf %442, %443 : vector<2x64xf32>
    %c0_330 = arith.constant 0 : index
    %c0_331 = arith.constant 0 : index
    %445 = vector.load %arg22[%c0_330, %c0_331] : memref<64x16xf32, #tpu.memory_space<vmem>>, vector<64x16xf32>
    %cst_332 = arith.constant dense<0.000000e+00> : vector<2x16xf32>
    %446 = tpu.matmul %444, %445, %cst_332 {dimension_numbers = #tpu.dot_dimension_numbers<[1], [0], [0], [1], [0, 0, 1, 1], [], []>} : vector<2x64xf32>, vector<64x16xf32>, vector<2x16xf32> -> vector<2x16xf32>
    %c0_333 = arith.constant 0 : index
    %c0_334 = arith.constant 0 : index
    %447 = vector.load %arg23[%c0_333, %c0_334] : memref<1x16xf32, #tpu.memory_space<vmem>>, vector<1x16xf32>
    %448 = vector.broadcast %447 : vector<1x16xf32> to vector<2x16xf32>
    %449 = arith.addf %446, %448 : vector<2x16xf32>
    %cst_335 = arith.constant 0.000000e+00 : f32
    %450 = vector.broadcast %cst_335 : f32 to vector<2x16xf32>
    %451 = arith.maximumf %449, %450 : vector<2x16xf32>
    %c0_336 = arith.constant 0 : index
    %c0_337 = arith.constant 0 : index
    %452 = vector.load %arg24[%c0_336, %c0_337] : memref<16x4xf32, #tpu.memory_space<vmem>>, vector<16x4xf32>
    %cst_338 = arith.constant dense<0.000000e+00> : vector<2x4xf32>
    %453 = tpu.matmul %451, %452, %cst_338 {dimension_numbers = #tpu.dot_dimension_numbers<[1], [0], [0], [1], [0, 0, 1, 1], [], []>} : vector<2x16xf32>, vector<16x4xf32>, vector<2x4xf32> -> vector<2x4xf32>
    %c0_339 = arith.constant 0 : index
    %c0_340 = arith.constant 0 : index
    %454 = vector.load %arg25[%c0_339, %c0_340] : memref<1x4xf32, #tpu.memory_space<vmem>>, vector<1x4xf32>
    %455 = vector.broadcast %454 : vector<1x4xf32> to vector<2x4xf32>
    %456 = arith.addf %453, %455 : vector<2x4xf32>
    %457 = arith.addf %436, %456 : vector<2x4xf32>
    %c0_341 = arith.constant 0 : index
    %c0_342 = arith.constant 0 : index
    %458 = vector.load %arg26[%c0_341, %c0_342] : memref<4x8xf32, #tpu.memory_space<vmem>>, vector<4x8xf32>
    %cst_343 = arith.constant dense<0.000000e+00> : vector<2x8xf32>
    %459 = tpu.matmul %457, %458, %cst_343 {dimension_numbers = #tpu.dot_dimension_numbers<[1], [0], [0], [1], [0, 0, 1, 1], [], []>} : vector<2x4xf32>, vector<4x8xf32>, vector<2x8xf32> -> vector<2x8xf32>
    %c0_344 = arith.constant 0 : index
    %c0_345 = arith.constant 0 : index
    %460 = vector.load %arg27[%c0_344, %c0_345] : memref<1x8xf32, #tpu.memory_space<vmem>>, vector<1x8xf32>
    %461 = vector.broadcast %460 : vector<1x8xf32> to vector<2x8xf32>
    %462 = arith.addf %459, %461 : vector<2x8xf32>
    %c0_346 = arith.constant 0 : index
    %c0_347 = arith.constant 0 : index
    %463 = vector.load %arg28[%c0_346, %c0_347] : memref<2x8xf32, #tpu.memory_space<vmem>>, vector<2x8xf32>
    tpu.vector_store %arg28[%c0_346, %c0_347], %462 {strides = array<i32>} : memref<2x8xf32, #tpu.memory_space<vmem>>, vector<2x8xf32>,
    return
  }
}

</mosaic_0001>

<bundles_post_ra>
// kernel: zolotyh_forward.1
= control target key start
LH: loop header
LB: loop body
LE: loop exit
PB: predicated region body
PF: predicated region fallthrough
CT: control target
= control target key end

     0   :  { %s10955_s0 = inlined_call_operand.vmem [shape: f32[2,64], index: 0, kind: input, shape index: {}, may-alias: {0,1}]   ;;  %s10956_s1 = inlined_call_operand.vmem [shape: f32[2,64], index: 1, kind: input, shape index: {}, may-alias: {0,1}]   ;;  %s10957_s2 = inlined_call_operand.vmem [shape: f32[3,8,1], index: 2, kind: input, shape index: {}]   ;;  %s10958_s3 = inlined_call_operand.vmem [shape: f32[8,1], index: 3, kind: input, shape index: {}]   ;;  %s10959_s4 = inlined_call_operand.vmem [shape: f32[2,8,8], index: 4, kind: input, shape index: {}]   ;;  %s10960_s5 = inlined_call_operand.vmem [shape: f32[8,1], index: 5, kind: input, shape index: {}]   ;;  %s10961_s6 = inlined_call_operand.vmem [shape: f32[3,16,8], index: 6, kind: input, shape index: {}]   ;;  %s10962_s7 = inlined_call_operand.vmem [shape: f32[16,1], index: 7, kind: input, shape index: {}]   ;;  %s10963_s8 = inlined_call_operand.vmem [shape: f32[2,16,16], index: 8, kind: input, shape index: {}]   ;;  %s10964_s9 = inlined_call_operand.vmem [shape: f32[16,1], index: 9, kind: input, shape index: {}]   ;;  %s10965_s10 = inlined_call_operand.vmem [shape: f32[3,32,16], index: 10, kind: input, shape index: {}]   ;;  %s10966_s11 = inlined_call_operand.vmem [shape: f32[32,1], index: 11, kind: input, shape index: {}]   ;;  %s10967_s12 = inlined_call_operand.vmem [shape: f32[2,32,32], index: 12, kind: input, shape index: {}]   ;;  %s10968_s13 = inlined_call_operand.vmem [shape: f32[32,1], index: 13, kind: input, shape index: {}]   ;;  %s10969_s14 = inlined_call_operand.vmem [shape: f32[3,32,32], index: 14, kind: input, shape index: {}]   ;;  %s10970_s15 = inlined_call_operand.vmem [shape: f32[32,1], index: 15, kind: input, shape index: {}]   ;;  %s10971_s16 = inlined_call_operand.vmem [shape: f32[2,32,32], index: 16, kind: input, shape index: {}]   ;;  %s10972_s17 = inlined_call_operand.vmem [shape: f32[32,1], index: 17, kind: input, shape index: {}]   ;;  %s10973_s18 = inlined_call_operand.vmem [shape: f32[3,1,32], index: 18, kind: input, shape index: {}]   ;;  %s10974_s19 = inlined_call_operand.<no memory space> [shape: f32[1,1], index: 19, kind: input, shape index: {}]   ;;  %s10975_s20 = inlined_call_operand.vmem [shape: f32[64,64], index: 20, kind: input, shape index: {}]   ;;  %s10976_s21 = inlined_call_operand.vmem [shape: f32[1,64], index: 21, kind: input, shape index: {}]   ;;  %s10977_s22 = inlined_call_operand.vmem [shape: f32[64,16], index: 22, kind: input, shape index: {}]   ;;  %s10978_s23 = inlined_call_operand.vmem [shape: f32[1,16], index: 23, kind: input, shape index: {}]   ;;  %s10979_s24 = inlined_call_operand.vmem [shape: f32[16,4], index: 24, kind: input, shape index: {}]   ;;  %s10980_s25 = inlined_call_operand.vmem [shape: f32[1,4], index: 25, kind: input, shape index: {}]   ;;  %s10981_s26 = inlined_call_operand.vmem [shape: f32[4,8], index: 26, kind: input, shape index: {}]   ;;  %s10982_s27 = inlined_call_operand.vmem [shape: f32[1,8], index: 27, kind: input, shape index: {}]   ;;  %s10983_s28 = inlined_call_operand.hbm [shape: f32[2,8], index: 28, kind: output, shape index: {}]  }
   0x1   :  { %11088 = sst [smem:[#allocation58_spill]] %s10955_s0  ;;  %v33_v0 = vstv %s10974_s19 }
   0x2   :  { %11089 = sst [smem:[#allocation59_spill]] %s10956_s1  ;;  %34 = vst [vmem:[#allocation2] sm:$0x1] %v33_v0 }
   0x3   :  { %11090 = sst [smem:[#allocation60_spill]] %s10957_s2 }
   0x4   :  { %11091 = sst [smem:[#allocation61_spill]] %s10958_s3 }
   0x5   :  { %11092 = sst [smem:[#allocation62_spill]] %s10959_s4 }
   0x6   :  { %11093 = sst [smem:[#allocation63_spill]] %s10960_s5 }
   0x7   :  { %11094 = sst [smem:[#allocation64_spill]] %s10961_s6 }
   0x8   :  { %11095 = sst [smem:[#allocation65_spill]] %s10962_s7 }
   0x9   :  { %11096 = sst [smem:[#allocation66_spill]] %s10963_s8 }
   0xa   :  { %11097 = sst [smem:[#allocation67_spill]] %s10964_s9 }
   0xb   :  { %11098 = sst [smem:[#allocation68_spill]] %s10965_s10 }
   0xc   :  { %11099 = sst [smem:[#allocation69_spill]] %s10966_s11 }
   0xd   :  { %11100 = sst [smem:[#allocation70_spill]] %s10967_s12 }
   0xe   :  { %v92_v1 = vlaneseq  ;;  %v11010_v2 = vmov 0.0|0.0   ;;  %s11101_s3 = sld [smem:[#allocation60_spill]]  ;;  %vm10994_vm0 = vmmov 0   ;;  %v11008_v7 = vmov 0.0   ;;  %s11107_s2 = sld [smem:[#allocation61_spill]] }
   0xf   :  { %8870 = vmatprep.subr.bf16.mxu0 %v11010_v2  ;;  %8882 = vmatprep.subr.bf16.mxu1 %v11010_v2  ;;  %v9365_v8 = vmov 0   ;;  %v11104_v19 = vmov 0  ;;  %v11012_v24 = vmov 1.0|1.0   ;;  %s11114_s1 = sld [smem:[#allocation63_spill]]  ;;  %s11115_s5 = sld [smem:[#allocation65_spill]] }
  0x10   :  { %v9525_v5 = vshrl.u32 %v92_v1, 7  ;;  %v9527_v6 = vand.u32 127, %v92_v1  ;;  %8032 = vmatprep.mubr.msk.f32.mxu0 %vm10994_vm0, %v11008_v7  ;;  %8051 = vmatprep.mubr.msk.f32.mxu1 %vm10994_vm0, %v11008_v7  ;;  %v11118_v36 = vmov 0  ;;  %v11120_v38 = vmov 0  ;;  %s11122_s10 = sld [smem:[#allocation67_spill]] }
  0x11   :  { %9336 = vset.pattern.permute.xlu0 %v9365_v8  ;;  %9337 = vset.pattern.permute.xlu1 %v9365_v8 }
  0x12   :  { %v9534_v9 = vadd.s32 8, %v9525_v5  ;;  %v103_v10 = vadd.s32 1, %v9525_v5  ;;  %v127_v11 = vadd.s32 1, %v9527_v6  ;;  %v9539_v12 = vadd.s32 16, %v9525_v5 }
  0x13   :  { %v9542_v13 = vadd.s32 24, %v9525_v5  ;;  %v9545_v14 = vadd.s32 32, %v9525_v5  ;;  %v9548_v15 = vadd.s32 40, %v9525_v5  ;;  %v9589_v28 = vadd.s32 48, %v9525_v5 }
  0x14   :  { %v323_v3 = vld [vmem:[%s11101_s3] sm:$0xff]  ;;  %v7206_v4 = vld [vmem:[%s11101_s3 + $0x10] sm:$0xff]  ;;  %v7205_v16 = vld [vmem:[%s11101_s3 + $0x8] sm:$0xff]  ;;  %v104_v17 = vadd.s32 1, %v9534_v9  ;;  %vm9555_vm1 = vcmp.eq.s32.totalorder %v103_v10, %v9527_v6  ;;  %vm9560_vm2 = vcmp.eq.s32.totalorder %v9525_v5, %v127_v11  ;;  %vm129_vm3 = vcmp.eq.s32.totalorder %v9534_v9, %v127_v11 }
  0x15   :  { %330 = vperm.xlu0 %9336, %v323_v3   ;;  %351 = vperm.xlu1 %9337, %v7206_v4   ;;  %v11105_v19 = vsel %vm9560_vm2, 4294967295, %v11104_v19  ;;  %v360_v20 = vld [vmem:[%s11107_s2] sm:$0xff]  ;;  %vm9570_vm4 = vmpackc.low %vm129_vm3, %vm9560_vm2  ;;  %v105_v22 = vadd.s32 1, %v9539_v12  ;;  %v106_v23 = vadd.s32 1, %v9542_v13  ;;  %vm130_vm5 = vcmp.eq.s32.totalorder %v9539_v12, %v127_v11  ;;  %v1067_v37 = vld [vmem:[%s11115_s5 + $0x8] sm:$0xff] }
  0x16   :  { %11106 = vst [vmem:[#allocation6_spill] sm:$0xff] %v11105_v19  ;;  %vm131_vm6 = vcmp.eq.s32.totalorder %v9542_v13, %v127_v11  ;;  %vm112_vm7 = vcmp.eq.s32.totalorder %v104_v17, %v9527_v6  ;;  %8884 = vmatpush3.bf16.msk.msra.mxu1 %vm9570_vm4, %v11012_v24  ;;  %v107_v26 = vadd.s32 1, %v9545_v14  ;;  %v108_v27 = vadd.s32 1, %v9548_v15  ;;  %v661_v31 = vld [vmem:[%s11114_s1] sm:$0xff] }
  0x17   :  { %vm9582_vm8 = vmpackc.low %vm131_vm6, %vm130_vm5  ;;  %vm113_vm10 = vcmp.eq.s32.totalorder %v105_v22, %v9527_v6  ;;  %vm114_vm11 = vcmp.eq.s32.totalorder %v106_v23, %v9527_v6  ;;  %8885 = vmatprep.subr.bf16.mxu1 %v11010_v2  ;;  %v9601_v30 = vadd.s32 56, %v9525_v5  ;;  %vm132_vm12 = vcmp.eq.s32.totalorder %v9545_v14, %v127_v11  ;;  %v1066_v32 = vld [vmem:[%s11115_s5] sm:$0xff] }
  0x18   :  { %vm9593_vm9 = vmpackc.low %vm112_vm7, %vm9555_vm1  ;;  %vm133_vm13 = vcmp.eq.s32.totalorder %v9548_v15, %v127_v11  ;;  %vm115_vm15 = vcmp.eq.s32.totalorder %v107_v26, %v9527_v6  ;;  %vm116_vm3 = vcmp.eq.s32.totalorder %v108_v27, %v9527_v6  ;;  %v109_v34 = vadd.s32 1, %v9589_v28  ;;  %v1406_v39 = vld [vmem:[%s11122_s10] sm:$0xff] }
  0x19   :  { %340 = vperm.xlu0 %9336, %v7205_v16   ;;  %363 = vperm.xlu1 %9337, %v360_v20   ;;  %vm9615_vm14 = vmpackc.low %vm114_vm11, %vm113_vm10  ;;  %v110_v35 = vadd.s32 1, %v9601_v30  ;;  %vm134_vm7 = vcmp.eq.s32.totalorder %v9589_v28, %v127_v11  ;;  %vm135_vm10 = vcmp.eq.s32.totalorder %v9601_v30, %v127_v11 }
  0x1a   :  { %8872 = vmatpush3.bf16.msk.msra.mxu0 %vm9593_vm9, %v11012_v24  ;;  %8887 = vmatpush3.bf16.msk.msra.mxu1 %vm9582_vm8, %v11012_v24  ;;  %vm9627_vm5 = vmpackc.low %vm133_vm13, %vm132_vm12 }
  0x1b   :  { %8873 = vmatprep.subr.bf16.mxu0 %v11010_v2  ;;  %8888 = vmatprep.subr.bf16.mxu1 %v11010_v2  ;;  %v11119_v36 = vsel %vm9627_vm5, 4294967295, %v11118_v36  ;;  %vm9637_vm6 = vmpackc.low %vm116_vm3, %vm115_vm15 }
  0x1c   :  { %v11121_v38 = vsel %vm9637_vm6, 4294967295, %v11120_v38 }
  0x1d   :  { %664 = vperm.xlu0 %9336, %v661_v31   ;;  %1070 = vperm.xlu1 %9337, %v1066_v32  }
  0x1e   :  { %8875 = vmatpush3.bf16.msk.msra.mxu0 %vm9615_vm14, %v11012_v24 }
  0x1f   :  { %8876 = vmatprep.subr.bf16.mxu0 %v11010_v2 }
  0x20   :  { %35 = vsyncpa [#allocation4], 0  ;;  %8890 = vmatpush3.bf16.msk.msra.mxu1 %vm9627_vm5, %v11012_v24  ;;  %vm117_vm11 = vcmp.eq.s32.totalorder %v109_v34, %v9527_v6  ;;  %vm118_vm12 = vcmp.eq.s32.totalorder %v110_v35, %v9527_v6  ;;  %v11123_v40 = vmov 0  ;;  %v1407_v41 = vld [vmem:[%s11122_s10 + $0x8] sm:$0xff]  ;;  %s11125_s2 = sld [smem:[#allocation69_spill]]  ;;  %v11126_v43 = vmov 0 }
  0x21   :  { %1075 = vperm.xlu0 %9336, %v1067_v37   ;;  %8891 = vmatprep.subr.bf16.mxu1 %v11010_v2  ;;  %vm9653_vm13 = vmpackc.low %vm135_vm10, %vm134_vm7  ;;  %s11128_s1 = sld [smem:[#allocation58_spill]]  ;;  %vm10996_vm3 = vcmask 523264   ;;  %v2304_v48 = vld [vmem:[%s10968_s13] sm:$0xff]  ;;  %v2305_v49 = vld [vmem:[%s10968_s13 + $0x8] sm:$0xff]  ;;  %v144_v61 = vmul.u32 2, %v9527_v6  ;;  %v11129_v62 = vmov 0 }
  0x22   :  { %v11124_v40 = vsel %vm9653_vm13, 4294967295, %v11123_v40  ;;  %1410 = vperm.xlu1 %9337, %v1406_v39   ;;  %8878 = vmatpush3.bf16.msk.msra.mxu0 %vm9637_vm6, %v11012_v24  ;;  %vm9667_vm15 = vmpackc.low %vm118_vm12, %vm117_vm11  ;;  %v2306_v50 = vld [vmem:[%s10968_s13 + $0x10] sm:$0xff]  ;;  %v2307_v51 = vld [vmem:[%s10968_s13 + $0x18] sm:$0xff]  ;;  %v11132_v0 = vmov 0  ;;  %v11134_v1 = vmov 0  ;;  %v11137_v3 = vmov 0 }
  0x23   :  { %8879 = vmatprep.subr.bf16.mxu0 %v11010_v2  ;;  %v11127_v43 = vsel %vm9667_vm15, 4294967295, %v11126_v43  ;;  %v2827_v52 = vld [vmem:[%s10970_s15] sm:$0xff]  ;;  %v2828_v53 = vld [vmem:[%s10970_s15 + $0x8] sm:$0xff]  ;;  %v2829_v54 = vld [vmem:[%s10970_s15 + $0x10] sm:$0xff]  ;;  %vm9739_vm7 = vcmp.eq.s32.totalorder %v9525_v5, %v144_v61  ;;  %vm146_vm10 = vcmp.eq.s32.totalorder %v9534_v9, %v144_v61  ;;  %v161_v63 = vadd.s32 1, %v144_v61  ;;  %s11154_s12 = sld [smem:[#allocation62_spill]] }
  0x24   :  { %8893 = vmatpush3.bf16.msk.msra.mxu1 %vm9653_vm13, %v11012_v24  ;;  %v2830_v55 = vld [vmem:[%s10970_s15 + $0x18] sm:$0xff]  ;;  %v3244_v56 = vld [vmem:[%s10972_s17] sm:$0xff]  ;;  %v3245_v57 = vld [vmem:[%s10972_s17 + $0x8] sm:$0xff]  ;;  %v11130_v62 = vsel %vm9739_vm7, 4294967295, %v11129_v62  ;;  %vm148_vm13 = vcmp.eq.s32.totalorder %v9542_v13, %v144_v61  ;;  %v11139_v4 = vmov 0  ;;  %v11141_v6 = vmov 0 }
  0x25   :  { %1415 = vperm.xlu0 %9336, %v1407_v41   ;;  %8906 = vmatprep.subr.bf16.mxu1 %v11010_v2  ;;  %v3246_v58 = vld [vmem:[%s10972_s17 + $0x10] sm:$0xff]  ;;  %v3247_v59 = vld [vmem:[%s10972_s17 + $0x18] sm:$0xff]  ;;  %v3691_v60 = vld [vmem:[#allocation2] sm:$0x1]  ;;  %11131 = vst [vmem:[#allocation7_spill] sm:$0xff] %v11130_v62  ;;  %vm9754_vm12 = vcmp.eq.s32.totalorder %v9525_v5, %v161_v63  ;;  %vm164_vm5 = vcmp.eq.s32.totalorder %v9539_v12, %v161_v63  ;;  %v11143_v8 = vmov 0 }
  0x26   :  { %v1887_v42 = vld [vmem:[%s11125_s2] sm:$0xff]  ;;  %v1888_v45 = vld [vmem:[%s11125_s2 + $0x8] sm:$0xff]  ;;  %8881 = vmatpush3.bf16.msk.msra.mxu0 %vm9667_vm15, %v11012_v24  ;;  %v1889_v46 = vld [vmem:[%s11125_s2 + $0x10] sm:$0xff]  ;;  %v11135_v1 = vsel %vm9754_vm12, 4294967295, %v11134_v1  ;;  %vm165_vm15 = vcmp.eq.s32.totalorder %v9542_v13, %v161_v63  ;;  %vm168_vm2 = vcmp.eq.s32.totalorder %v9589_v28, %v161_v63  ;;  %v11147_v10 = vmov 0  ;;  %s11155_s30 = sld [smem:[#allocation64_spill]] }
  0x27   :  { %v9677_v44 = vld [vmem:[%s11128_s1] sm:$0x1]  ;;  %1893 = vperm.xlu1 %9337, %v1887_v42   ;;  %8894 = vmatprep.subr.bf16.mxu0 %v11010_v2  ;;  %v1890_v47 = vld [vmem:[%s11125_s2 + $0x18] sm:$0xff]  ;;  %vm9746_vm11 = vmpackc.low %vm146_vm10, %vm9739_vm7  ;;  %11136 = vst [vmem:[#allocation8_spill] sm:$0xff] %v11135_v1  ;;  %vm147_vm10 = vcmp.eq.s32.totalorder %v9539_v12, %v144_v61  ;;  %vm167_vm7 = vcmp.eq.s32.totalorder %v9548_v15, %v161_v63  ;;  %v11149_v11 = vmov 0  ;;  %v9831_v12 = vsub.s32 0, %v9525_v5 }
  0x28   :  { %8052 = vmatmul.mubr.msk.f32.vlgmr.msra.gmra.mrb[0].mxu1 %vm10996_vm3, %v9677_v44  ;;  %v11133_v0 = vsel %vm9746_vm11, 4294967295, %v11132_v0  ;;  %vm9781_vm6 = vmpackc.low %vm165_vm15, %vm164_vm5  ;;  %s11157_s10 = sld [smem:[#allocation68_spill]]  ;;  %s11170_s15 = sld [smem:[#allocation70_spill]] }
  0x29   :  { %1898 = vperm.xlu0 %9336, %v1888_v45   ;;  %8089 = vmatprep.mubr.msk.f32.mxu1 %vm10994_vm0, %v11008_v7  ;;  %v11142_v6 = vsel %vm9781_vm6, 4294967295, %v11141_v6  ;;  %v9858_v39 = vld [vmem:[%s11154_s12 + $0x8] sm:$0xff]  ;;  %v9863_v41 = vld [vmem:[%s11154_s12] sm:$0xff]  ;;  %s11156_s12 = sld [smem:[#allocation66_spill]]  ;;  %s9368_s8 = smov [#allocation3]  }
  0x2a   :  { %8033 = vmatmul.mubr.msk.f32.vlgmr.msra.gmra.mrb[0].mxu0 %vm10996_vm3, %v9677_v44 }
  0x2b   :  { %1903 = vperm.xlu1 %9337, %v1889_v46   ;;  %8070 = vmatprep.mubr.msk.f32.mxu0 %vm10994_vm0, %v11008_v7  ;;  %vm163_vm0 = vcmp.eq.s32.totalorder %v9534_v9, %v161_v63  ;;  %v11145_v9 = vmov 0 }
  0x2c   :  { %8896 = vmatpush3.bf16.msk.msra.mxu0 %vm9746_vm11, %v11012_v24  ;;  %vm9761_vm3 = vmpackc.low %vm163_vm0, %vm9754_vm12  ;;  %vm166_vm12 = vcmp.eq.s32.totalorder %v9545_v14, %v161_v63 }
  0x2d   :  { %1908 = vperm.xlu0 %9336, %v1890_v47   ;;  %v11138_v3 = vsel %vm9761_vm3, 4294967295, %v11137_v3  ;;  %8897 = vmatprep.subr.bf16.mxu0 %v11010_v2  ;;  %vm9774_vm0 = vmpackc.low %vm148_vm13, %vm147_vm10  ;;  %vm149_vm13 = vcmp.eq.s32.totalorder %v9545_v14, %v144_v61  ;;  %vm150_vm10 = vcmp.eq.s32.totalorder %v9548_v15, %v144_v61  ;;  %v346_v15 = vrot.slane %v9677_v44, %v9831_v12 }
  0x2e   :  { %8908 = vmatpush3.bf16.msk.msra.mxu1 %vm9761_vm3, %v11012_v24  ;;  %v11140_v4 = vsel %vm9774_vm0, 4294967295, %v11139_v4  ;;  %vm9794_vm5 = vmpackc.low %vm150_vm10, %vm149_vm13  ;;  %vm151_vm13 = vcmp.eq.s32.totalorder %v9589_v28, %v144_v61  ;;  %vm152_vm10 = vcmp.eq.s32.totalorder %v9601_v30, %v144_v61 }
  0x2f   :  { %2310 = vperm.xlu1 %9337, %v2304_v48   ;;  %8909 = vmatprep.subr.bf16.mxu1 %v11010_v2  ;;  %v11144_v8 = vsel %vm9794_vm5, 4294967295, %v11143_v8  ;;  %vm9801_vm15 = vmpackc.low %vm167_vm7, %vm166_vm12 }
  0x30   :  { %8899 = vmatpush3.bf16.msk.msra.mxu0 %vm9774_vm0, %v11012_v24  ;;  %v11146_v9 = vsel %vm9801_vm15, 4294967295, %v11145_v9  ;;  %vm9814_vm7 = vmpackc.low %vm152_vm10, %vm151_vm13  ;;  %vm11153_vm13 = vmmov 0   ;;  %vm11040_vm10 = vcmask 64512  }
  0x31   :  { %2315 = vperm.xlu0 %9336, %v2305_v49   ;;  %8900 = vmatprep.subr.bf16.mxu0 %v11010_v2  ;;  %v11148_v10 = vsel %vm9814_vm7, 4294967295, %v11147_v10 }
  0x32   :  { %8911 = vmatpush3.bf16.msk.msra.mxu1 %vm9781_vm6, %v11012_v24 }
  0x33   :  { %2320 = vperm.xlu1 %9337, %v2306_v50   ;;  %8912 = vmatprep.subr.bf16.mxu1 %v11010_v2 }
  0x34   :  { %8902 = vmatpush3.bf16.msk.msra.mxu0 %vm9794_vm5, %v11012_v24  ;;  %vm169_vm5 = vcmp.eq.s32.totalorder %v9601_v30, %v161_v63 }
  0x35   :  { %2325 = vperm.xlu0 %9336, %v2307_v51   ;;  %8903 = vmatprep.subr.bf16.mxu0 %v11010_v2  ;;  %vm9821_vm12 = vmpackc.low %vm169_vm5, %vm168_vm2  ;;  %vm11151_vm2 = vcmask 523264  }
  0x36   :  { %8914 = vmatpush3.bf16.msk.msra.mxu1 %vm9801_vm15, %v11012_v24  ;;  %v11150_v11 = vsel %vm9821_vm12, 4294967295, %v11149_v11  ;;  %vm11152_vm5 = vmmov %vm11151_vm2  ;;  %vm11188_vm15 = vcmask 261120  }
  0x37   :  { %2833 = vperm.xlu1 %9337, %v2827_v52   ;;  %8915 = vmatprep.subr.bf16.mxu1 %v11010_v2 }
  0x38   :  { %8905 = vmatpush3.bf16.msk.msra.mxu0 %vm9814_vm7, %v11012_v24 }
  0x39   :  { %2838 = vperm.xlu0 %9336, %v2828_v53   ;;  %8092 = vmatprep.subr.mxu0 %v11008_v7 }
  0x3a   :  { %8917 = vmatpush3.bf16.msk.msra.mxu1 %vm9821_vm12, %v11012_v24  ;;  %vm11186_vm12 = vnez %v11135_v1 }
  0x3b   :  { %2843 = vperm.xlu1 %9337, %v2829_v54   ;;  %8097 = vmatprep.subr.mxu1 %v11008_v7 }
  0x3d   :  { %2848 = vperm.xlu0 %9336, %v2830_v55   ;;  %v9898_v55 = vld [vmem:[%s11155_s30 + $0x10] sm:$0xff] }
  0x3f   :  { %3250 = vperm.xlu1 %9337, %v3244_v56   ;;  %v9907_v56 = vld [vmem:[%s11155_s30 + $0x18] sm:$0xff] }
  0x41   :  { %3255 = vperm.xlu0 %9336, %v3245_v57   ;;  %v9926_v57 = vld [vmem:[%s11155_s30] sm:$0xff] }
  0x43   :  { %3260 = vperm.xlu1 %9337, %v3246_v58  }
  0x45   :  { %3265 = vperm.xlu0 %9336, %v3247_v59  }
  0x47   :  { %3694 = vperm.xlu1 %9337, %v3691_v60   ;;  %v9933_v60 = vld [vmem:[%s11155_s30 + $0x8] sm:$0xff] }
  0x94   :  { %v9833_v13 = vpop.permute.xlu0 %330  ;;  %v9841_v27 = vpop.permute.xlu1 %351 }
  0x98   :  { %v9839_v26 = vpop.permute.xlu0 %340  ;;  %v9846_v34 = vpop.permute.xlu1 %363 }
  0x99   :  { %v347_v5 = vmul.f32 %v346_v15, %v9839_v26  ;;  %v9947_v15 = vld [vmem:[%s11155_s30 + $0x28] sm:$0xff] }
  0x9c   :  { %v9892_v52 = vpop.permute.xlu0 %664 }
  0xfb   :  { %v319_v14 = vpop.f32.mrb[0].mxu1 }
  0xfc   :  { %v357_v16 = vrot.slane %v319_v14, %v9831_v12  ;;  %v8053_v17 = vpop.f32.mrb[1].mxu1  ;;  %v9938_v14 = vld [vmem:[%s11155_s30 + $0x20] sm:$0xff] }
  0xfd   :  { %v249_v20 = vpop.f32.mrb[0].mxu0 }
  0xfe   :  { %v336_v22 = vrot.slane %v249_v20, %v9831_v12  ;;  %v8034_v23 = vpop.f32.mrb[1].mxu0  ;;  %v358_v30 = vmul.f32 %v357_v16, %v9841_v27  ;;  %v9951_v16 = vpop.permute.xlu0 %1075 }
  0xff   :  { %v9953_v20 = vpop.permute.xlu1 %1070 }
 0x100   :  { %v337_v28 = vmul.f32 %v336_v22, %v9833_v13 }
 0x102   :  { %v348_v31 = vadd.f32 %v347_v5, %v337_v28 }
 0x104   :  { %v359_v32 = vadd.f32 %v358_v30, %v348_v31  ;;  %v9979_v31 = vld [vmem:[%s11156_s12 + $0x10] sm:$0xff] }
 0x106   :  { %v366_v35 = vadd.f32 %v9846_v34, %v359_v32 }
 0x108   :  { %v367_v37 = vmax.f32 %v366_v35, 0.0 }
 0x10a   :  { %8071 = vmatmul.mubr.msk.f32.vlgmr.msra.gmra.mrb[2].mxu0 %vm11151_vm2, %v367_v37  ;;  %8090 = vmatmul.mubr.msk.f32.vlgmr.msra.gmra.mrb[2].mxu1 %vm11152_vm5, %v367_v37  ;;  %vm11036_vm2 = vcmask 261120   ;;  %vm11023_vm5 = vcmask 130048  }
 0x10b   :  { %8094 = vmatprep.mubr.msk.f32.mxu0 %vm11153_vm13, %v11008_v7  ;;  %8099 = vmatprep.mubr.msk.f32.mxu1 %vm11153_vm13, %v11008_v7 }
 0x1dd   :  { %v437_v42 = vpop.f32.mrb[2].mxu0  ;;  %v507_v44 = vpop.f32.mrb[2].mxu1 }
 0x1de   :  { %v8072_v45 = vpop.f32.mrb[3].mxu0  ;;  %v8091_v46 = vpop.f32.mrb[3].mxu1  ;;  %8093 = vmatpush3.msra.mxu0 %v507_v44  ;;  %8098 = vmatpush3.msra.mxu1 %v437_v42 }
 0x1df   :  { %8095 = vmatmul.mubr.msk.f32.vlgmr.msra.gmra.mrb[4].mxu0 %vm11040_vm10, %v9858_v39  ;;  %8100 = vmatmul.mubr.msk.f32.vlgmr.msra.gmra.mrb[4].mxu1 %vm11040_vm10, %v9863_v41  ;;  %v9986_v46 = vld [vmem:[%s11156_s12 + $0x18] sm:$0xff] }
 0x1e0   :  { %8918 = vmatprep.subr.bf16.mxu0 %v11010_v2  ;;  %8924 = vmatprep.subr.bf16.mxu1 %v11010_v2 }
 0x1e1   :  { %8920 = vmatpush3.bf16.msk.msra.mxu0 %vm9593_vm9, %v11012_v24  ;;  %8926 = vmatpush3.bf16.msk.msra.mxu1 %vm9570_vm4, %v11012_v24 }
 0x1e2   :  { %8921 = vmatprep.subr.bf16.mxu0 %v11010_v2  ;;  %8927 = vmatprep.subr.bf16.mxu1 %v11010_v2 }
 0x1e3   :  { %8110 = vmatprep.mubr.msk.f32.mxu0 %vm11153_vm13, %v11008_v7  ;;  %8121 = vmatprep.mubr.msk.f32.mxu1 %vm11153_vm13, %v11008_v7 }
 0x1e5   :  { %8923 = vmatpush3.bf16.msk.msra.mxu0 %vm9615_vm14, %v11012_v24  ;;  %8929 = vmatpush3.bf16.msk.msra.mxu1 %vm9582_vm8, %v11012_v24 }
 0x1e6   :  { %8931 = vmatprep.subr.msk.bf16.mxu1 %vm9746_vm11, %v11012_v24 }
 0x2b2   :  { %v584_v47 = vpop.f32.mrb[4].mxu0  ;;  %v657_v48 = vpop.f32.mrb[4].mxu1 }
 0x2b3   :  { %v658_v49 = vadd.f32 %v657_v48, %v584_v47  ;;  %v8096_v50 = vpop.f32.mrb[5].mxu0  ;;  %v8101_v51 = vpop.f32.mrb[5].mxu1  ;;  %v9991_v47 = vld [vmem:[%s11156_s12] sm:$0xff]  ;;  %v10003_v48 = vld [vmem:[%s11156_s12 + $0x8] sm:$0xff] }
 0x2b4   :  { %v10015_v51 = vpop.permute.xlu1 %1410 }
 0x2b5   :  { %v667_v53 = vadd.f32 %v9892_v52, %v658_v49  ;;  %v10013_v49 = vpop.permute.xlu0 %1415 }
 0x2b7   :  { %v668_v54 = vmax.f32 %v667_v53, 0.0 }
 0x2b9   :  { %8111 = vmatmul.mubr.msk.f32.vlgmr.msra.gmra.mrb[6].mxu0 %vm11036_vm2, %v668_v54  ;;  %8122 = vmatmul.mubr.msk.f32.vlgmr.msra.gmra.mrb[6].mxu1 %vm11036_vm2, %v668_v54 }
 0x2ba   :  { %8124 = vmatprep.subr.mxu0 %v668_v54  ;;  %8126 = vmatprep.mubr.msk.f32.mxu0 %vm11040_vm10, %v9898_v55 }
 0x2bb   :  { %8125 = vmatpush3.msra.mxu0 %v668_v54  ;;  %8933 = vmatpush3.bf16.msk.msra.mxu1 %vm9746_vm11, %v11012_v24 }
 0x2bc   :  { %8935 = vmatprep.subr.msk.bf16.mxu1 %vm9774_vm0, %v11012_v24 }
 0x2bd   :  { %8127 = vmatmul.mubr.msk.f32.vlgmr.msra.gmra.mrb[8].mxu0 %vm11040_vm10, %v9907_v56 }
 0x2be   :  { %8131 = vmatprep.mubr.msk.f32.mxu0 %vm11040_vm10, %v9926_v57 }
 0x2bf   :  { %8937 = vmatpush3.bf16.msk.msra.mxu1 %vm9774_vm0, %v11012_v24 }
 0x2c0   :  { %8939 = vmatprep.subr.msk.bf16.mxu1 %vm9761_vm3, %v11012_v24 }
 0x38c   :  { %v739_v58 = vpop.f32.mrb[6].mxu0  ;;  %v809_v59 = vpop.f32.mrb[6].mxu1 }
 0x38d   :  { %v8112_v61 = vpop.f32.mrb[7].mxu0  ;;  %v8123_v63 = vpop.f32.mrb[7].mxu1  ;;  %8129 = vmatprep.subr.mxu0 %v739_v58 }
 0x38e   :  { %8130 = vmatpush3.msra.mxu0 %v739_v58  ;;  %v10022_v63 = vld [vmem:[%s11157_s10 + $0x20] sm:$0xff] }
 0x38f   :  { %8132 = vmatmul.mubr.msk.f32.vlgmr.msra.gmra.mrb[8].mxu0 %vm11040_vm10, %v9933_v60  ;;  %8134 = vmatprep.subr.mxu0 %v809_v59 }
 0x390   :  { %8135 = vmatpush3.msra.mxu0 %v809_v59  ;;  %8136 = vmatprep.mubr.msk.f32.mxu0 %vm11040_vm10, %v9938_v14 }
 0x397   :  { %8137 = vmatmul.mubr.msk.f32.vlgmr.msra.gmra.mrb[8].mxu0 %vm11040_vm10, %v9947_v15 }
 0x398   :  { %8165 = vmatprep.mubr.msk.f32.mxu0 %vm11023_vm5, %v9979_v31 }
 0x46a   :  { %v8138_v17 = vpop.f32.mrb[8].mxu0 }
 0x46b   :  { %v1079_v22 = vadd.f32 %v8138_v17, %v9951_v16  ;;  %v1055_v23 = vpop.f32.mrb[9].mxu0 }
 0x46c   :  { %v1078_v5 = vadd.f32 %v9953_v20, %v1055_v23  ;;  %v10046_v23 = vld [vmem:[%s11157_s10 + $0x30] sm:$0xff] }
 0x46d   :  { %v1081_v30 = vmax.f32 %v1079_v22, 0.0  ;;  %v10039_v22 = vld [vmem:[%s11157_s10 + $0x28] sm:$0xff] }
 0x46e   :  { %v1080_v28 = vmax.f32 %v1078_v5, 0.0  ;;  %v10051_v5 = vld [vmem:[%s11157_s10 + $0x38] sm:$0xff] }
 0x470   :  { %8147 = vmatprep.mubr.msk.f32.mxu1 %vm11036_vm2, %v1080_v28 }
 0x471   :  { %8148 = vmatmul.mubr.msk.f32.vlgmr.msra.gmra.mrb[8].mxu1 %vm11036_vm2, %v1081_v30 }
 0x472   :  { %8941 = vmatpush3.bf16.msk.msra.mxu1 %vm9761_vm3, %v11012_v24  ;;  %8158 = vmatprep.mubr.msk.f32.mxu1 %vm11036_vm2, %v1080_v28  ;;  %v10060_v28 = vld [vmem:[%s11157_s10] sm:$0xff] }
 0x473   :  { %8943 = vmatprep.subr.msk.bf16.mxu1 %vm9781_vm6, %v11012_v24 }
 0x476   :  { %8945 = vmatpush3.bf16.msk.msra.mxu1 %vm9781_vm6, %v11012_v24 }
 0x477   :  { %8955 = vmatprep.subr.msk.bf16.mxu1 %vm9593_vm9, %v11012_v24 }
 0x479   :  { %8159 = vmatmul.mubr.msk.f32.vlgmr.msra.gmra.mrb[10].mxu1 %vm11036_vm2, %v1081_v30 }
 0x47a   :  { %8957 = vmatpush3.bf16.msk.msra.mxu1 %vm9593_vm9, %v11012_v24 }
 0x544   :  { %v8149_v32 = vpop.f32.mrb[8].mxu1 }
 0x545   :  { %v1154_v35 = vpop.f32.mrb[9].mxu1 }
 0x546   :  { %v8950_v37 = vpack.c.bf16 %v8149_v32, %v1154_v35 }
 0x54c   :  { %v8160_v42 = vpop.f32.mrb[10].mxu1 }
 0x54d   :  { %v1229_v44 = vpop.f32.mrb[11].mxu1 }
 0x54e   :  { %v8946_v45 = vpack.c.bf16 %v8160_v42, %v1229_v44 }
 0x550   :  { %8947 = vmatprep.subr.bf16.mxu0 %v8946_v45 }
 0x551   :  { %8949 = vmatpush3.bf16.msra.mxu0 %v8946_v45  ;;  %v10067_v45 = vld [vmem:[%s11157_s10 + $0x8] sm:$0xff] }
 0x552   :  { %8951 = vmatprep.subr.bf16.mxu0 %v8950_v37  ;;  %11158 = vst [vmem:[#allocation9_spill] sm:$0xff] %v10067_v45 }
 0x554   :  { %8166 = vmatmul.mubr.msk.f32.vlgmr.msra.gmra.mrb[10].mxu0 %vm11023_vm5, %v9986_v46 }
 0x555   :  { %8953 = vmatpush3.bf16.msra.mxu0 %v8950_v37  ;;  %8172 = vmatprep.mubr.msk.f32.mxu0 %vm11023_vm5, %v9991_v47 }
 0x556   :  { %8959 = vmatprep.subr.msk.bf16.mxu0 %vm9570_vm4, %v11012_v24 }
 0x55c   :  { %8173 = vmatmul.mubr.msk.f32.vlgmr.msra.gmra.mrb[10].mxu0 %vm11023_vm5, %v10003_v48 }
 0x55d   :  { %8961 = vmatpush3.bf16.msk.msra.mxu0 %vm9570_vm4, %v11012_v24 }
 0x55e   :  { %8975 = vmatprep.subr.msk.bf16.mxu0 %vm9746_vm11, %v11012_v24 }
 0x62f   :  { %v8174_v50 = vpop.f32.mrb[10].mxu0 }
 0x630   :  { %v1419_v53 = vadd.f32 %v8174_v50, %v10013_v49  ;;  %v1397_v54 = vpop.f32.mrb[11].mxu0  ;;  %v10072_v50 = vld [vmem:[%s11157_s10 + $0x10] sm:$0xff] }
 0x631   :  { %v1418_v58 = vadd.f32 %v10015_v51, %v1397_v54  ;;  %11159 = vst [vmem:[#allocation10_spill] sm:$0xff] %v10072_v50  ;;  %v10086_v54 = vld [vmem:[%s11157_s10 + $0x40] sm:$0xff] }
 0x632   :  { %v1421_v59 = vmax.f32 %v1419_v53, 0.0  ;;  %v10081_v53 = vld [vmem:[%s11157_s10 + $0x18] sm:$0xff]  ;;  %11161 = vst [vmem:[#allocation12_spill] sm:$0xff] %v10086_v54 }
 0x633   :  { %v1420_v61 = vmax.f32 %v1418_v58, 0.0  ;;  %11160 = vst [vmem:[#allocation11_spill] sm:$0xff] %v10081_v53  ;;  %v10095_v58 = vld [vmem:[%s11157_s10 + $0x48] sm:$0xff] }
 0x634   :  { %11162 = vst [vmem:[#allocation13_spill] sm:$0xff] %v10095_v58 }
 0x635   :  { %8179 = vmatprep.mubr.msk.f32.mxu1 %vm11023_vm5, %v1420_v61  ;;  %8186 = vmatprep.mubr.msk.f32.mxu0 %vm11023_vm5, %v1420_v61  ;;  %v8962_v17 = vpack.c.bf16 %v1421_v59, %v1420_v61  ;;  %v10109_v61 = vld [vmem:[%s11157_s10 + $0x58] sm:$0xff] }
 0x636   :  { %8180 = vmatmul.mubr.msk.f32.vlgmr.msra.gmra.mrb[12].mxu1 %vm11023_vm5, %v1421_v59  ;;  %8187 = vmatmul.mubr.msk.f32.vlgmr.msra.gmra.mrb[12].mxu0 %vm11023_vm5, %v1421_v59  ;;  %v10100_v59 = vld [vmem:[%s11157_s10 + $0x50] sm:$0xff]  ;;  %11164 = vst [vmem:[#allocation15_spill] sm:$0xff] %v10109_v61 }
 0x637   :  { %8963 = vmatprep.subr.bf16.mxu1 %v8962_v17  ;;  %8193 = vmatprep.mubr.msk.f32.mxu1 %vm11023_vm5, %v10022_v63  ;;  %11163 = vst [vmem:[#allocation14_spill] sm:$0xff] %v10100_v59 }
 0x638   :  { %8965 = vmatpush3.bf16.msra.mxu1 %v8962_v17  ;;  %8977 = vmatpush3.bf16.msk.msra.mxu0 %vm9746_vm11, %v11012_v24  ;;  %v10113_v17 = vpop.permute.xlu0 %1898 }
 0x639   :  { %8979 = vmatprep.subr.msk.bf16.mxu0 %vm9761_vm3, %v11012_v24  ;;  %11165 = vst [vmem:[#allocation16_spill] sm:$0xff] %v10113_v17 }
 0x63b   :  { %8194 = vmatmul.mubr.msk.f32.vlgmr.msra.gmra.mrb[14].mxu1 %vm11023_vm5, %v10039_v22 }
 0x63c   :  { %8196 = vmatprep.mubr.msk.f32.mxu1 %vm11023_vm5, %v10046_v23 }
 0x63f   :  { %8197 = vmatmul.mubr.msk.f32.gmra.mrb[16].mxu1 %vm11023_vm5, %v10051_v5 }
 0x640   :  { %8203 = vmatprep.mubr.msk.f32.mxu1 %vm11023_vm5, %v10060_v28 }
 0x709   :  { %v8181_v30 = vpop.f32.mrb[12].mxu1  ;;  %v8188_v32 = vpop.f32.mrb[12].mxu0 }
 0x70a   :  { %v1494_v35 = vpop.f32.mrb[13].mxu1  ;;  %v1569_v37 = vpop.f32.mrb[13].mxu0 }
 0x70b   :  { %v8966_v42 = vpack.c.bf16 %v8181_v30, %v1494_v35  ;;  %v8970_v44 = vpack.c.bf16 %v8188_v32, %v1569_v37  ;;  %v10115_v30 = vpop.permute.xlu1 %1893 }
 0x70c   :  { %11166 = vst [vmem:[#allocation17_spill] sm:$0xff] %v10115_v30 }
 0x70d   :  { %8967 = vmatprep.subr.bf16.mxu1 %v8966_v42 }
 0x70e   :  { %8969 = vmatpush3.bf16.msra.mxu1 %v8966_v42 }
 0x70f   :  { %8971 = vmatprep.subr.bf16.mxu1 %v8970_v44  ;;  %v10121_v24 = vpop.permute.xlu1 %1903 }
 0x710   :  { %11168 = vst [vmem:[#allocation19_spill] sm:$0xff] %v10121_v24 }
 0x711   :  { %8204 = vmatmul.mubr.msk.f32.vlgmr.msra.gmra.mrb[14].mxu1 %vm11023_vm5, %v10067_v45 }
 0x712   :  { %8973 = vmatpush3.bf16.msra.mxu1 %v8970_v44  ;;  %8206 = vmatprep.mubr.msk.f32.mxu1 %vm11023_vm5, %v10072_v50  ;;  %v10119_v44 = vpop.permute.xlu0 %1908 }
 0x713   :  { %11167 = vst [vmem:[#allocation18_spill] sm:$0xff] %v10119_v44 }
 0x715   :  { %8207 = vmatmul.mubr.msk.f32.gmra.mrb[16].mxu1 %vm11023_vm5, %v10081_v53 }
 0x716   :  { %8213 = vmatprep.mubr.msk.f32.mxu1 %vm11023_vm5, %v10086_v54 }
 0x719   :  { %8214 = vmatmul.mubr.msk.f32.vlgmr.msra.gmra.mrb[14].mxu1 %vm11023_vm5, %v10095_v58 }
 0x71a   :  { %8216 = vmatprep.mubr.msk.f32.mxu1 %vm11023_vm5, %v10100_v59 }
 0x71d   :  { %8217 = vmatmul.mubr.msk.f32.gmra.mrb[16].mxu1 %vm11023_vm5, %v10109_v61 }
 0x7ec   :  { %v8215_v32 = vpop.f32.mrb[14].mxu1 }
 0x7ed   :  { %v1912_v35 = vadd.f32 %v8215_v32, %v10113_v17  ;;  %v1864_v37 = vpop.f32.mrb[15].mxu1  ;;  %v11169_v17 = vmov 1.0|1.0  }
 0x7ee   :  { %v1911_v42 = vadd.f32 %v10115_v30, %v1864_v37 }
 0x7ef   :  { %v1916_v59 = vmax.f32 %v1912_v35, 0.0 }
 0x7f0   :  { %v1915_v7 = vmax.f32 %v1911_v42, 0.0  ;;  %v8218_v2 = vpop.f32.mrb[16].mxu1 }
 0x7f1   :  { %v1914_v58 = vadd.f32 %v8218_v2, %v10119_v44  ;;  %v1874_v61 = vpop.f32.mrb[17].mxu1  ;;  %v10139_v2 = vld [vmem:[%s11170_s15 + $0x20] sm:$0xff] }
 0x7f2   :  { %v1913_v54 = vadd.f32 %v10121_v24, %v1874_v61  ;;  %8223 = vmatprep.mubr.msk.f32.mxu0 %vm11023_vm5, %v1915_v7  ;;  %11171 = vst [vmem:[#allocation20_spill] sm:$0xff] %v10139_v2 }
 0x7f3   :  { %8224 = vmatmul.mubr.msk.f32.vlgmr.msra.gmra.mrb[14].mxu0 %vm11023_vm5, %v1916_v59  ;;  %v1918_v37 = vmax.f32 %v1914_v58, 0.0 }
 0x7f4   :  { %v1917_v32 = vmax.f32 %v1913_v54, 0.0  ;;  %8981 = vmatpush3.bf16.msk.msra.mxu0 %vm9761_vm3, %v11169_v17 }
 0x7f6   :  { %8226 = vmatprep.mubr.msk.f32.mxu0 %vm11023_vm5, %v1917_v32 }
 0x7f7   :  { %8227 = vmatmul.mubr.msk.f32.gmra.mrb[16].mxu0 %vm11023_vm5, %v1918_v37 }
 0x7f8   :  { %8233 = vmatprep.mubr.msk.f32.mxu0 %vm11023_vm5, %v1915_v7 }
 0x7fb   :  { %8234 = vmatmul.mubr.msk.f32.vlgmr.msra.gmra.mrb[18].mxu0 %vm11023_vm5, %v1916_v59 }
 0x7fc   :  { %8236 = vmatprep.mubr.msk.f32.mxu0 %vm11023_vm5, %v1917_v32 }
 0x7ff   :  { %8237 = vmatmul.mubr.msk.f32.gmra.mrb[20].mxu0 %vm11023_vm5, %v1918_v37  ;;  %vm11179_vm5 = vnez %v11105_v19 }
 0x800   :  { %8247 = vmatprep.mubr.msk.f32.mxu0 %vm11036_vm2, %v10139_v2  ;;  %v10146_v2 = vld [vmem:[%s11170_s15 + $0x28] sm:$0xff] }
 0x801   :  { %11172 = vst [vmem:[#allocation21_spill] sm:$0xff] %v10146_v2 }
 0x8c6   :  { %v8225_v54 = vpop.f32.mrb[14].mxu0 }
 0x8c7   :  { %v1997_v58 = vpop.f32.mrb[15].mxu0 }
 0x8c8   :  { %v8990_v61 = vpack.c.bf16 %v8225_v54, %v1997_v58  ;;  %v10151_v54 = vld [vmem:[%s11170_s15 + $0x30] sm:$0xff] }
 0x8c9   :  { %11173 = vst [vmem:[#allocation22_spill] sm:$0xff] %v10151_v54  ;;  %v10179_v58 = vld [vmem:[%s11170_s15 + $0x10] sm:$0xff] }
 0x8ca   :  { %v8228_v35 = vpop.f32.mrb[16].mxu0  ;;  %11177 = vst [vmem:[#allocation26_spill] sm:$0xff] %v10179_v58 }
 0x8cb   :  { %v2007_v42 = vpop.f32.mrb[17].mxu0 }
 0x8cc   :  { %v8994_v7 = vpack.c.bf16 %v8228_v35, %v2007_v42  ;;  %v11031_v35 = vmov 1.0   ;;  %v10201_v42 = vpop.permute.xlu0 %2315 }
 0x8cd   :  { %8267 = vmatprep.subr.msk.mxu1 %vm9555_vm1, %v11031_v35  ;;  %11180 = vst [vmem:[#allocation28_spill] sm:$0xff] %v10201_v42 }
 0x8ce   :  { %v8235_v24 = vpop.f32.mrb[18].mxu0  ;;  %8268 = vmatpush3.msk.msra.mxu1 %vm9555_vm1, %v11031_v35 }
 0x8cf   :  { %v2082_v59 = vpop.f32.mrb[19].mxu0  ;;  %8275 = vmatprep.subr.msk.mxu1 %vm11179_vm5, %v11031_v35 }
 0x8d0   :  { %v8982_v44 = vpack.c.bf16 %v8235_v24, %v2082_v59  ;;  %v10160_v24 = vld [vmem:[%s11170_s15 + $0x38] sm:$0xff] }
 0x8d1   :  { %11174 = vst [vmem:[#allocation23_spill] sm:$0xff] %v10160_v24 }
 0x8d2   :  { %v8238_v32 = vpop.f32.mrb[20].mxu0  ;;  %8983 = vmatprep.subr.bf16.mxu0 %v8982_v44 }
 0x8d3   :  { %v2092_v37 = vpop.f32.mrb[21].mxu0  ;;  %8985 = vmatpush3.bf16.msra.mxu0 %v8982_v44  ;;  %v10174_v44 = vld [vmem:[%s11170_s15 + $0x8] sm:$0xff] }
 0x8d4   :  { %v8986_v30 = vpack.c.bf16 %v8238_v32, %v2092_v37  ;;  %11176 = vst [vmem:[#allocation25_spill] sm:$0xff] %v10174_v44 }
 0x8d6   :  { %8987 = vmatprep.subr.bf16.mxu0 %v8986_v30 }
 0x8d7   :  { %8989 = vmatpush3.bf16.msra.mxu0 %v8986_v30  ;;  %v10165_v30 = vld [vmem:[%s11170_s15] sm:$0xff] }
 0x8d8   :  { %8991 = vmatprep.subr.bf16.mxu0 %v8990_v61  ;;  %11175 = vst [vmem:[#allocation24_spill] sm:$0xff] %v10165_v30 }
 0x8da   :  { %8248 = vmatmul.mubr.msk.f32.vlgmr.msra.gmra.mrb[22].mxu0 %vm11036_vm2, %v10146_v2 }
 0x8db   :  { %8993 = vmatpush3.bf16.msra.mxu0 %v8990_v61  ;;  %8250 = vmatprep.mubr.msk.f32.mxu0 %vm11036_vm2, %v10151_v54  ;;  %v10188_v61 = vld [vmem:[%s11170_s15 + $0x18] sm:$0xff] }
 0x8dc   :  { %8995 = vmatprep.subr.bf16.mxu0 %v8994_v7  ;;  %11178 = vst [vmem:[#allocation27_spill] sm:$0xff] %v10188_v61 }
 0x8de   :  { %8251 = vmatmul.mubr.msk.f32.gmra.mrb[24].mxu0 %vm11036_vm2, %v10160_v24 }
 0x8df   :  { %8997 = vmatpush3.bf16.msra.mxu0 %v8994_v7  ;;  %8261 = vmatprep.mubr.msk.f32.mxu0 %vm11036_vm2, %v10165_v30  ;;  %v10203_v7 = vpop.permute.xlu1 %2310 }
 0x8e0   :  { %11181 = vst [vmem:[#allocation29_spill] sm:$0xff] %v10203_v7 }
 0x8e2   :  { %8262 = vmatmul.mubr.msk.f32.vlgmr.msra.gmra.mrb[22].mxu0 %vm11036_vm2, %v10174_v44  ;;  %v10207_v44 = vpop.permute.xlu0 %2325 }
 0x8e3   :  { %8264 = vmatprep.mubr.msk.f32.mxu0 %vm11036_vm2, %v10179_v58  ;;  %11182 = vst [vmem:[#allocation30_spill] sm:$0xff] %v10207_v44  ;;  %v10209_v54 = vpop.permute.xlu1 %2320 }
 0x8e4   :  { %11183 = vst [vmem:[#allocation31_spill] sm:$0xff] %v10209_v54 }
 0x8e6   :  { %8265 = vmatmul.mubr.msk.f32.gmra.mrb[24].mxu0 %vm11036_vm2, %v10188_v61  ;;  %vm11185_vm2 = vnez %v11130_v62 }
 0x9b5   :  { %v8263_v59 = vpop.f32.mrb[22].mxu0 }
 0x9b6   :  { %v2329_v32 = vadd.f32 %v8263_v59, %v10201_v42  ;;  %v2285_v37 = vpop.f32.mrb[23].mxu0 }
 0x9b7   :  { %v2328_v61 = vadd.f32 %v10203_v7, %v2285_v37 }
 0x9b8   :  { %v2333_v58 = vmax.f32 %v2329_v32, 0.0  ;;  %v11184_v32 = vmov 1.0  }
 0x9b9   :  { %v2332_v30 = vmax.f32 %v2328_v61, 0.0  ;;  %v8266_v24 = vpop.f32.mrb[24].mxu0 }
 0x9ba   :  { %v2331_v2 = vadd.f32 %v8266_v24, %v10207_v44  ;;  %v2295_v35 = vpop.f32.mrb[25].mxu0 }
 0x9bb   :  { %v2330_v53 = vadd.f32 %v10209_v54, %v2295_v35  ;;  %8269 = vmatprep.mubr.msk.f32.mxu1 %vm11040_vm10, %v2332_v30  ;;  %v8998_v50 = vpack.c.bf16 %v2333_v58, %v2332_v30 }
 0x9bc   :  { %v2335_v45 = vmax.f32 %v2331_v2, 0.0  ;;  %8270 = vmatmul.mubr.msk.f32.vlgmr.msra.gmra.mrb[18].mxu1 %vm11040_vm10, %v2333_v58  ;;  %v10257_v2 = vld [vmem:[%s10969_s14 + $0x38] sm:$0xff] }
 0x9bd   :  { %v2334_v59 = vmax.f32 %v2330_v53, 0.0  ;;  %8999 = vmatprep.subr.bf16.mxu0 %v8998_v50  ;;  %8276 = vmatpush3.msk.msra.mxu1 %vm11179_vm5, %v11184_v32  ;;  %v10243_v53 = vld [vmem:[%s10969_s14 + $0x28] sm:$0xff]  ;;  %11193 = vst [vmem:[#allocation35_spill] sm:$0xff] %v10257_v2 }
 0x9be   :  { %9001 = vmatpush3.bf16.msra.mxu0 %v8998_v50  ;;  %8325 = vmatprep.subr.msk.mxu1 %vm11185_vm2, %v11184_v32  ;;  %v10236_v50 = vld [vmem:[%s10969_s14 + $0x20] sm:$0xff]  ;;  %11189 = vst [vmem:[#allocation33_spill] sm:$0xff] %v10243_v53 }
 0x9bf   :  { %8272 = vmatprep.mubr.msk.f32.mxu1 %vm11040_vm10, %v2334_v59  ;;  %v9002_v24 = vpack.c.bf16 %v2335_v45, %v2334_v59  ;;  %11187 = vst [vmem:[#allocation32_spill] sm:$0xff] %v10236_v50  ;;  %8291 = vmatprep.mubr.msk.f32.mxu0 %vm11188_vm15, %v10236_v50 }
 0x9c0   :  { %8273 = vmatmul.mubr.msk.f32.gmra.mrb[20].mxu1 %vm11040_vm10, %v2335_v45 }
 0x9c1   :  { %8277 = vmatprep.mubr.msk.f32.mxu1 %vm11040_vm10, %v2332_v30  ;;  %9003 = vmatprep.subr.bf16.mxu0 %v9002_v24  ;;  %v10264_v30 = vld [vmem:[%s10969_s14] sm:$0xff] }
 0x9c2   :  { %9005 = vmatpush3.bf16.msra.mxu0 %v9002_v24  ;;  %11195 = vst [vmem:[#allocation36_spill] sm:$0xff] %v10264_v30 }
 0x9c4   :  { %8278 = vmatmul.mubr.msk.f32.vlgmr.msra.gmra.mrb[22].mxu1 %vm11040_vm10, %v2333_v58 }
 0x9c5   :  { %8280 = vmatprep.mubr.msk.f32.mxu1 %vm11040_vm10, %v2334_v59  ;;  %8326 = vmatpush3.msk.msra.mxu1 %vm11185_vm2, %v11184_v32  ;;  %vm11190_vm2 = vmmov %vm11188_vm15 }
 0x9c6   :  { %8333 = vmatprep.subr.msk.mxu1 %vm11186_vm12, %v11184_v32  ;;  %8292 = vmatmul.mubr.msk.f32.vlgmr.msra.gmra.mrb[26].mxu0 %vm11190_vm2, %v10243_v53  ;;  %vm11194_vm15 = vmmov %vm11190_vm2 }
 0x9c8   :  { %8281 = vmatmul.mubr.msk.f32.gmra.mrb[24].mxu1 %vm11040_vm10, %v2335_v45  ;;  %v10250_v45 = vld [vmem:[%s10969_s14 + $0x30] sm:$0xff]  ;;  %vm11192_vm10 = vmmov %vm11190_vm2 }
 0x9c9   :  { %11191 = vst [vmem:[#allocation34_spill] sm:$0xff] %v10250_v45  ;;  %8294 = vmatprep.mubr.msk.f32.mxu0 %vm11192_vm10, %v10250_v45  ;;  %vm11198_vm10 = vmmov %vm11190_vm2 }
 0x9ca   :  { %8295 = vmatmul.mubr.msk.f32.gmra.mrb[28].mxu0 %vm11194_vm15, %v10257_v2  ;;  %v10271_v2 = vld [vmem:[%s10969_s14 + $0x8] sm:$0xff]  ;;  %vm11199_vm15 = vmmov %vm11190_vm2 }
 0x9cb   :  { %8305 = vmatprep.mubr.msk.f32.mxu0 %vm11190_vm2, %v10264_v30  ;;  %11196 = vst [vmem:[#allocation37_spill] sm:$0xff] %v10271_v2  ;;  %v10276_v30 = vld [vmem:[%s10969_s14 + $0x10] sm:$0xff] }
 0x9cc   :  { %11197 = vst [vmem:[#allocation38_spill] sm:$0xff] %v10276_v30 }
 0xa8f   :  { %v8271_v58 = vpop.f32.mrb[18].mxu1 }
 0xa90   :  { %v2414_v61 = vpop.f32.mrb[19].mxu1 }
 0xa91   :  { %v9006_v35 = vpack.c.bf16 %v8271_v58, %v2414_v61 }
 0xa93   :  { %v8274_v37 = vpop.f32.mrb[20].mxu1  ;;  %9007 = vmatprep.subr.bf16.mxu0 %v9006_v35 }
 0xa94   :  { %v2424_v59 = vpop.f32.mrb[21].mxu1  ;;  %9009 = vmatpush3.bf16.msra.mxu0 %v9006_v35  ;;  %v10285_v35 = vld [vmem:[%s10969_s14 + $0x18] sm:$0xff] }
 0xa95   :  { %v9010_v24 = vpack.c.bf16 %v8274_v37, %v2424_v59  ;;  %11200 = vst [vmem:[#allocation39_spill] sm:$0xff] %v10285_v35  ;;  %v10304_v37 = vld [vmem:[%s10969_s14 + $0x50] sm:$0xff]  ;;  %v10313_v59 = vld [vmem:[%s10969_s14 + $0x58] sm:$0xff] }
 0xa96   :  { %11204 = vst [vmem:[#allocation42_spill] sm:$0xff] %v10304_v37  ;;  %11206 = vst [vmem:[#allocation43_spill] sm:$0xff] %v10313_v59 }
 0xa97   :  { %v8279_v45 = vpop.f32.mrb[22].mxu1  ;;  %9011 = vmatprep.subr.bf16.mxu0 %v9010_v24 }
 0xa98   :  { %v2499_v53 = vpop.f32.mrb[23].mxu1  ;;  %9013 = vmatpush3.bf16.msra.mxu0 %v9010_v24  ;;  %v10317_v24 = vpop.permute.xlu0 %2838 }
 0xa99   :  { %v9014_v62 = vpack.c.bf16 %v8279_v45, %v2499_v53  ;;  %v10290_v45 = vld [vmem:[%s10969_s14 + $0x40] sm:$0xff]  ;;  %11208 = vst [vmem:[#allocation44_spill] sm:$0xff] %v10317_v24 }
 0xa9a   :  { %11201 = vst [vmem:[#allocation40_spill] sm:$0xff] %v10290_v45 }
 0xa9b   :  { %v8282_v58 = vpop.f32.mrb[24].mxu1  ;;  %8306 = vmatmul.mubr.msk.f32.vlgmr.msra.gmra.mrb[26].mxu0 %vm11198_vm10, %v10271_v2  ;;  %9015 = vmatprep.subr.bf16.mxu0 %v9014_v62  ;;  %vm11202_vm10 = vmmov %vm11190_vm2 }
 0xa9c   :  { %v2509_v61 = vpop.f32.mrb[25].mxu1  ;;  %9017 = vmatpush3.bf16.msra.mxu0 %v9014_v62  ;;  %8308 = vmatprep.mubr.msk.f32.mxu0 %vm11199_vm15, %v10276_v30  ;;  %v10299_v62 = vld [vmem:[%s10969_s14 + $0x48] sm:$0xff]  ;;  %vm11205_vm15 = vmmov %vm11190_vm2  ;;  %s11402_s14 = sld [smem:[#allocation59_spill]] }
 0xa9d   :  { %v9018_v53 = vpack.c.bf16 %v8282_v58, %v2509_v61  ;;  %11203 = vst [vmem:[#allocation41_spill] sm:$0xff] %v10299_v62  ;;  %v10319_v58 = vpop.permute.xlu1 %2833 }
 0xa9e   :  { %11209 = vst [vmem:[#allocation45_spill] sm:$0xff] %v10319_v58 }
 0xa9f   :  { %8309 = vmatmul.mubr.msk.f32.gmra.mrb[28].mxu0 %vm11190_vm2, %v10285_v35  ;;  %9019 = vmatprep.subr.bf16.mxu0 %v9018_v53  ;;  %v10323_v35 = vpop.permute.xlu0 %2848 }
 0xaa0   :  { %9021 = vmatpush3.bf16.msra.mxu0 %v9018_v53  ;;  %8319 = vmatprep.mubr.msk.f32.mxu0 %vm11202_vm10, %v10290_v45  ;;  %vm11207_vm10 = vmmov %vm11190_vm2  ;;  %11210 = vst [vmem:[#allocation46_spill] sm:$0xff] %v10323_v35 }
 0xaa1   :  { %v10325_v2 = vpop.permute.xlu1 %2843 }
 0xaa2   :  { %11211 = vst [vmem:[#allocation47_spill] sm:$0xff] %v10325_v2 }
 0xaa3   :  { %8320 = vmatmul.mubr.msk.f32.vlgmr.msra.gmra.mrb[26].mxu0 %vm11205_vm15, %v10299_v62  ;;  %vm11212_vm15 = vcmask 64512  }
 0xaa4   :  { %8322 = vmatprep.mubr.msk.f32.mxu0 %vm11190_vm2, %v10304_v37  ;;  %vm11213_vm2 = vmmov %vm11212_vm15 }
 0xaa5   :  { %vm11215_vm7 = vmmov %vm11213_vm2 }
 0xaa6   :  { %vm11216_vm6 = vmmov %vm11213_vm2 }
 0xaa7   :  { %8323 = vmatmul.mubr.msk.f32.gmra.mrb[28].mxu0 %vm11207_vm10, %v10313_v59  ;;  %vm11214_vm10 = vmmov %vm11213_vm2 }
 0xaa8   :  { %vm11217_vm3 = vmmov %vm11213_vm2 }
 0xaa9   :  { %vm11218_vm0 = vmmov %vm11213_vm2 }
 0xaaa   :  { %vm11219_vm11 = vmmov %vm11218_vm0 }
 0xb76   :  { %v8321_v61 = vpop.f32.mrb[26].mxu0 }
 0xb77   :  { %v2852_v53 = vadd.f32 %v8321_v61, %v10317_v24  ;;  %v2804_v45 = vpop.f32.mrb[27].mxu0 }
 0xb78   :  { %v2851_v62 = vadd.f32 %v10319_v58, %v2804_v45 }
 0xb79   :  { %v2856_v54 = vmax.f32 %v2852_v53, 0.0 }
 0xb7a   :  { %v2855_v37 = vmax.f32 %v2851_v62, 0.0  ;;  %v8324_v30 = vpop.f32.mrb[28].mxu0 }
 0xb7b   :  { %v2854_v44 = vadd.f32 %v8324_v30, %v10323_v35  ;;  %v2814_v59 = vpop.f32.mrb[29].mxu0 }
 0xb7c   :  { %v2853_v7 = vadd.f32 %v10325_v2, %v2814_v59  ;;  %8327 = vmatprep.mubr.msk.f32.mxu1 %vm11212_vm15, %v2855_v37  ;;  %vm11221_vm15 = vcmask 261120  }
 0xb7d   :  { %8328 = vmatmul.mubr.msk.f32.vlgmr.msra.gmra.mrb[26].mxu1 %vm11213_vm2, %v2856_v54  ;;  %v2858_v45 = vmax.f32 %v2854_v44, 0.0 }
 0xb7e   :  { %v2857_v61 = vmax.f32 %v2853_v7, 0.0  ;;  %8334 = vmatpush3.msk.msra.mxu1 %vm11186_vm12, %v11184_v32  ;;  %v10343_v7 = vld [vmem:[%s10971_s16 + $0x20] sm:$0xff] }
 0xb7f   :  { %11220 = vst [vmem:[#allocation48_spill] sm:$0xff] %v10343_v7 }
 0xb80   :  { %8330 = vmatprep.mubr.msk.f32.mxu1 %vm11214_vm10, %v2857_v61 }
 0xb81   :  { %8331 = vmatmul.mubr.msk.f32.gmra.mrb[28].mxu1 %vm11215_vm7, %v2858_v45 }
 0xb82   :  { %8335 = vmatprep.mubr.msk.f32.mxu1 %vm11216_vm6, %v2855_v37  ;;  %vm11224_vm6 = vmmov %vm11221_vm15 }
 0xb85   :  { %8336 = vmatmul.mubr.msk.f32.vlgmr.msra.gmra.mrb[30].mxu1 %vm11217_vm3, %v2856_v54  ;;  %vm11225_vm3 = vmmov %vm11224_vm6 }
 0xb86   :  { %8338 = vmatprep.mubr.msk.f32.mxu1 %vm11218_vm0, %v2857_v61  ;;  %vm11229_vm0 = vmmov %vm11225_vm3 }
 0xb87   :  { %vm11233_vm7 = vmmov %vm11229_vm0 }
 0xb88   :  { %vm11234_vm2 = vmmov %vm11229_vm0 }
 0xb89   :  { %8339 = vmatmul.mubr.msk.f32.gmra.mrb[32].mxu1 %vm11219_vm11, %v2858_v45  ;;  %vm11228_vm11 = vmmov %vm11225_vm3 }
 0xb8a   :  { %8349 = vmatprep.mubr.msk.f32.mxu1 %vm11221_vm15, %v10343_v7  ;;  %v10350_v7 = vld [vmem:[%s10971_s16 + $0x28] sm:$0xff]  ;;  %vm11236_vm10 = vmmov %vm11229_vm0  ;;  %vm3289_vm15 = vcmask 1043456  }
 0xb8b   :  { %11222 = vst [vmem:[#allocation49_spill] sm:$0xff] %v10350_v7 }
 0xc50   :  { %v8329_v44 = vpop.f32.mrb[26].mxu1 }
 0xc51   :  { %v2937_v30 = vpop.f32.mrb[27].mxu1 }
 0xc52   :  { %v9030_v62 = vpack.c.bf16 %v8329_v44, %v2937_v30  ;;  %v10355_v44 = vld [vmem:[%s10971_s16 + $0x30] sm:$0xff] }
 0xc53   :  { %11223 = vst [vmem:[#allocation50_spill] sm:$0xff] %v10355_v44  ;;  %v10383_v30 = vld [vmem:[%s10971_s16 + $0x10] sm:$0xff] }
 0xc54   :  { %v8332_v59 = vpop.f32.mrb[28].mxu1  ;;  %11231 = vst [vmem:[#allocation54_spill] sm:$0xff] %v10383_v30 }
 0xc55   :  { %v2947_v53 = vpop.f32.mrb[29].mxu1 }
 0xc56   :  { %v9034_v37 = vpack.c.bf16 %v8332_v59, %v2947_v53  ;;  %v10393_v59 = vld [vmem:[%s10971_s16 + $0x18] sm:$0xff]  ;;  %v11237_v53 = vmov 0.0  }
 0xc57   :  { %11235 = vst [vmem:[#allocation55_spill] sm:$0xff] %v10393_v59 }
 0xc58   :  { %v8337_v2 = vpop.f32.mrb[30].mxu1 }
 0xc59   :  { %v3022_v54 = vpop.f32.mrb[31].mxu1 }
 0xc5a   :  { %v9022_v35 = vpack.c.bf16 %v8337_v2, %v3022_v54  ;;  %v10364_v2 = vld [vmem:[%s10971_s16 + $0x38] sm:$0xff]  ;;  %v10411_v54 = vsel %vm11179_vm5, 1.0, %v11237_v53 }
 0xc5b   :  { %11226 = vst [vmem:[#allocation51_spill] sm:$0xff] %v10364_v2 }
 0xc5c   :  { %v8340_v61 = vpop.f32.mrb[32].mxu1  ;;  %9023 = vmatprep.subr.bf16.mxu1 %v9022_v35 }
 0xc5d   :  { %v3032_v45 = vpop.f32.mrb[33].mxu1  ;;  %9025 = vmatpush3.bf16.msra.mxu1 %v9022_v35  ;;  %v10369_v35 = vld [vmem:[%s10971_s16] sm:$0xff] }
 0xc5e   :  { %v9026_v58 = vpack.c.bf16 %v8340_v61, %v3032_v45  ;;  %11227 = vst [vmem:[#allocation52_spill] sm:$0xff] %v10369_v35  ;;  %v10415_v61 = vpop.permute.xlu0 %3255  ;;  %v10417_v45 = vpop.permute.xlu1 %3250 }
 0xc60   :  { %9027 = vmatprep.subr.bf16.mxu1 %v9026_v58 }
 0xc61   :  { %9029 = vmatpush3.bf16.msra.mxu1 %v9026_v58  ;;  %v10378_v58 = vld [vmem:[%s10971_s16 + $0x8] sm:$0xff] }
 0xc62   :  { %9031 = vmatprep.subr.bf16.mxu1 %v9030_v62  ;;  %11230 = vst [vmem:[#allocation53_spill] sm:$0xff] %v10378_v58 }
 0xc64   :  { %8350 = vmatmul.mubr.msk.f32.vlgmr.msra.gmra.mrb[34].mxu1 %vm11224_vm6, %v10350_v7  ;;  %vm11086_vm6 = vcmask 31744  }
 0xc65   :  { %9033 = vmatpush3.bf16.msra.mxu1 %v9030_v62  ;;  %8352 = vmatprep.mubr.msk.f32.mxu1 %vm11225_vm3, %v10355_v44  ;;  %v11232_v62 = vmov 0.0|0.0   ;;  %v10421_v44 = vpop.permute.xlu0 %3265  ;;  %vm11239_vm3 = vmmov %vm11229_vm0 }
 0xc66   :  { %9035 = vmatprep.subr.bf16.mxu1 %v9034_v37 }
 0xc68   :  { %8353 = vmatmul.mubr.msk.f32.gmra.mrb[36].mxu1 %vm11228_vm11, %v10364_v2  ;;  %vm11240_vm11 = vmmov %vm11229_vm0 }
 0xc69   :  { %9037 = vmatpush3.bf16.msra.mxu1 %v9034_v37  ;;  %8363 = vmatprep.mubr.msk.f32.mxu1 %vm11229_vm0, %v10369_v35  ;;  %v10402_v37 = vsel %vm9555_vm1, 1.0, %v11237_v53 }
 0xc6a   :  { %9038 = vmatprep.subr.bf16.mxu1 %v11232_v62  ;;  %11238 = vst [vmem:[#allocation56_spill] sm:$0xff] %v10402_v37  ;;  %8369 = vmatprep.subr.msk.mxu0 %vm3289_vm15, %v10402_v37 }
 0xc6b   :  { %8370 = vmatpush3.msk.msra.mxu0 %vm3289_vm15, %v10402_v37  ;;  %v10423_v37 = vpop.permute.xlu1 %3260 }
 0xc6c   :  { %8364 = vmatmul.mubr.msk.f32.vlgmr.msra.gmra.mrb[34].mxu1 %vm11233_vm7, %v10378_v58  ;;  %8377 = vmatprep.subr.msk.mxu0 %vm3289_vm15, %v10411_v54  ;;  %vm11242_vm7 = vnez %v11121_v38  ;;  %v3702_v38 = vld [vmem:[%s11128_s1 + $0x1] sm:$0x1]  ;;  %s7179_s1 = sshll.u32 %s9368_s8, 4  ;;  %s7180_s1 = int_to_ptr.vmem [resolvable:$true] %s7179_s1 }
 0xc6d   :  { %8366 = vmatprep.mubr.msk.f32.mxu1 %vm11234_vm2, %v10383_v30  ;;  %vm11243_vm2 = vnez %v11127_v43  ;;  %p9343_p1 = scmp.lt.s32.totalorder %s7180_s1, %s7180_s1 }
 0xc70   :  { %8367 = vmatmul.mubr.msk.f32.gmra.mrb[36].mxu1 %vm11236_vm10, %v10393_v59  ;;  %vm11244_vm10 = vcmask 523264  }
 0xc71   :  { %8393 = vmatprep.mubr.msk.f32.mxu1 %vm11153_vm13, %v11237_v53 }
 0xd3f   :  { %v8365_v59 = vpop.f32.mrb[34].mxu1 }
 0xd40   :  { %v3269_v30 = vadd.f32 %v8365_v59, %v10415_v61  ;;  %v3225_v58 = vpop.f32.mrb[35].mxu1 }
 0xd41   :  { %v3268_v35 = vadd.f32 %v10417_v45, %v3225_v58 }
 0xd42   :  { %v3273_v2 = vmax.f32 %v3269_v30, 0.0 }
 0xd43   :  { %v3272_v7 = vmax.f32 %v3268_v35, 0.0  ;;  %v8368_v24 = vpop.f32.mrb[36].mxu1 }
 0xd44   :  { %v3271_v1 = vadd.f32 %v8368_v24, %v10421_v44  ;;  %v3235_v42 = vpop.f32.mrb[37].mxu1 }
 0xd45   :  { %v9039_v50 = vpack.c.bf16 %v3273_v2, %v3272_v7  ;;  %v3270_v19 = vadd.f32 %v10423_v37, %v3235_v42  ;;  %8371 = vmatprep.mubr.msk.f32.mxu0 %vm11086_vm6, %v3272_v7 }
 0xd46   :  { %v3275_v59 = vmax.f32 %v3271_v1, 0.0  ;;  %8372 = vmatmul.mubr.msk.f32.vlgmr.msra.gmra.mrb[30].mxu0 %vm11086_vm6, %v3273_v2 }
 0xd47   :  { %v3274_v58 = vmax.f32 %v3270_v19, 0.0  ;;  %9040 = vmatpush3.bf16.msra.mxu1 %v9039_v50  ;;  %8378 = vmatpush3.msk.msra.mxu0 %vm3289_vm15, %v10411_v54  ;;  %v10445_v19 = vld [vmem:[%s10973_s18 + $0x1] sm:$0x1] }
 0xd48   :  { %9041 = vmatprep.subr.bf16.mxu1 %v11232_v62  ;;  %9044 = vmatprep.subr.bf16.mxu0 %v11232_v62 }
 0xd49   :  { %v9042_v35 = vpack.c.bf16 %v3275_v59, %v3274_v58  ;;  %8374 = vmatprep.mubr.msk.f32.mxu0 %vm11086_vm6, %v3274_v58 }
 0xd4a   :  { %8375 = vmatmul.mubr.msk.f32.gmra.mrb[32].mxu0 %vm11086_vm6, %v3275_v59 }
 0xd4b   :  { %8379 = vmatprep.mubr.msk.f32.mxu0 %vm11086_vm6, %v3272_v7  ;;  %9043 = vmatpush3.bf16.msra.mxu1 %v9042_v35 }
 0xd4c   :  { %9050 = vmatprep.subr.bf16.mxu1 %v11232_v62 }
 0xd4e   :  { %8380 = vmatmul.mubr.msk.f32.vlgmr.msra.gmra.mrb[34].mxu0 %vm11086_vm6, %v3273_v2  ;;  %8394 = vmatmul.mubr.msk.f32.vlgmr.msra.gmra.mrb[38].mxu1 %vm11239_vm3, %v10445_v19  ;;  %vm11245_vm3 = vnez %v11119_v36 }
 0xd4f   :  { %8382 = vmatprep.mubr.msk.f32.mxu0 %vm11086_vm6, %v3274_v58  ;;  %8415 = vmatprep.mubr.msk.f32.mxu1 %vm11153_vm13, %v11237_v53 }
 0xd52   :  { %8383 = vmatmul.mubr.msk.f32.gmra.mrb[36].mxu0 %vm11086_vm6, %v3275_v59  ;;  %v10455_v59 = vld [vmem:[%s10973_s18] sm:$0x1]  ;;  %vm11255_vm6 = vnez %v11150_v11 }
 0xd53   :  { %8404 = vmatprep.mubr.msk.f32.mxu0 %vm11153_vm13, %v11237_v53 }
 0xe19   :  { %v8373_v1 = vpop.f32.mrb[30].mxu0 }
 0xe1a   :  { %v3359_v42 = vpop.f32.mrb[31].mxu0 }
 0xe1b   :  { %v9045_v50 = vpack.c.bf16 %v8373_v1, %v3359_v42 }
 0xe1d   :  { %v8376_v24 = vpop.f32.mrb[32].mxu0  ;;  %9046 = vmatpush3.bf16.msra.mxu0 %v9045_v50 }
 0xe1e   :  { %v3369_v7 = vpop.f32.mrb[33].mxu0  ;;  %9047 = vmatprep.subr.bf16.mxu0 %v11232_v62 }
 0xe1f   :  { %v9048_v2 = vpack.c.bf16 %v8376_v24, %v3369_v7  ;;  %v10473_v24 = vld [vmem:[%s10973_s18 + $0x2] sm:$0x1] }
 0xe20   :  { %11241 = vst [vmem:[#allocation57_spill] sm:$0xff] %v10473_v24 }
 0xe21   :  { %v8381_v30 = vpop.f32.mrb[34].mxu0  ;;  %9049 = vmatpush3.bf16.msra.mxu0 %v9048_v2  ;;  %v3540_v36 = vpop.f32.mrb[38].mxu1 }
 0xe22   :  { %v3447_v58 = vpop.f32.mrb[35].mxu0  ;;  %9056 = vmatprep.subr.bf16.mxu0 %v11232_v62 }
 0xe23   :  { %v9051_v35 = vpack.c.bf16 %v8381_v30, %v3447_v58 }
 0xe24   :  { %8405 = vmatmul.mubr.msk.f32.vlgmr.msra.gmra.mrb[38].mxu0 %vm11240_vm11, %v10455_v59  ;;  %vm11246_vm11 = vnez %v11133_v0 }
 0xe25   :  { %v8384_v1 = vpop.f32.mrb[36].mxu0  ;;  %9052 = vmatpush3.bf16.msra.mxu1 %v9051_v35  ;;  %9058 = vmatpush3.bf16.msk.msra.mxu0 %vm9593_vm9, %v11169_v17 }
 0xe26   :  { %v3457_v42 = vpop.f32.mrb[37].mxu0  ;;  %9053 = vmatprep.subr.bf16.mxu1 %v11232_v62  ;;  %9059 = vmatprep.subr.bf16.mxu0 %v11232_v62 }
 0xe27   :  { %v9054_v50 = vpack.c.bf16 %v8384_v1, %v3457_v42  ;;  %8434 = vmatprep.mubr.msk.f32.mxu0 %vm11153_vm13, %v11237_v53 }
 0xe29   :  { %9055 = vmatpush3.bf16.msra.mxu1 %v9054_v50  ;;  %9061 = vmatpush3.bf16.msk.msra.mxu0 %vm9615_vm14, %v11169_v17 }
 0xe2a   :  { %9062 = vmatprep.subr.bf16.mxu0 %v11232_v62  ;;  %9068 = vmatprep.subr.bf16.mxu1 %v11232_v62 }
 0xe2c   :  { %8416 = vmatmul.mubr.msk.f32.vlgmr.msra.gmra.mrb[40].mxu1 %vm11229_vm0, %v10473_v24  ;;  %vm11247_vm0 = vnez %v11124_v40  ;;  %v8395_v40 = vpop.f32.mrb[39].mxu1 }
 0xe2d   :  { %9064 = vmatpush3.bf16.msk.msra.mxu0 %vm11242_vm7, %v11169_v17  ;;  %9070 = vmatpush3.bf16.msk.msra.mxu1 %vm9570_vm4, %v11169_v17  ;;  %vm11248_vm7 = vnez %v11140_v4 }
 0xe2e   :  { %9065 = vmatprep.subr.bf16.mxu0 %v11232_v62  ;;  %9071 = vmatprep.subr.bf16.mxu1 %v11232_v62 }
 0xe2f   :  { %8453 = vmatprep.mubr.msk.f32.mxu1 %vm11153_vm13, %v11237_v53 }
 0xe31   :  { %9067 = vmatpush3.bf16.msk.msra.mxu0 %vm11243_vm2, %v11169_v17  ;;  %9073 = vmatpush3.bf16.msk.msra.mxu1 %vm9582_vm8, %v11169_v17  ;;  %vm11249_vm2 = vmmov %vm11244_vm10 }
 0xe32   :  { %9074 = vmatprep.subr.bf16.mxu1 %v11232_v62  ;;  %9080 = vmatprep.subr.bf16.mxu0 %v11232_v62 }
 0xe34   :  { %8435 = vmatmul.mubr.msk.f32.vlgmr.msra.gmra.mrb[40].mxu0 %vm11244_vm10, %v3702_v38  ;;  %vm11250_vm10 = vnez %v11138_v3 }
 0xe35   :  { %9076 = vmatpush3.bf16.msk.msra.mxu1 %vm11245_vm3, %v11169_v17  ;;  %9082 = vmatpush3.bf16.msk.msra.mxu0 %vm11246_vm11, %v11169_v17  ;;  %vm11251_vm3 = vnez %v11144_v8 }
 0xe36   :  { %9077 = vmatprep.subr.bf16.mxu1 %v11232_v62  ;;  %9083 = vmatprep.subr.bf16.mxu0 %v11232_v62 }
 0xe37   :  { %8472 = vmatprep.mubr.msk.f32.mxu0 %vm11153_vm13, %v11237_v53 }
 0xe39   :  { %9079 = vmatpush3.bf16.msk.msra.mxu1 %vm11247_vm0, %v11169_v17  ;;  %9085 = vmatpush3.bf16.msk.msra.mxu0 %vm11248_vm7, %v11169_v17  ;;  %vm11252_vm0 = vnez %v11142_v6 }
 0xe3a   :  { %9092 = vmatprep.subr.bf16.mxu1 %v11232_v62  ;;  %9086 = vmatprep.subr.bf16.mxu0 %v11232_v62 }
 0xe3c   :  { %8454 = vmatmul.mubr.msk.f32.vlgmr.msra.gmra.mrb[42].mxu1 %vm11249_vm2, %v3702_v38  ;;  %vm11253_vm2 = vnez %v11148_v10 }
 0xe3d   :  { %9094 = vmatpush3.bf16.msk.msra.mxu1 %vm11250_vm10, %v11169_v17  ;;  %9088 = vmatpush3.bf16.msk.msra.mxu0 %vm11251_vm3, %v11169_v17  ;;  %vm11254_vm3 = vnez %v11146_v9  ;;  %v3854_v9 = vrot.slane %v3702_v38, %v9831_v12 }
 0xe3e   :  { %9095 = vmatprep.subr.bf16.mxu1 %v11232_v62  ;;  %9089 = vmatprep.subr.bf16.mxu0 %v11232_v62 }
 0xe3f   :  { %8491 = vmatprep.mubr.msk.f32.mxu1 %vm11153_vm13, %v11237_v53  ;;  %v3855_v11 = vmul.f32 %v3854_v9, %v9839_v26 }
 0xe41   :  { %9097 = vmatpush3.bf16.msk.msra.mxu1 %vm11252_vm0, %v11169_v17  ;;  %9091 = vmatpush3.bf16.msk.msra.mxu0 %vm11253_vm2, %v11169_v17 }
 0xe42   :  { %9098 = vmatprep.subr.bf16.mxu1 %v11232_v62  ;;  %8494 = vmatprep.subr.mxu0 %v11237_v53 }
 0xe45   :  { %9100 = vmatpush3.bf16.msk.msra.mxu1 %vm11254_vm3, %v11169_v17  ;;  %vm11258_vm3 = vcmask 64512  }
 0xe46   :  { %9101 = vmatprep.subr.bf16.mxu1 %v11232_v62 }
 0xe49   :  { %9103 = vmatpush3.bf16.msk.msra.mxu1 %vm11255_vm6, %v11169_v17  ;;  %vm11256_vm6 = vcmask 523264  }
 0xe4a   :  { %9104 = vmatprep.subr.bf16.mxu1 %v11232_v62  ;;  %vm11257_vm2 = vmmov %vm11256_vm6 }
 0xef7   :  { %v3613_v43 = vpop.f32.mrb[38].mxu0 }
 0xef8   :  { %v3614_v8 = vadd.f32 %v3613_v43, %v3540_v36  ;;  %v8406_v10 = vpop.f32.mrb[39].mxu0 }
 0xeff   :  { %v3686_v7 = vpop.f32.mrb[40].mxu1 }
 0xf00   :  { %v10546_v2 = vadd.f32 %v3686_v7, %v3614_v8  ;;  %v8417_v30 = vpop.f32.mrb[41].mxu1 }
 0xf07   :  { %v3772_v58 = vpop.f32.mrb[40].mxu0 }
 0xf08   :  { %v3849_v35 = vrot.slane %v3772_v58, %v9831_v12  ;;  %v8436_v1 = vpop.f32.mrb[41].mxu0 }
 0xf0a   :  { %v3850_v42 = vmul.f32 %v3849_v35, %v9833_v13 }
 0xf0c   :  { %v3856_v50 = vadd.f32 %v3855_v11, %v3850_v42 }
 0xf0f   :  { %v3842_v24 = vpop.f32.mrb[42].mxu1 }
 0xf10   :  { %v3860_v40 = vrot.slane %v3842_v24, %v9831_v12  ;;  %v8455_v36 = vpop.f32.mrb[43].mxu1 }
 0xf11   :  { %v11283_v36 = vld [vmem:[#allocation9_spill] sm:$0xff] }
 0xf12   :  { %v3861_v43 = vmul.f32 %v3860_v40, %v9841_v27 }
 0xf14   :  { %v3862_v8 = vadd.f32 %v3861_v43, %v3856_v50  ;;  %v11293_v43 = vld [vmem:[#allocation14_spill] sm:$0xff] }
 0xf16   :  { %v3863_v10 = vadd.f32 %v3862_v8, %v9846_v34  ;;  %v11340_v8 = vld [vmem:[#allocation33_spill] sm:$0xff] }
 0xf18   :  { %v3864_v7 = vmax.f32 %v3863_v10, 0.0  ;;  %v11296_v10 = vld [vmem:[#allocation15_spill] sm:$0xff] }
 0xf1a   :  { %8473 = vmatmul.mubr.msk.f32.vlgmr.msra.gmra.mrb[42].mxu0 %vm11256_vm6, %v3864_v7  ;;  %8492 = vmatmul.mubr.msk.f32.vlgmr.msra.gmra.mrb[44].mxu1 %vm11257_vm2, %v3864_v7  ;;  %vm11259_vm6 = vmmov %vm11258_vm3 }
 0xf1b   :  { %8496 = vmatprep.mubr.msk.f32.mxu0 %vm11153_vm13, %v11237_v53  ;;  %9106 = vmatpush3.bf16.msk.msra.mxu1 %vm9593_vm9, %v11169_v17 }
 0xf1c   :  { %9107 = vmatprep.subr.bf16.mxu1 %v11232_v62  ;;  %8512 = vmatprep.mubr.msk.f32.mxu1 %vm11153_vm13, %v11237_v53 }
 0xf1f   :  { %9109 = vmatpush3.bf16.msk.msra.mxu1 %vm9615_vm14, %v11169_v17  ;;  %vm11260_vm14 = vcmask 261120  }
 0xf20   :  { %vm11261_vm2 = vmmov %vm11260_vm14 }
 0xfed   :  { %v3934_v13 = vpop.f32.mrb[42].mxu0  ;;  %v4004_v26 = vpop.f32.mrb[44].mxu1 }
 0xfee   :  { %v8474_v27 = vpop.f32.mrb[43].mxu0  ;;  %v8493_v34 = vpop.f32.mrb[45].mxu1  ;;  %8495 = vmatpush3.msra.mxu0 %v4004_v26 }
 0xfef   :  { %8497 = vmatmul.mubr.msk.f32.vlgmr.msra.gmra.mrb[44].mxu0 %vm11258_vm3, %v9858_v39  ;;  %8499 = vmatprep.subr.mxu0 %v11237_v53  ;;  %v11299_v34 = vld [vmem:[#allocation17_spill] sm:$0xff] }
 0xff0   :  { %8500 = vmatpush3.msra.mxu0 %v3934_v13  ;;  %8501 = vmatprep.mubr.msk.f32.mxu0 %vm11153_vm13, %v11237_v53  ;;  %v11298_v13 = vld [vmem:[#allocation16_spill] sm:$0xff] }
 0xff1   :  { %9110 = vmatprep.subr.bf16.mxu0 %v11232_v62 }
 0xff3   :  { %8502 = vmatmul.mubr.msk.f32.vlgmr.msra.gmra.mrb[46].mxu0 %vm11259_vm6, %v9863_v41  ;;  %vm11263_vm6 = vmmov %vm11258_vm3 }
 0xff4   :  { %9112 = vmatpush3.bf16.msk.msra.mxu0 %vm9570_vm4, %v11169_v17  ;;  %8523 = vmatprep.mubr.msk.f32.mxu0 %vm11153_vm13, %v11237_v53 }
 0xff5   :  { %9113 = vmatprep.subr.bf16.mxu0 %v11232_v62 }
 0xff8   :  { %9115 = vmatpush3.bf16.msk.msra.mxu0 %vm9582_vm8, %v11169_v17  ;;  %vm11262_vm8 = vmmov %vm11258_vm3 }
 0xff9   :  { %9117 = vmatprep.subr.msk.bf16.mxu0 %vm11246_vm11, %v11169_v17 }
0x10c2   :  { %v4074_v33 = vpop.f32.mrb[44].mxu0 }
0x10c3   :  { %v8498_v39 = vpop.f32.mrb[45].mxu0 }
0x10c6   :  { %v4144_v41 = vpop.f32.mrb[46].mxu0 }
0x10c7   :  { %v4145_v24 = vadd.f32 %v4144_v41, %v4074_v33  ;;  %v8503_v38 = vpop.f32.mrb[47].mxu0 }
0x10c8   :  { %v11300_v38 = vld [vmem:[#allocation18_spill] sm:$0xff] }
0x10c9   :  { %v4148_v30 = vadd.f32 %v4145_v24, %v9892_v52 }
0x10cb   :  { %v4149_v9 = vmax.f32 %v4148_v30, 0.0 }
0x10cd   :  { %8513 = vmatmul.mubr.msk.f32.vlgmr.msra.gmra.mrb[46].mxu1 %vm11260_vm14, %v4149_v9  ;;  %8524 = vmatmul.mubr.msk.f32.vlgmr.msra.gmra.mrb[48].mxu0 %vm11261_vm2, %v4149_v9  ;;  %vm11264_vm14 = vmmov %vm11258_vm3 }
0x10ce   :  { %8526 = vmatprep.subr.mxu1 %v4149_v9  ;;  %8528 = vmatprep.mubr.msk.f32.mxu1 %vm11258_vm3, %v9898_v55  ;;  %vm11265_vm2 = vmmov %vm11258_vm3  ;;  %vm11267_vm3 = vcmask 130048  }
0x10cf   :  { %8527 = vmatpush3.msra.mxu1 %v4149_v9  ;;  %9119 = vmatpush3.bf16.msk.msra.mxu0 %vm11246_vm11, %v11169_v17  ;;  %v11301_v9 = vld [vmem:[#allocation19_spill] sm:$0xff] }
0x10d0   :  { %9121 = vmatprep.subr.msk.bf16.mxu0 %vm11248_vm7, %v11169_v17 }
0x10d1   :  { %8529 = vmatmul.mubr.msk.f32.vlgmr.msra.gmra.mrb[48].mxu1 %vm11262_vm8, %v9907_v56  ;;  %vm11268_vm8 = vcmask 261120  }
0x10d2   :  { %8533 = vmatprep.mubr.msk.f32.mxu1 %vm11263_vm6, %v9926_v57  ;;  %vm11269_vm6 = vmmov %vm11268_vm8 }
0x10d3   :  { %9123 = vmatpush3.bf16.msk.msra.mxu0 %vm11248_vm7, %v11169_v17  ;;  %vm11266_vm7 = vmmov %vm11265_vm2 }
0x10d4   :  { %9125 = vmatprep.subr.msk.bf16.mxu0 %vm11250_vm10, %v11169_v17 }
0x11a0   :  { %v4219_v25 = vpop.f32.mrb[46].mxu1  ;;  %v4289_v52 = vpop.f32.mrb[48].mxu0 }
0x11a1   :  { %v8514_v55 = vpop.f32.mrb[47].mxu1  ;;  %v8525_v58 = vpop.f32.mrb[49].mxu0  ;;  %8531 = vmatprep.subr.mxu1 %v4219_v25 }
0x11a2   :  { %8532 = vmatpush3.msra.mxu1 %v4219_v25  ;;  %v11309_v58 = vld [vmem:[#allocation20_spill] sm:$0xff] }
0x11a3   :  { %8534 = vmatmul.mubr.msk.f32.vlgmr.msra.gmra.mrb[48].mxu1 %vm11264_vm14, %v9933_v60  ;;  %8536 = vmatprep.subr.mxu1 %v4289_v52  ;;  %vm11270_vm14 = vmmov %vm11269_vm6 }
0x11a4   :  { %8537 = vmatpush3.msra.mxu1 %v4289_v52  ;;  %8538 = vmatprep.mubr.msk.f32.mxu1 %vm11265_vm2, %v9938_v14  ;;  %vm11271_vm2 = vmmov %vm11269_vm6 }
0x11ab   :  { %8539 = vmatmul.mubr.msk.f32.vlgmr.msra.gmra.mrb[48].mxu1 %vm11266_vm7, %v9947_v15 }
0x11ac   :  { %8567 = vmatprep.mubr.msk.f32.mxu1 %vm11267_vm3, %v9979_v31 }
0x127e   :  { %v8540_v4 = vpop.f32.mrb[48].mxu1 }
0x127f   :  { %v4521_v56 = vadd.f32 %v8540_v4, %v9951_v16  ;;  %v4509_v57 = vpop.f32.mrb[49].mxu1 }
0x1280   :  { %v4520_v35 = vadd.f32 %v4509_v57, %v9953_v20 }
0x1281   :  { %v4523_v11 = vmax.f32 %v4521_v56, 0.0 }
0x1282   :  { %v4522_v1 = vmax.f32 %v4520_v35, 0.0 }
0x1284   :  { %8549 = vmatprep.mubr.msk.f32.mxu0 %vm11268_vm8, %v4522_v1 }
0x1285   :  { %8550 = vmatmul.mubr.msk.f32.vlgmr.msra.gmra.mrb[50].mxu0 %vm11269_vm6, %v4523_v11 }
0x1286   :  { %9127 = vmatpush3.bf16.msk.msra.mxu0 %vm11250_vm10, %v11169_v17  ;;  %8560 = vmatprep.mubr.msk.f32.mxu0 %vm11270_vm14, %v4522_v1 }
0x1287   :  { %9129 = vmatprep.subr.msk.bf16.mxu0 %vm11252_vm0, %v11169_v17 }
0x128a   :  { %9131 = vmatpush3.bf16.msk.msra.mxu0 %vm11252_vm0, %v11169_v17  ;;  %vm11272_vm0 = vmmov %vm11267_vm3 }
0x128b   :  { %9141 = vmatprep.subr.msk.bf16.mxu0 %vm9593_vm9, %v11169_v17  ;;  %vm11273_vm7 = vmmov %vm11272_vm0 }
0x128c   :  { %vm11275_vm3 = vmmov %vm11272_vm0 }
0x128d   :  { %8561 = vmatmul.mubr.msk.f32.vlgmr.msra.gmra.mrb[52].mxu0 %vm11271_vm2, %v4523_v11  ;;  %vm11276_vm8 = vmmov %vm11272_vm0 }
0x128e   :  { %9143 = vmatpush3.bf16.msk.msra.mxu0 %vm9593_vm9, %v11169_v17  ;;  %vm11274_vm9 = vmmov %vm11272_vm0 }
0x128f   :  { %vm11277_vm6 = vmmov %vm11272_vm0 }
0x1290   :  { %vm11279_vm14 = vmmov %vm11272_vm0 }
0x1291   :  { %vm11280_vm2 = vmmov %vm11272_vm0 }
0x1358   :  { %v8551_v60 = vpop.f32.mrb[50].mxu0 }
0x1359   :  { %v4596_v14 = vpop.f32.mrb[51].mxu0 }
0x135a   :  { %v9136_v15 = vpack.c.bf16 %v8551_v60, %v4596_v14 }
0x1360   :  { %v8562_v16 = vpop.f32.mrb[52].mxu0 }
0x1361   :  { %v4671_v20 = vpop.f32.mrb[53].mxu0 }
0x1362   :  { %v9132_v31 = vpack.c.bf16 %v8562_v16, %v4671_v20  ;;  %v11311_v20 = vld [vmem:[#allocation21_spill] sm:$0xff] }
0x1364   :  { %9133 = vmatprep.subr.bf16.mxu1 %v9132_v31 }
0x1365   :  { %9135 = vmatpush3.bf16.msra.mxu1 %v9132_v31  ;;  %v11313_v31 = vld [vmem:[#allocation22_spill] sm:$0xff] }
0x1366   :  { %9137 = vmatprep.subr.bf16.mxu1 %v9136_v15 }
0x1368   :  { %8568 = vmatmul.mubr.msk.f32.vlgmr.msra.gmra.mrb[50].mxu1 %vm11272_vm0, %v9986_v46 }
0x1369   :  { %9139 = vmatpush3.bf16.msra.mxu1 %v9136_v15  ;;  %8574 = vmatprep.mubr.msk.f32.mxu1 %vm11273_vm7, %v9991_v47  ;;  %vm11281_vm7 = vmmov %vm11272_vm0 }
0x136a   :  { %9145 = vmatprep.subr.msk.bf16.mxu1 %vm9570_vm4, %v11169_v17 }
0x1370   :  { %8575 = vmatmul.mubr.msk.f32.vlgmr.msra.gmra.mrb[50].mxu1 %vm11274_vm9, %v10003_v48  ;;  %vm11282_vm9 = vmmov %vm11272_vm0 }
0x1371   :  { %9147 = vmatpush3.bf16.msk.msra.mxu1 %vm9570_vm4, %v11169_v17  ;;  %vm11278_vm4 = vmmov %vm11272_vm0 }
0x1372   :  { %9161 = vmatprep.subr.msk.bf16.mxu1 %vm11246_vm11, %v11169_v17 }
0x1443   :  { %v8576_v29 = vpop.f32.mrb[50].mxu1 }
0x1444   :  { %v4831_v6 = vadd.f32 %v8576_v29, %v10013_v49  ;;  %v4821_v46 = vpop.f32.mrb[51].mxu1  ;;  %v11315_v29 = vld [vmem:[#allocation23_spill] sm:$0xff] }
0x1445   :  { %v4830_v47 = vadd.f32 %v4821_v46, %v10015_v51  ;;  %v11319_v46 = vld [vmem:[#allocation25_spill] sm:$0xff] }
0x1446   :  { %v4833_v42 = vmax.f32 %v4831_v6, 0.0  ;;  %v11317_v6 = vld [vmem:[#allocation24_spill] sm:$0xff] }
0x1447   :  { %v4832_v50 = vmax.f32 %v4830_v47, 0.0  ;;  %v11321_v47 = vld [vmem:[#allocation26_spill] sm:$0xff] }
0x1449   :  { %8581 = vmatprep.mubr.msk.f32.mxu0 %vm11275_vm3, %v4832_v50  ;;  %8588 = vmatprep.mubr.msk.f32.mxu1 %vm11276_vm8, %v4832_v50  ;;  %v9148_v48 = vpack.c.bf16 %v4833_v42, %v4832_v50  ;;  %vm11286_vm3 = vmmov %vm11272_vm0  ;;  %v11325_v50 = vld [vmem:[#allocation32_spill] sm:$0xff] }
0x144a   :  { %8582 = vmatmul.mubr.msk.f32.vlgmr.msra.gmra.mrb[54].mxu0 %vm11277_vm6, %v4833_v42  ;;  %8589 = vmatmul.mubr.msk.f32.vlgmr.msra.gmra.mrb[52].mxu1 %vm11278_vm4, %v4833_v42  ;;  %vm11288_vm8 = vmmov %vm11272_vm0  ;;  %v11323_v42 = vld [vmem:[#allocation27_spill] sm:$0xff] }
0x144b   :  { %9149 = vmatprep.subr.bf16.mxu0 %v9148_v48  ;;  %8595 = vmatprep.mubr.msk.f32.mxu0 %vm11279_vm14, %v10022_v63  ;;  %vm11290_vm6 = vmmov %vm11272_vm0 }
0x144c   :  { %9151 = vmatpush3.bf16.msra.mxu0 %v9148_v48  ;;  %9163 = vmatpush3.bf16.msk.msra.mxu1 %vm11246_vm11, %v11169_v17  ;;  %vm11284_vm11 = vmmov %vm11272_vm0 }
0x144d   :  { %9165 = vmatprep.subr.msk.bf16.mxu1 %vm11250_vm10, %v11169_v17  ;;  %vm11292_vm4 = vmmov %vm11272_vm0 }
0x144e   :  { %vm11294_vm14 = vmmov %vm11272_vm0 }
0x144f   :  { %8596 = vmatmul.mubr.msk.f32.vlgmr.msra.gmra.mrb[56].mxu0 %vm11280_vm2, %v10039_v22  ;;  %v11285_v22 = vld [vmem:[#allocation10_spill] sm:$0xff]  ;;  %vm11297_vm2 = vmmov %vm11272_vm0 }
0x1450   :  { %8598 = vmatprep.mubr.msk.f32.mxu0 %vm11272_vm0, %v10046_v23  ;;  %v11287_v23 = vld [vmem:[#allocation11_spill] sm:$0xff] }
0x1453   :  { %8599 = vmatmul.mubr.msk.f32.gmra.mrb[58].mxu0 %vm11281_vm7, %v10051_v5  ;;  %v11289_v5 = vld [vmem:[#allocation12_spill] sm:$0xff]  ;;  %vm11303_vm7 = vmmov %vm11272_vm0 }
0x1454   :  { %8605 = vmatprep.mubr.msk.f32.mxu0 %vm11282_vm9, %v10060_v28  ;;  %v11291_v28 = vld [vmem:[#allocation13_spill] sm:$0xff]  ;;  %vm11304_vm9 = vmmov %vm11272_vm0 }
0x151d   :  { %v8583_v21 = vpop.f32.mrb[54].mxu0  ;;  %v8590_v49 = vpop.f32.mrb[52].mxu1 }
0x151e   :  { %v4906_v0 = vpop.f32.mrb[55].mxu0  ;;  %v4981_v51 = vpop.f32.mrb[53].mxu1 }
0x151f   :  { %v9152_v63 = vpack.c.bf16 %v8583_v21, %v4906_v0  ;;  %v9156_v40 = vpack.c.bf16 %v8590_v49, %v4981_v51  ;;  %v11327_v21 = vld [vmem:[#allocation28_spill] sm:$0xff]  ;;  %v11328_v51 = vld [vmem:[#allocation29_spill] sm:$0xff] }
0x1521   :  { %9153 = vmatprep.subr.bf16.mxu0 %v9152_v63 }
0x1522   :  { %9155 = vmatpush3.bf16.msra.mxu0 %v9152_v63 }
0x1523   :  { %9157 = vmatprep.subr.bf16.mxu0 %v9156_v40 }
0x1525   :  { %8606 = vmatmul.mubr.msk.f32.vlgmr.msra.gmra.mrb[56].mxu0 %vm11284_vm11, %v11283_v36  ;;  %vm11305_vm11 = vmmov %vm11272_vm0 }
0x1526   :  { %9159 = vmatpush3.bf16.msra.mxu0 %v9156_v40  ;;  %8608 = vmatprep.mubr.msk.f32.mxu0 %vm11286_vm3, %v11285_v22  ;;  %vm11306_vm3 = vmmov %vm11272_vm0 }
0x1527   :  { %8669 = vmatprep.subr.msk.mxu0 %vm9555_vm1, %v11184_v32 }
0x1529   :  { %8609 = vmatmul.mubr.msk.f32.gmra.mrb[58].mxu0 %vm11288_vm8, %v11287_v23  ;;  %vm11307_vm8 = vmmov %vm11272_vm0  ;;  %v11329_v23 = vld [vmem:[#allocation30_spill] sm:$0xff] }
0x152a   :  { %8615 = vmatprep.mubr.msk.f32.mxu0 %vm11290_vm6, %v11289_v5  ;;  %vm11308_vm6 = vmmov %vm11272_vm0 }
0x152d   :  { %8616 = vmatmul.mubr.msk.f32.vlgmr.msra.gmra.mrb[56].mxu0 %vm11292_vm4, %v11291_v28  ;;  %vm11310_vm4 = vcmask 261120  }
0x152e   :  { %8618 = vmatprep.mubr.msk.f32.mxu0 %vm11294_vm14, %v11293_v43  ;;  %8670 = vmatpush3.msk.msra.mxu0 %vm9555_vm1, %v11184_v32  ;;  %vm11302_vm1 = vmmov %vm11272_vm0  ;;  %v11330_v43 = vld [vmem:[#allocation31_spill] sm:$0xff] }
0x152f   :  { %8677 = vmatprep.subr.msk.mxu0 %vm11179_vm5, %v11184_v32  ;;  %vm11314_vm14 = vmmov %vm11310_vm4 }
0x1531   :  { %8619 = vmatmul.mubr.msk.f32.gmra.mrb[58].mxu0 %vm11297_vm2, %v11296_v10  ;;  %vm11316_vm2 = vmmov %vm11310_vm4 }
0x1600   :  { %v8617_v7 = vpop.f32.mrb[56].mxu0 }
0x1601   :  { %v5250_v26 = vadd.f32 %v8617_v7, %v11298_v13  ;;  %v5226_v27 = vpop.f32.mrb[57].mxu0 }
0x1602   :  { %v5249_v33 = vadd.f32 %v5226_v27, %v11299_v34  ;;  %v11333_v27 = vld [vmem:[#allocation7_spill] sm:$0xff] }
0x1603   :  { %v5254_v24 = vmax.f32 %v5250_v26, 0.0 }
0x1604   :  { %v5253_v39 = vmax.f32 %v5249_v33, 0.0  ;;  %v8620_v41 = vpop.f32.mrb[58].mxu0  ;;  %v11342_v33 = vld [vmem:[#allocation34_spill] sm:$0xff] }
0x1605   :  { %v5252_v30 = vadd.f32 %v8620_v41, %v11300_v38  ;;  %v5236_v18 = vpop.f32.mrb[59].mxu0  ;;  %v11345_v41 = vld [vmem:[#allocation35_spill] sm:$0xff] }
0x1606   :  { %v5251_v25 = vadd.f32 %v5236_v18, %v11301_v9  ;;  %8625 = vmatprep.mubr.msk.f32.mxu1 %vm11302_vm1, %v5253_v39  ;;  %vm11318_vm1 = vmmov %vm11316_vm2 }
0x1607   :  { %8626 = vmatmul.mubr.msk.f32.vlgmr.msra.gmra.mrb[54].mxu1 %vm11272_vm0, %v5254_v24  ;;  %v5256_v55 = vmax.f32 %v5252_v30, 0.0  ;;  %vm11320_vm0 = vmmov %vm11318_vm1 }
0x1608   :  { %v5255_v52 = vmax.f32 %v5251_v25, 0.0  ;;  %9167 = vmatpush3.bf16.msk.msra.mxu1 %vm11250_vm10, %v11169_v17  ;;  %vm11312_vm10 = vmmov %vm11310_vm4 }
0x160a   :  { %8628 = vmatprep.mubr.msk.f32.mxu1 %vm11303_vm7, %v5255_v52  ;;  %vm11322_vm7 = vmmov %vm11320_vm0 }
0x160b   :  { %8629 = vmatmul.mubr.msk.f32.gmra.mrb[56].mxu1 %vm11304_vm9, %v5256_v55  ;;  %vm11324_vm9 = vmmov %vm11320_vm0 }
0x160c   :  { %8635 = vmatprep.mubr.msk.f32.mxu1 %vm11305_vm11, %v5253_v39  ;;  %vm11326_vm11 = vmmov %vm11320_vm0  ;;  %v11379_v39 = vld [vmem:[#allocation50_spill] sm:$0xff] }
0x160f   :  { %8636 = vmatmul.mubr.msk.f32.vlgmr.msra.gmra.mrb[58].mxu1 %vm11306_vm3, %v5254_v24  ;;  %vm11331_vm3 = vcmask 64512   ;;  %v11347_v24 = vld [vmem:[#allocation36_spill] sm:$0xff] }
0x1610   :  { %8638 = vmatprep.mubr.msk.f32.mxu1 %vm11307_vm8, %v5255_v52  ;;  %vm11332_vm8 = vmmov %vm11331_vm3 }
0x1613   :  { %8639 = vmatmul.mubr.msk.f32.gmra.mrb[60].mxu1 %vm11308_vm6, %v5256_v55  ;;  %vm11334_vm6 = vnez %v11333_v27 }
0x1614   :  { %8649 = vmatprep.mubr.msk.f32.mxu1 %vm11310_vm4, %v11309_v58  ;;  %vm11335_vm4 = vmmov %vm11331_vm3 }
0x16da   :  { %v8627_v4 = vpop.f32.mrb[54].mxu1 }
0x16db   :  { %v5335_v56 = vpop.f32.mrb[55].mxu1 }
0x16dc   :  { %v9176_v3 = vpack.c.bf16 %v8627_v4, %v5335_v56 }
0x16de   :  { %v8630_v17 = vpop.f32.mrb[56].mxu1 }
0x16df   :  { %v5345_v57 = vpop.f32.mrb[57].mxu1 }
0x16e0   :  { %v9180_v35 = vpack.c.bf16 %v8630_v17, %v5345_v57  ;;  %v11351_v57 = vld [vmem:[#allocation38_spill] sm:$0xff] }
0x16e2   :  { %v8637_v1 = vpop.f32.mrb[58].mxu1 }
0x16e3   :  { %v5420_v11 = vpop.f32.mrb[59].mxu1 }
0x16e4   :  { %v9168_v60 = vpack.c.bf16 %v8637_v1, %v5420_v11  ;;  %v11353_v1 = vld [vmem:[#allocation39_spill] sm:$0xff]  ;;  %v11355_v11 = vld [vmem:[#allocation40_spill] sm:$0xff] }
0x16e6   :  { %v8640_v14 = vpop.f32.mrb[60].mxu1  ;;  %9169 = vmatprep.subr.bf16.mxu1 %v9168_v60 }
0x16e7   :  { %v5430_v15 = vpop.f32.mrb[61].mxu1  ;;  %9171 = vmatpush3.bf16.msra.mxu1 %v9168_v60  ;;  %v11357_v60 = vld [vmem:[#allocation56_spill] sm:$0xff] }
0x16e8   :  { %v9172_v16 = vpack.c.bf16 %v8640_v14, %v5430_v15  ;;  %v11358_v14 = vld [vmem:[#allocation41_spill] sm:$0xff]  ;;  %v11360_v15 = vld [vmem:[#allocation42_spill] sm:$0xff] }
0x16ea   :  { %9173 = vmatprep.subr.bf16.mxu1 %v9172_v16 }
0x16eb   :  { %9175 = vmatpush3.bf16.msra.mxu1 %v9172_v16  ;;  %v11362_v16 = vld [vmem:[#allocation43_spill] sm:$0xff] }
0x16ec   :  { %9177 = vmatprep.subr.bf16.mxu1 %v9176_v3 }
0x16ee   :  { %8650 = vmatmul.mubr.msk.f32.vlgmr.msra.gmra.mrb[62].mxu1 %vm11312_vm10, %v11311_v20  ;;  %vm11336_vm10 = vmmov %vm11331_vm3 }
0x16ef   :  { %9179 = vmatpush3.bf16.msra.mxu1 %v9176_v3  ;;  %8652 = vmatprep.mubr.msk.f32.mxu1 %vm11314_vm14, %v11313_v31  ;;  %vm11337_vm14 = vmmov %vm11331_vm3  ;;  %v11349_v3 = vld [vmem:[#allocation37_spill] sm:$0xff]  ;;  %v11364_v31 = vld [vmem:[#allocation44_spill] sm:$0xff] }
0x16f0   :  { %9181 = vmatprep.subr.bf16.mxu1 %v9180_v35 }
0x16f2   :  { %8653 = vmatmul.mubr.msk.f32.gmra.mrb[64].mxu1 %vm11316_vm2, %v11315_v29  ;;  %vm11338_vm2 = vmmov %vm11331_vm3 }
0x16f3   :  { %9183 = vmatpush3.bf16.msra.mxu1 %v9180_v35  ;;  %8663 = vmatprep.mubr.msk.f32.mxu1 %vm11318_vm1, %v11317_v6  ;;  %vm11339_vm1 = vmmov %vm11338_vm2 }
0x16f6   :  { %8664 = vmatmul.mubr.msk.f32.vlgmr.msra.gmra.mrb[62].mxu1 %vm11320_vm0, %v11319_v46  ;;  %v11365_v46 = vld [vmem:[#allocation45_spill] sm:$0xff] }
0x16f7   :  { %8666 = vmatprep.mubr.msk.f32.mxu1 %vm11322_vm7, %v11321_v47  ;;  %vm11344_vm7 = vmmov %vm11339_vm1 }
0x16fa   :  { %8667 = vmatmul.mubr.msk.f32.gmra.mrb[64].mxu1 %vm11324_vm9, %v11323_v42  ;;  %vm11346_vm9 = vmmov %vm11320_vm0 }
0x16fb   :  { %8693 = vmatprep.mubr.msk.f32.mxu1 %vm11326_vm11, %v11325_v50  ;;  %vm11348_vm11 = vmmov %vm11320_vm0 }
0x17c9   :  { %v8665_v48 = vpop.f32.mrb[62].mxu1 }
0x17ca   :  { %v5610_v49 = vadd.f32 %v8665_v48, %v11327_v21  ;;  %v5590_v0 = vpop.f32.mrb[63].mxu1  ;;  %v11366_v21 = vld [vmem:[#allocation46_spill] sm:$0xff] }
0x17cb   :  { %v5609_v63 = vadd.f32 %v5590_v0, %v11328_v51  ;;  %v11367_v51 = vld [vmem:[#allocation47_spill] sm:$0xff] }
0x17cc   :  { %v5614_v40 = vmax.f32 %v5610_v49, 0.0 }
0x17cd   :  { %v5613_v36 = vmax.f32 %v5609_v63, 0.0  ;;  %v8668_v22 = vpop.f32.mrb[64].mxu1 }
0x17ce   :  { %v5612_v5 = vadd.f32 %v8668_v22, %v11329_v23  ;;  %v5600_v28 = vpop.f32.mrb[65].mxu1  ;;  %v11375_v22 = vld [vmem:[#allocation48_spill] sm:$0xff] }
0x17cf   :  { %v5611_v10 = vadd.f32 %v5600_v28, %v11330_v43  ;;  %8671 = vmatprep.mubr.msk.f32.mxu0 %vm11331_vm3, %v5613_v36  ;;  %v9184_v7 = vpack.c.bf16 %v5614_v40, %v5613_v36  ;;  %vm11350_vm3 = vmmov %vm11320_vm0 }
0x17d0   :  { %v5616_v13 = vmax.f32 %v5612_v5, 0.0  ;;  %8672 = vmatmul.mubr.msk.f32.vlgmr.msra.gmra.mrb[60].mxu0 %vm11332_vm8, %v5614_v40  ;;  %vm11352_vm8 = vmmov %vm11320_vm0 }
0x17d1   :  { %v5615_v26 = vmax.f32 %v5611_v10, 0.0  ;;  %9185 = vmatprep.subr.bf16.mxu1 %v9184_v7  ;;  %8678 = vmatpush3.msk.msra.mxu0 %vm11179_vm5, %v11184_v32  ;;  %vm11341_vm5 = vmmov %vm11320_vm0 }
0x17d2   :  { %9187 = vmatpush3.bf16.msra.mxu1 %v9184_v7  ;;  %8727 = vmatprep.subr.msk.mxu0 %vm11334_vm6, %v11184_v32 }
0x17d3   :  { %8674 = vmatprep.mubr.msk.f32.mxu0 %vm11335_vm4, %v5615_v26  ;;  %v9188_v34 = vpack.c.bf16 %v5616_v13, %v5615_v26  ;;  %vm11356_vm4 = vmmov %vm11320_vm0 }
0x17d4   :  { %8675 = vmatmul.mubr.msk.f32.gmra.mrb[62].mxu0 %vm11336_vm10, %v5616_v13  ;;  %vm11359_vm10 = vmmov %vm11320_vm0 }
0x17d5   :  { %8679 = vmatprep.mubr.msk.f32.mxu0 %vm11337_vm14, %v5613_v36  ;;  %9189 = vmatprep.subr.bf16.mxu1 %v9188_v34  ;;  %vm11361_vm14 = vmmov %vm11320_vm0 }
0x17d6   :  { %9191 = vmatpush3.bf16.msra.mxu1 %v9188_v34 }
0x17d8   :  { %8680 = vmatmul.mubr.msk.f32.vlgmr.msra.gmra.mrb[64].mxu0 %vm11338_vm2, %v5614_v40  ;;  %vm11363_vm2 = vmmov %vm11320_vm0 }
0x17d9   :  { %8682 = vmatprep.mubr.msk.f32.mxu0 %vm11339_vm1, %v5615_v26  ;;  %8694 = vmatmul.mubr.msk.f32.vlgmr.msra.gmra.mrb[66].mxu1 %vm11341_vm5, %v11340_v8  ;;  %vm11368_vm5 = vmmov %vm11339_vm1 }
0x17da   :  { %8696 = vmatprep.mubr.msk.f32.mxu1 %vm11320_vm0, %v11342_v33  ;;  %8728 = vmatpush3.msk.msra.mxu0 %vm11334_vm6, %v11184_v32  ;;  %vm11354_vm6 = vmmov %vm11320_vm0  ;;  %v11377_v33 = vld [vmem:[#allocation49_spill] sm:$0xff] }
0x17db   :  { %8735 = vmatprep.subr.msk.mxu0 %vm11186_vm12, %v11184_v32  ;;  %vm11369_vm0 = vmmov %vm11339_vm1 }
0x17dc   :  { %8683 = vmatmul.mubr.msk.f32.gmra.mrb[66].mxu0 %vm11344_vm7, %v5616_v13  ;;  %vm11370_vm7 = vmmov %vm11369_vm0 }
0x17dd   :  { %8697 = vmatmul.mubr.msk.f32.gmra.mrb[68].mxu1 %vm11346_vm9, %v11345_v41  ;;  %vm11371_vm9 = vmmov %vm11369_vm0  ;;  %v11381_v41 = vld [vmem:[#allocation51_spill] sm:$0xff] }
0x17de   :  { %8707 = vmatprep.mubr.msk.f32.mxu1 %vm11348_vm11, %v11347_v24  ;;  %vm11372_vm11 = vmmov %vm11369_vm0  ;;  %v11383_v24 = vld [vmem:[#allocation52_spill] sm:$0xff] }
0x18a3   :  { %v8673_v38 = vpop.f32.mrb[60].mxu0 }
0x18a4   :  { %v5695_v30 = vpop.f32.mrb[61].mxu0 }
0x18a5   :  { %v9192_v18 = vpack.c.bf16 %v8673_v38, %v5695_v30  ;;  %v11385_v38 = vld [vmem:[#allocation53_spill] sm:$0xff]  ;;  %v11386_v30 = vld [vmem:[#allocation54_spill] sm:$0xff] }
0x18a7   :  { %v8676_v9 = vpop.f32.mrb[62].mxu0  ;;  %9193 = vmatprep.subr.bf16.mxu1 %v9192_v18 }
0x18a8   :  { %v5705_v25 = vpop.f32.mrb[63].mxu0  ;;  %9195 = vmatpush3.bf16.msra.mxu1 %v9192_v18  ;;  %v11388_v18 = vld [vmem:[#allocation55_spill] sm:$0xff] }
0x18a9   :  { %v9196_v52 = vpack.c.bf16 %v8676_v9, %v5705_v25 }
0x18ab   :  { %v8681_v55 = vpop.f32.mrb[64].mxu0  ;;  %9197 = vmatprep.subr.bf16.mxu1 %v9196_v52 }
0x18ac   :  { %v5780_v58 = vpop.f32.mrb[65].mxu0  ;;  %9199 = vmatpush3.bf16.msra.mxu1 %v9196_v52 }
0x18ad   :  { %v9200_v4 = vpack.c.bf16 %v8681_v55, %v5780_v58 }
0x18af   :  { %v8684_v56 = vpop.f32.mrb[66].mxu0  ;;  %8708 = vmatmul.mubr.msk.f32.vlgmr.msra.gmra.mrb[66].mxu1 %vm11350_vm3, %v11349_v3  ;;  %9201 = vmatprep.subr.bf16.mxu1 %v9200_v4  ;;  %vm11373_vm3 = vmmov %vm11369_vm0 }
0x18b0   :  { %v5790_v17 = vpop.f32.mrb[67].mxu0  ;;  %9203 = vmatpush3.bf16.msra.mxu1 %v9200_v4  ;;  %8710 = vmatprep.mubr.msk.f32.mxu1 %vm11352_vm8, %v11351_v57  ;;  %vm11374_vm8 = vmmov %vm11369_vm0 }
0x18b1   :  { %v9204_v35 = vpack.c.bf16 %v8684_v56, %v5790_v17 }
0x18b3   :  { %8711 = vmatmul.mubr.msk.f32.gmra.mrb[68].mxu1 %vm11354_vm6, %v11353_v1  ;;  %9205 = vmatprep.subr.bf16.mxu1 %v9204_v35  ;;  %vm11376_vm6 = vmmov %vm11363_vm2 }
0x18b4   :  { %9207 = vmatpush3.bf16.msra.mxu1 %v9204_v35  ;;  %8721 = vmatprep.mubr.msk.f32.mxu1 %vm11356_vm4, %v11355_v11  ;;  %vm11380_vm4 = vmmov %vm11363_vm2 }
0x18b5   :  { %8771 = vmatprep.subr.msk.mxu1 %vm3289_vm15, %v11357_v60 }
0x18b7   :  { %8722 = vmatmul.mubr.msk.f32.vlgmr.msra.gmra.mrb[66].mxu1 %vm11359_vm10, %v11358_v14  ;;  %vm11382_vm10 = vmmov %vm11363_vm2  ;;  %v6827_v14 = vld [vmem:[%s10975_s20 + $0x8] sm:$0xff] }
0x18b8   :  { %8724 = vmatprep.mubr.msk.f32.mxu1 %vm11361_vm14, %v11360_v15  ;;  %8772 = vmatpush3.msk.msra.mxu1 %vm3289_vm15, %v11357_v60  ;;  %vm11384_vm14 = vmmov %vm11363_vm2 }
0x18b9   :  { %8779 = vmatprep.subr.msk.mxu1 %vm3289_vm15, %v10411_v54 }
0x18bb   :  { %8725 = vmatmul.mubr.msk.f32.gmra.mrb[68].mxu1 %vm11363_vm2, %v11362_v16 }
0x198a   :  { %v8723_v20 = vpop.f32.mrb[66].mxu1 }
0x198b   :  { %v6059_v29 = vadd.f32 %v8723_v20, %v11364_v31  ;;  %v6035_v6 = vpop.f32.mrb[67].mxu1 }
0x198c   :  { %v6058_v47 = vadd.f32 %v6035_v6, %v11365_v46  ;;  %v6828_v6 = vld [vmem:[%s10975_s20 + $0x10] sm:$0xff]  ;;  %v6829_v46 = vld [vmem:[%s10975_s20 + $0x18] sm:$0xff] }
0x198d   :  { %v6063_v48 = vmax.f32 %v6059_v29, 0.0 }
0x198e   :  { %v6062_v42 = vmax.f32 %v6058_v47, 0.0  ;;  %v8726_v50 = vpop.f32.mrb[68].mxu1 }
0x198f   :  { %v6061_v49 = vadd.f32 %v8726_v50, %v11366_v21  ;;  %v6045_v0 = vpop.f32.mrb[69].mxu1 }
0x1990   :  { %v6060_v63 = vadd.f32 %v6045_v0, %v11367_v51  ;;  %8729 = vmatprep.mubr.msk.f32.mxu0 %vm11339_vm1, %v6062_v42  ;;  %vm11387_vm1 = vmmov %vm11363_vm2  ;;  %v6831_v0 = vld [vmem:[%s10975_s20 + $0x28] sm:$0xff] }
0x1991   :  { %8730 = vmatmul.mubr.msk.f32.vlgmr.msra.gmra.mrb[68].mxu0 %vm11368_vm5, %v6063_v48  ;;  %v6065_v36 = vmax.f32 %v6061_v49, 0.0  ;;  %vm11389_vm5 = vmmov %vm11387_vm1  ;;  %v6830_v49 = vld [vmem:[%s10975_s20 + $0x20] sm:$0xff] }
0x1992   :  { %v6064_v40 = vmax.f32 %v6060_v63, 0.0  ;;  %8736 = vmatpush3.msk.msra.mxu0 %vm11186_vm12, %v11184_v32  ;;  %vm11378_vm12 = vmmov %vm11363_vm2  ;;  %v6832_v63 = vld [vmem:[%s10975_s20 + $0x30] sm:$0xff] }
0x1994   :  { %8732 = vmatprep.mubr.msk.f32.mxu0 %vm11369_vm0, %v6064_v40  ;;  %vm11390_vm0 = vcmask 31744  }
0x1995   :  { %8733 = vmatmul.mubr.msk.f32.gmra.mrb[70].mxu0 %vm11370_vm7, %v6065_v36  ;;  %vm11391_vm7 = vmmov %vm11390_vm0 }
0x1996   :  { %8737 = vmatprep.mubr.msk.f32.mxu0 %vm11371_vm9, %v6062_v42  ;;  %vm11392_vm9 = vmmov %vm11390_vm0 }
0x1999   :  { %8738 = vmatmul.mubr.msk.f32.vlgmr.msra.gmra.mrb[72].mxu0 %vm11372_vm11, %v6063_v48  ;;  %vm11393_vm11 = vmmov %vm11390_vm0  ;;  %v9246_v48 = vpack.c.bf16 %v6829_v46, %v6828_v6 }
0x199a   :  { %8740 = vmatprep.mubr.msk.f32.mxu0 %vm11373_vm3, %v6064_v40  ;;  %vm11394_vm3 = vmmov %vm11390_vm0  ;;  %v6833_v40 = vld [vmem:[%s10975_s20 + $0x38] sm:$0xff] }
0x199d   :  { %8741 = vmatmul.mubr.msk.f32.gmra.mrb[74].mxu0 %vm11374_vm8, %v6065_v36  ;;  %vm11395_vm8 = vmmov %vm11390_vm0  ;;  %v11400_v36 = vld [vmem:[#allocation57_spill] sm:$0xff] }
0x199e   :  { %8751 = vmatprep.mubr.msk.f32.mxu0 %vm11376_vm6, %v11375_v22  ;;  %vm11396_vm6 = vmmov %vm11387_vm1  ;;  %v9252_v22 = vpack.c.bf16 %v6833_v40, %v6832_v63 }
0x1a64   :  { %v8731_v23 = vpop.f32.mrb[68].mxu0 }
0x1a65   :  { %v6144_v5 = vpop.f32.mrb[69].mxu0 }
0x1a66   :  { %v9216_v28 = vpack.c.bf16 %v8731_v23, %v6144_v5  ;;  %v6825_v23 = vld [vmem:[%s11402_s14] sm:$0x3] }
0x1a67   :  { %v6915_v5 = vld [vmem:[%s10977_s22] sm:$0xff] }
0x1a68   :  { %v8734_v32 = vpop.f32.mrb[70].mxu0 }
0x1a69   :  { %v6154_v43 = vpop.f32.mrb[71].mxu0 }
0x1a6a   :  { %v9220_v10 = vpack.c.bf16 %v8734_v32, %v6154_v43  ;;  %v6917_v43 = vld [vmem:[%s10977_s22 + $0x10] sm:$0xff] }
0x1a6c   :  { %v8739_v7 = vpop.f32.mrb[72].mxu0 }
0x1a6d   :  { %v6229_v13 = vpop.f32.mrb[73].mxu0 }
0x1a6e   :  { %v9208_v26 = vpack.c.bf16 %v8739_v7, %v6229_v13  ;;  %v6919_v13 = vld [vmem:[%s10977_s22 + $0x20] sm:$0xff] }
0x1a70   :  { %v8742_v27 = vpop.f32.mrb[74].mxu0  ;;  %9209 = vmatprep.subr.bf16.mxu0 %v9208_v26 }
0x1a71   :  { %v6239_v34 = vpop.f32.mrb[75].mxu0  ;;  %9211 = vmatpush3.bf16.msra.mxu0 %v9208_v26  ;;  %v6920_v26 = vld [vmem:[%s10977_s22 + $0x28] sm:$0xff] }
0x1a72   :  { %v9212_v8 = vpack.c.bf16 %v8742_v27, %v6239_v34  ;;  %v9261_v27 = vpack.c.bf16 %v6920_v26, %v6919_v13  ;;  %v6921_v34 = vld [vmem:[%s10977_s22 + $0x30] sm:$0xff] }
0x1a74   :  { %9213 = vmatprep.subr.bf16.mxu0 %v9212_v8 }
0x1a75   :  { %9215 = vmatpush3.bf16.msra.mxu0 %v9212_v8  ;;  %v6922_v8 = vld [vmem:[%s10977_s22 + $0x38] sm:$0xff] }
0x1a76   :  { %9217 = vmatprep.subr.bf16.mxu0 %v9216_v28 }
0x1a78   :  { %8752 = vmatmul.mubr.msk.f32.vlgmr.msra.gmra.mrb[76].mxu0 %vm11378_vm12, %v11377_v33  ;;  %vm11397_vm12 = vmmov %vm11390_vm0  ;;  %v9264_v33 = vpack.c.bf16 %v6922_v8, %v6921_v34 }
0x1a79   :  { %9219 = vmatpush3.bf16.msra.mxu0 %v9216_v28  ;;  %8754 = vmatprep.mubr.msk.f32.mxu0 %vm11380_vm4, %v11379_v39  ;;  %vm11398_vm4 = vmmov %vm11390_vm0  ;;  %v6916_v28 = vld [vmem:[%s10977_s22 + $0x8] sm:$0xff] }
0x1a7a   :  { %9221 = vmatprep.subr.bf16.mxu0 %v9220_v10  ;;  %v9255_v32 = vpack.c.bf16 %v6916_v28, %v6915_v5 }
0x1a7c   :  { %8755 = vmatmul.mubr.msk.f32.gmra.mrb[78].mxu0 %vm11382_vm10, %v11381_v41  ;;  %vm11399_vm10 = vmmov %vm11387_vm1 }
0x1a7d   :  { %9223 = vmatpush3.bf16.msra.mxu0 %v9220_v10  ;;  %8765 = vmatprep.mubr.msk.f32.mxu0 %vm11384_vm14, %v11383_v24  ;;  %vm11401_vm14 = vmmov %vm11387_vm1  ;;  %v6918_v10 = vld [vmem:[%s10977_s22 + $0x18] sm:$0xff] }
0x1a7e   :  { %9224 = vmatprep.subr.bf16.mxu0 %v11232_v62  ;;  %v9258_v7 = vpack.c.bf16 %v6918_v10, %v6917_v43 }
0x1a80   :  { %8766 = vmatmul.mubr.msk.f32.vlgmr.msra.gmra.mrb[76].mxu0 %vm11363_vm2, %v11385_v38  ;;  %vm11403_vm2 = vcmask 523264   ;;  %v3695_v38 = vpop.permute.xlu1 %3694 }
0x1a81   :  { %8768 = vmatprep.mubr.msk.f32.mxu0 %vm11387_vm1, %v11386_v30  ;;  %vm6823_vm1 = vcmask 1040384  }
0x1a84   :  { %8769 = vmatmul.mubr.msk.f32.gmra.mrb[78].mxu0 %vm11389_vm5, %v11388_v18  ;;  %v3700_v18 = vrot.slane %v3695_v38, %v9831_v12  ;;  %vm11404_vm5 = vmmov %vm11403_vm2  ;;  %v7004_v12 = vld [vmem:[%s10979_s24] sm:$0xff] }
0x1a85   :  { %8795 = vmatprep.mubr.msk.f32.mxu0 %vm11153_vm13, %v11237_v53 }
0x1b53   :  { %v8767_v9 = vpop.f32.mrb[76].mxu0 }
0x1b54   :  { %v6419_v25 = vadd.f32 %v8767_v9, %v10415_v61  ;;  %v6399_v52 = vpop.f32.mrb[77].mxu0 }
0x1b55   :  { %v6418_v55 = vadd.f32 %v6399_v52, %v10417_v45  ;;  %v3701_v52 = vadd.f32 %v3700_v18, %v10546_v2  ;;  %v7005_v2 = vld [vmem:[%s10979_s24 + $0x8] sm:$0xff] }
0x1b56   :  { %v6423_v58 = vmax.f32 %v6419_v25, 0.0 }
0x1b57   :  { %v6422_v4 = vmax.f32 %v6418_v55, 0.0  ;;  %v8770_v56 = vpop.f32.mrb[78].mxu0 }
0x1b58   :  { %v6421_v3 = vadd.f32 %v8770_v56, %v10421_v44  ;;  %v6409_v17 = vpop.f32.mrb[79].mxu0 }
0x1b59   :  { %v9225_v57 = vpack.c.bf16 %v6423_v58, %v6422_v4  ;;  %v6420_v35 = vadd.f32 %v6409_v17, %v10423_v37  ;;  %8773 = vmatprep.mubr.msk.f32.mxu1 %vm11390_vm0, %v6422_v4  ;;  %vm11405_vm0 = vcmask 130048  }
0x1b5a   :  { %v6425_v1 = vmax.f32 %v6421_v3, 0.0  ;;  %8774 = vmatmul.mubr.msk.f32.vlgmr.msra.gmra.mrb[70].mxu1 %vm11391_vm7, %v6423_v58  ;;  %vm11406_vm7 = vmmov %vm11394_vm3 }
0x1b5b   :  { %v6424_v11 = vmax.f32 %v6420_v35, 0.0  ;;  %9226 = vmatpush3.bf16.msra.mxu0 %v9225_v57  ;;  %8780 = vmatpush3.msk.msra.mxu1 %vm3289_vm15, %v10411_v54  ;;  %v9267_v35 = vpack.c.bf16 %v7005_v2, %v7004_v12 }
0x1b5c   :  { %9227 = vmatprep.subr.bf16.mxu0 %v11232_v62  ;;  %9230 = vmatprep.subr.bf16.mxu1 %v11232_v62 }
0x1b5d   :  { %v9228_v61 = vpack.c.bf16 %v6425_v1, %v6424_v11  ;;  %8776 = vmatprep.mubr.msk.f32.mxu1 %vm11392_vm9, %v6424_v11 }
0x1b5e   :  { %8777 = vmatmul.mubr.msk.f32.gmra.mrb[72].mxu1 %vm11393_vm11, %v6425_v1 }
0x1b5f   :  { %8781 = vmatprep.mubr.msk.f32.mxu1 %vm11394_vm3, %v6422_v4  ;;  %9229 = vmatpush3.bf16.msra.mxu0 %v9228_v61 }
0x1b60   :  { %9236 = vmatprep.subr.bf16.mxu0 %v11232_v62 }
0x1b62   :  { %8782 = vmatmul.mubr.msk.f32.vlgmr.msra.gmra.mrb[74].mxu1 %vm11395_vm8, %v6423_v58  ;;  %8796 = vmatmul.mubr.msk.f32.vlgmr.msra.gmra.mrb[80].mxu0 %vm11396_vm6, %v10445_v19  ;;  %v6826_v19 = vld [vmem:[%s10975_s20] sm:$0xff] }
0x1b63   :  { %8784 = vmatprep.mubr.msk.f32.mxu1 %vm11397_vm12, %v6424_v11  ;;  %8817 = vmatprep.mubr.msk.f32.mxu0 %vm11153_vm13, %v11237_v53  ;;  %v9243_v20 = vpack.c.bf16 %v6827_v14, %v6826_v19  ;;  %v7548_v58 = vld [vmem:[%s10976_s21] ss:$0 sm:$0xff] }
0x1b66   :  { %8785 = vmatmul.mubr.msk.f32.gmra.mrb[76].mxu1 %vm11398_vm4, %v6425_v1  ;;  %v7550_v1 = vld [vmem:[%s10978_s23] ss:$0 sm:$0xff] }
0x1b67   :  { %8806 = vmatprep.mubr.msk.f32.mxu1 %vm11153_vm13, %v11237_v53 }
0x1c2d   :  { %v8775_v44 = vpop.f32.mrb[70].mxu1 }
0x1c2e   :  { %v6504_v37 = vpop.f32.mrb[71].mxu1 }
0x1c2f   :  { %v9231_v54 = vpack.c.bf16 %v8775_v44, %v6504_v37 }
0x1c31   :  { %v8778_v45 = vpop.f32.mrb[72].mxu1  ;;  %9232 = vmatpush3.bf16.msra.mxu1 %v9231_v54  ;;  %v7087_v54 = vld [vmem:[%s10981_s26] sm:$0xf]  ;;  %s9338_s26 = scalar_lea.vmem %s7180_s1, 32 }
0x1c32   :  { %v6514_v60 = vpop.f32.mrb[73].mxu1  ;;  %9233 = vmatprep.subr.bf16.mxu1 %v11232_v62  ;;  %p9339_p0 = scmp.ne.s32.totalorder %s7180_s1, %s9338_s26  ;;  %p9344_p2 = scmp.lt.s32.totalorder %s9338_s26, %s9338_s26 }
0x1c33   :  { %v9234_v15 = vpack.c.bf16 %v8778_v45, %v6514_v60  ;;  %v7552_v45 = vld [vmem:[%s10980_s25] ss:$0 sm:$0xff] }
0x1c34   :  { %p9345_p3 = por %p9344_p2, %p9343_p1 }
0x1c35   :  { %v8783_v16 = vpop.f32.mrb[74].mxu1  ;;  %9235 = vmatpush3.bf16.msra.mxu1 %v9234_v15  ;;  %v6674_v31 = vpop.f32.mrb[80].mxu0 }
0x1c36   :  { %v6589_v29 = vpop.f32.mrb[75].mxu1  ;;  %9242 = vmatprep.subr.bf16.mxu1 %v11232_v62  ;;  %v8797_v47 = vpop.f32.mrb[81].mxu0  ;;  %p9346_p4 = pnand %p9345_p3, %p9339_p0 }
0x1c37   :  { %v9237_v42 = vpack.c.bf16 %v8783_v16, %v6589_v29 }
0x1c38   :  { %8807 = vmatmul.mubr.msk.f32.vlgmr.msra.gmra.mrb[78].mxu1 %vm11399_vm10, %v10455_v59  ;;  %v9249_v59 = vpack.c.bf16 %v6831_v0, %v6830_v49 }
0x1c39   :  { %v8786_v50 = vpop.f32.mrb[76].mxu1  ;;  %9238 = vmatpush3.bf16.msra.mxu0 %v9237_v42  ;;  %9244 = vmatpush3.bf16.msra.mxu1 %v9243_v20 }
0x1c3a   :  { %v6599_v21 = vpop.f32.mrb[77].mxu1  ;;  %9239 = vmatprep.subr.bf16.mxu0 %v11232_v62  ;;  %9245 = vmatprep.subr.bf16.mxu1 %v11232_v62 }
0x1c3b   :  { %v9240_v51 = vpack.c.bf16 %v8786_v50, %v6599_v21  ;;  %8836 = vmatprep.mubr.msk.f32.mxu1 %vm11153_vm13, %v11237_v53 }
0x1c3d   :  { %9241 = vmatpush3.bf16.msra.mxu0 %v9240_v51  ;;  %9247 = vmatpush3.bf16.msra.mxu1 %v9246_v48 }
0x1c3e   :  { %9248 = vmatprep.subr.bf16.mxu1 %v11232_v62  ;;  %9254 = vmatprep.subr.bf16.mxu0 %v11232_v62 }
0x1c40   :  { %8818 = vmatmul.mubr.msk.f32.vlgmr.msra.gmra.mrb[82].mxu0 %vm11401_vm14, %v11400_v36 }
0x1c41   :  { %9250 = vmatpush3.bf16.msra.mxu1 %v9249_v59  ;;  %8855 = vmatprep.mubr.msk.f32.mxu0 %vm11153_vm13, %v11237_v53 }
0x1c42   :  { %9251 = vmatprep.subr.bf16.mxu1 %v11232_v62  ;;  %9256 = vmatpush3.bf16.msra.mxu0 %v9255_v32 }
0x1c43   :  { %9257 = vmatprep.subr.bf16.mxu0 %v11232_v62 }
0x1c45   :  { %9253 = vmatpush3.bf16.msra.mxu1 %v9252_v22 }
0x1c46   :  { %9266 = vmatprep.subr.bf16.mxu1 %v11232_v62  ;;  %9259 = vmatpush3.bf16.msra.mxu0 %v9258_v7 }
0x1c47   :  { %9260 = vmatprep.subr.bf16.mxu0 %v11232_v62 }
0x1c48   :  { %8837 = vmatmul.mubr.msk.f32.vlgmr.msra.gmra.mrb[80].mxu1 %vm11403_vm2, %v6825_v23 }
0x1c49   :  { %8862 = vmatprep.mubr.msk.f32.mxu1 %vm11153_vm13, %v11237_v53  ;;  %9268 = vmatpush3.bf16.msra.mxu1 %v9267_v35 }
0x1c4a   :  { %9262 = vmatpush3.bf16.msra.mxu0 %v9261_v27  ;;  %8865 = vmatprep.subr.mxu1 %v11237_v53 }
0x1c4b   :  { %9263 = vmatprep.subr.bf16.mxu0 %v11232_v62 }
0x1c4e   :  { %9265 = vmatpush3.bf16.msra.mxu0 %v9264_v33 }
0x1d0b   :  { %v6744_v39 = vpop.f32.mrb[78].mxu1 }
0x1d0c   :  { %v6745_v41 = vadd.f32 %v6744_v39, %v6674_v31  ;;  %v8808_v24 = vpop.f32.mrb[79].mxu1 }
0x1d13   :  { %v6814_v30 = vpop.f32.mrb[82].mxu0 }
0x1d14   :  { %v6818_v9 = vadd.f32 %v6814_v30, %v6745_v41  ;;  %v8819_v25 = vpop.f32.mrb[83].mxu0 }
0x1d16   :  { %v6819_v62 = vadd.f32 %v6818_v9, %v3700_v18 }
0x1d18   :  { %v6821_v55 = vrot.slane %v6819_v62, 7 }
0x1d1a   :  { %v6824_v4 = vsel %vm6823_vm1, %v3701_v52, %v6821_v55 }
0x1d1b   :  { %v6910_v56 = vpop.f32.mrb[80].mxu1 }
0x1d1c   :  { %v6911_v3 = vadd.f32 %v7548_v58, %v6910_v56  ;;  %v8838_v17 = vpop.f32.mrb[81].mxu1 }
0x1d1e   :  { %v6914_v57 = vmax.f32 %v6911_v3, 0.0 }
0x1d20   :  { %8856 = vmatmul.mubr.msk.f32.vlgmr.msra.gmra.mrb[84].mxu0 %vm11404_vm5, %v6914_v57 }
0x1df3   :  { %v6999_v11 = vpop.f32.mrb[84].mxu0 }
0x1df4   :  { %v7000_v61 = vadd.f32 %v7550_v1, %v6999_v11  ;;  %v8857_v44 = vpop.f32.mrb[85].mxu0 }
0x1df6   :  { %v7003_v37 = vmax.f32 %v7000_v61, 0.0 }
0x1df8   :  { %8863 = vmatmul.mubr.msk.f32.vlgmr.msra.gmra.mrb[82].mxu1 %vm11405_vm0, %v7003_v37 }
0x1df9   :  { %8867 = vmatprep.mubr.msk.f32.mxu1 %vm11153_vm13, %v11237_v53  ;;  %8866 = vmatpush3.msk.msra.mxu1 %vm3289_vm15, %v7087_v54  ;;  %v7554_v53 = vld [vmem:[%s10982_s27] ss:$0 sm:$0xff]  ;;  %vm7171_vm13 = vcmask 58368  }
0x1ecb   :  { %v7082_v60 = vpop.f32.mrb[82].mxu1 }
0x1ecc   :  { %v7083_v19 = vadd.f32 %v7552_v45, %v7082_v60  ;;  %v8864_v14 = vpop.f32.mrb[83].mxu1 }
0x1ece   :  { %v7086_v15 = vadd.f32 %v7083_v19, %v6824_v4 }
0x1ed0   :  { %8868 = vmatmul.mubr.msk.f32.vlgmr.msra.gmra.mrb[84].mxu1 %vm11406_vm7, %v7086_v15 }
0x1fa3   :  { %v7167_v16 = vpop.f32.mrb[84].mxu1 }
0x1fa4   :  { %v7168_v20 = vadd.f32 %v7554_v53, %v7167_v16  ;;  %v8869_v31 = vpop.f32.mrb[85].mxu1 }
0x1fa6   :  { %7172 = vst.msk [vmem:[#allocation3] sm:$0x3] %vm7171_vm13, %v7168_v20 }
0x1fa7   :  { %9349 = shalt.err (!%p9346_p4)
}
0x1fa8   :  { %s9350_s9 = scalar_lea.hbm %s10983_s28, 32 }
0x1fa9   :  { %p9351_p5 = scmp.ne.s32.totalorder %s10983_s28, %s9350_s9  ;;  %p9354_p6 = scmp.lt.u32.totalorder %s9350_s9, %s10983_s28 }
0x1fab   :  { %p9356_p7 = pnand %p9354_p6, %p9351_p5 }
0x1fad   :  { %9359 = shalt.err (!%p9356_p7)
}
0x1fae   :  { %7182 = dma.vmem_to_hbm [thread:$0]  %s7180_s1, 32, %s10983_s28, [#allocation4]  }
0x1faf   :  { %9360 = dma.done.wait [#allocation4], 32  }
0x1fb0   :  { %9361 = vsyncadd [#allocation4], 4294967264 }
0x1fb1   :  { %7186 = vsyncpa [#allocation4], 1 }

</bundles_post_ra>
